<compile_context>
chip_gen: v5e
topology: v5e:2x2
jax: 0.10.0
libtpu: 0.0.40
codegen_flags: <defaults>
</compile_context>

<pallas_src>
import functools

import jax
import jax.numpy as jnp
import numpy as np
from jax.experimental import pallas as pl
from jax.experimental.pallas import tpu as pltpu

POOLS = (1, 3, 5, 7)
BN_EPS = 1e-5
_NEG_BIG = 1e30          # finite "minus infinity" for the additive pool mask
_POOL_CHUNK = 16         # rows of the pool mask reduced per chunk


# --------------------------------------------------------------------------
# Fused ASSC kernel: Tq/Tk conv + pyramid pool + attention + dilated dynamic
# conv, one grid step per (path, batch).  Also emits the target slab.
# --------------------------------------------------------------------------
def assc_kernel(nb_ref, tg_ref, wq_ref, bq_ref, wk_ref, bk_ref, cond_ref,
                pmask_ref, rvalid_ref, bmask_ref, cal_ref, tslab_ref,
                *, C, H, W, rate, L_pad):
    HW = H * W
    nb = nb_ref[0, 0]                                   # (C, HW) f32
    tg = tg_ref[0]                                      # (C, HW) f32

    def shifted(x, dy, dx, dil):
        # tap[p] = x[p + (dy*W + dx)*dil] (circular shift on the lane axis;
        # wrapped lanes are either zeroed by bmask or excluded from every
        # pyramid-pool window, so they never contribute).
        d = (dy * W + dx) * dil
        if d == 0:
            return x
        return pltpu.roll(x, (-d) % HW, 1)

    def conv3x3(x, w_taps):
        # 'same'-style 3x3 conv as 9 shifted (C,C)@(C,HW) bf16 MXU matmuls.
        acc = jnp.zeros((C, HW), jnp.float32)
        for ky in range(3):
            for kx in range(3):
                t = ky * 3 + kx
                tap = shifted(x, ky - 1, kx - 1, 1).astype(jnp.bfloat16)
                acc = acc + jnp.dot(w_taps[0, t], tap,
                                    preferred_element_type=jnp.float32)
        return acc                                       # (C, HW) f32

    def pyramid(conv):
        # Pyramid adaptive max-pool: chunked masked lane-reduce (additive
        # mask: 0 inside the window, -1e30 outside / padded rows).
        parts = []
        for l0 in range(0, L_pad, _POOL_CHUNK):
            m = pmask_ref[l0:l0 + _POOL_CHUNK, :]        # (chunk, HW)
            parts.append(jnp.max(conv[:, None, :] + m[None, :, :], axis=-1))
        return jnp.concatenate(parts, axis=-1)           # (C, L_pad)

    rv = rvalid_ref[...]                                 # (1, L_pad) 1/0
    q = (pyramid(conv3x3(nb, wq_ref)) + bq_ref[0]) * rv  # (C, L_pad)
    k = (pyramid(conv3x3(tg, wk_ref)) + bk_ref[0]) * rv

    att = jax.nn.sigmoid(
        jax.lax.dot_general(q.astype(jnp.bfloat16), k.astype(jnp.bfloat16),
                            (((1,), (1,)), ((), ())),
                            preferred_element_type=jnp.float32))   # (C, C)

    # Dilated dynamic conv: (att @ cond) @ patch == att @ (cond @ patch).
    inner = jnp.zeros((C, HW), jnp.float32)
    for ky in range(3):
        for kx in range(3):
            t = ky * 3 + kx
            tap = shifted(nb, ky - 1, kx - 1, rate) * bmask_ref[t]
            inner = inner + jnp.dot(cond_ref[0, t], tap.astype(jnp.bfloat16),
                                    preferred_element_type=jnp.float32)
    cal = jnp.dot(att.astype(jnp.bfloat16), inner.astype(jnp.bfloat16),
                  preferred_element_type=jnp.float32)    # (C, HW)

    cal_ref[0] = cal.astype(jnp.bfloat16)
    # Channel-major target slab (same values for both paths; identical
    # rewrites are benign) -> removes the XLA transpose+concat downstream.
    tslab_ref[...] = tg.astype(jnp.bfloat16)


def _vmem_limit_assc(C, HW, L_pad):
    blk = (2 * C * HW * 4                 # nb + tg blocks (f32)
           + 3 * 9 * C * C * 2            # wq / wk / cond taps (bf16)
           + 2 * C * 4                    # biases
           + L_pad * HW * 4 + L_pad * 4 + 9 * HW * 4    # masks
           + 2 * C * HW * 2)              # cal + target-slab out blocks (bf16)
    inter = C * _POOL_CHUNK * HW * 4 + 16 * C * HW * 4  # live intermediates
    est = 2 * blk + inter                  # double-buffered blocks + temps
    return int(min(max(est, 16 * 1024 * 1024), 32 * 1024 * 1024))


def assc_fused(nb_flat, tgt_flat, wq, bq, wk, bk, cond,
               pool_addmask, row_valid, bmask, rate, H, W):
    P, N, C, HW = nb_flat.shape
    L_pad = pool_addmask.shape[0]
    kern = functools.partial(assc_kernel, C=C, H=H, W=W, rate=rate, L_pad=L_pad)
    return pl.pallas_call(
        kern,
        out_shape=(jax.ShapeDtypeStruct((P, C, N * HW), jnp.bfloat16),
                   jax.ShapeDtypeStruct((C, N * HW), jnp.bfloat16)),
        grid=(P, N),
        in_specs=[
            pl.BlockSpec((1, 1, C, HW), lambda p, n: (p, n, 0, 0)),
            pl.BlockSpec((1, C, HW), lambda p, n: (n, 0, 0)),
            pl.BlockSpec((1, 9, C, C), lambda p, n: (p, 0, 0, 0)),
            pl.BlockSpec((1, C, 1), lambda p, n: (p, 0, 0)),
            pl.BlockSpec((1, 9, C, C), lambda p, n: (p, 0, 0, 0)),
            pl.BlockSpec((1, C, 1), lambda p, n: (p, 0, 0)),
            pl.BlockSpec((1, 9, C, C), lambda p, n: (p, 0, 0, 0)),
            pl.BlockSpec((L_pad, HW), lambda p, n: (0, 0)),
            pl.BlockSpec((1, L_pad), lambda p, n: (0, 0)),
            pl.BlockSpec((9, 1, HW), lambda p, n: (0, 0, 0)),
        ],
        out_specs=(pl.BlockSpec((1, C, HW), lambda p, n: (p, 0, n)),
                   pl.BlockSpec((C, HW), lambda p, n: (0, n))),
        compiler_params=pltpu.CompilerParams(
            dimension_semantics=("parallel", "parallel"),
            vmem_limit_bytes=_vmem_limit_assc(C, HW, L_pad)),
    )(nb_flat, tgt_flat, wq, bq, wk, bk, cond, pool_addmask, row_valid, bmask)


# --------------------------------------------------------------------------
# 1x1 conv (no bias) + BatchNorm2d (training-mode batch stats), tiled over
# output channels; three bf16 matmuls over lane-dense (C, N*HW) slabs.
# --------------------------------------------------------------------------
def outconv_bn_kernel(cal_ref, tgt_ref, w_ref, g_ref, b_ref, o_ref, *, eps):
    y = jnp.dot(w_ref[0], cal_ref[0], preferred_element_type=jnp.float32)
    y = y + jnp.dot(w_ref[1], tgt_ref[...], preferred_element_type=jnp.float32)
    y = y + jnp.dot(w_ref[2], cal_ref[1], preferred_element_type=jnp.float32)
    mean = jnp.mean(y, axis=-1, keepdims=True)
    var = jnp.mean(jnp.square(y - mean), axis=-1, keepdims=True)
    o_ref[...] = (y - mean) * (g_ref[...] * jax.lax.rsqrt(var + eps)) + b_ref[...]


def _pick_channel_block(C):
    # >=2 grid steps (v7x megacore) while keeping sublane-aligned blocks.
    for cand in (128, 64, 32, 16, 8):
        if C % cand == 0 and C // cand >= 2:
            return cand
    return C


def _vmem_limit_outconv(P, C, NHW, cblk):
    blk = (P * C * NHW * 2 + C * NHW * 2 + 3 * cblk * C * 2
           + 2 * cblk * 4 + cblk * NHW * 4)
    est = 2 * blk + 4 * cblk * NHW * 4
    return int(min(max(est, 16 * 1024 * 1024), 32 * 1024 * 1024))


def outconv_bn(cal, tslab, w3, gamma, beta, eps=BN_EPS):
    P, C, NHW = cal.shape
    cblk = _pick_channel_block(C)
    kern = functools.partial(outconv_bn_kernel, eps=eps)
    return pl.pallas_call(
        kern,
        out_shape=jax.ShapeDtypeStruct((C, NHW), jnp.float32),
        grid=(C // cblk,),
        in_specs=[
            pl.BlockSpec((P, C, NHW), lambda c: (0, 0, 0)),
            pl.BlockSpec((C, NHW), lambda c: (0, 0)),
            pl.BlockSpec((3, cblk, C), lambda c: (0, c, 0)),
            pl.BlockSpec((cblk, 1), lambda c: (c, 0)),
            pl.BlockSpec((cblk, 1), lambda c: (c, 0)),
        ],
        out_specs=pl.BlockSpec((cblk, NHW), lambda c: (c, 0)),
        compiler_params=pltpu.CompilerParams(
            dimension_semantics=("parallel",),
            vmem_limit_bytes=_vmem_limit_outconv(P, C, NHW, cblk)),
    )(cal, tslab, w3, gamma.reshape(C, 1), beta.reshape(C, 1))


# --------------------------------------------------------------------------
# Wrapper-side (trace-time) helpers.
# --------------------------------------------------------------------------
def _pool_addmask(H, W, sizes, L_pad):
    # PyTorch AdaptiveMaxPool2d windows on the (H-2, W-2) valid-conv domain,
    # expressed on the full H*W frame (interior offset +1).  Additive mask:
    # 0 inside the window, -1e30 outside; fully -1e30 padded rows.
    Ho, Wo = H - 2, W - 2
    rows = []
    for s in sizes:
        for i in range(s):
            h0 = (i * Ho) // s + 1
            h1 = -((-(i + 1) * Ho) // s) + 1
            for j in range(s):
                w0 = (j * Wo) // s + 1
                w1 = -((-(j + 1) * Wo) // s) + 1
                m = np.full((H, W), -_NEG_BIG, np.float32)
                m[h0:h1, w0:w1] = 0.0
                rows.append(m.reshape(-1))
    L = len(rows)
    mask = np.concatenate(
        [np.stack(rows, 0),
         np.full((L_pad - L, H * W), -_NEG_BIG, np.float32)], 0)
    rvalid = np.zeros((1, L_pad), np.float32)
    rvalid[0, :L] = 1.0
    return jnp.asarray(mask), jnp.asarray(rvalid)


def _dilated_bounds_mask(H, W, rate):
    # bmask[t, 0, p] = 1 where the dilated tap (dy, dx) stays inside the image
    # (zero padding of F.conv2d(padding=rate, dilation=rate)).
    m = np.zeros((9, 1, H * W), np.float32)
    for ky in range(3):
        for kx in range(3):
            dy, dx = (ky - 1) * rate, (kx - 1) * rate
            valid = np.zeros((H, W), np.float32)
            valid[max(0, -dy):min(H, H - dy), max(0, -dx):min(W, W - dx)] = 1.0
            m[ky * 3 + kx, 0] = valid.reshape(-1)
    return jnp.asarray(m)


def _taps(w):
    # (C_out, C_in, 3, 3) -> (9, C_out, C_in), tap index t = ky*3 + kx.
    return jnp.transpose(w, (2, 3, 0, 1)).reshape(9, w.shape[0], w.shape[1])


def bssf_forward(sd, params, rate, sizes=POOLS):
    N, C, _, H, W = sd.shape
    HW = H * W
    previous = sd[:, :, 0]
    target = sd[:, :, 1]
    next_ = sd[:, :, 2]

    pf = params["forward_calibration"]
    pb = params["backward_calibration"]

    nb_flat = jnp.stack([previous, next_], axis=0).reshape(2, N, C, HW)
    tgt_flat = target.reshape(N, C, HW)

    wq = jnp.stack([_taps(pf["wq"]), _taps(pb["wq"])], 0).astype(jnp.bfloat16)
    wk = jnp.stack([_taps(pf["wk"]), _taps(pb["wk"])], 0).astype(jnp.bfloat16)
    cond = jnp.stack([_taps(pf["condition"]),
                      _taps(pb["condition"])], 0).astype(jnp.bfloat16)
    bq = jnp.stack([pf["bq"], pb["bq"]], 0).reshape(2, C, 1)
    bk = jnp.stack([pf["bk"], pb["bk"]], 0).reshape(2, C, 1)

    L = sum(s * s for s in sizes)
    L_pad = max(128, ((L + 127) // 128) * 128)
    pool_addmask, row_valid = _pool_addmask(H, W, sizes, L_pad)
    bmask = _dilated_bounds_mask(H, W, rate)

    # cal: (2, C, N*HW) bf16 (path 0 = forward, 1 = backward); tslab: (C, N*HW).
    cal, tslab = assc_fused(nb_flat, tgt_flat, wq, bq, wk, bk, cond,
                            pool_addmask, row_valid, bmask, rate, H, W)

    ow = params["out_w"]                                   # (C, 3C)
    w3 = jnp.stack([ow[:, :C], ow[:, C:2 * C], ow[:, 2 * C:]],
                   axis=0).astype(jnp.bfloat16)            # (3, C, C)

    y = outconv_bn(cal, tslab, w3, params["bn_gamma"], params["bn_beta"])
    return jnp.transpose(y.reshape(C, N, HW), (1, 0, 2)).reshape(N, C, H, W)


def init_params(key, C):
    ks = jax.random.split(key, 6)

    def assc_params(k0, k1):
        kq, kb = jax.random.split(k0)
        kk, kb2 = jax.random.split(k1)
        return {
            "wq": 0.1 * jax.random.normal(kq, (C, C, 3, 3), jnp.float32),
            "bq": 0.1 * jax.random.normal(kb, (C,), jnp.float32),
            "wk": 0.1 * jax.random.normal(kk, (C, C, 3, 3), jnp.float32),
            "bk": 0.1 * jax.random.normal(kb2, (C,), jnp.float32),
            "condition": jnp.ones((C, C, 3, 3), jnp.float32),  # torch.ones init
        }

    return {
        "forward_calibration": assc_params(ks[0], ks[1]),
        "backward_calibration": assc_params(ks[2], ks[3]),
        "out_w": 0.1 * jax.random.normal(ks[4], (C, 3 * C), jnp.float32),
        "bn_gamma": jnp.ones((C,), jnp.float32),
        "bn_beta": jnp.zeros((C,), jnp.float32),
    }


if __name__ == "__main__":
    N, C, H, W = 2, 4, 16, 16
    rate = 2

    key = jax.random.PRNGKey(0)
    k_in, k_p = jax.random.split(key)
    sd = jax.random.normal(k_in, (N, C, 3, H, W), jnp.float32)
    params = init_params(k_p, C)

    fwd = jax.jit(functools.partial(bssf_forward, rate=rate, sizes=POOLS))
    out = fwd(sd, params)
    out = jax.block_until_ready(out)
    assert out.shape == (N, C, H, W), out.shape
    assert jnp.all(jnp.isfinite(out))
    print("KERNEL_OK")
</pallas_src>

<mosaic_0001>
module attributes {stable_mosaic.version = 11 : i64} {
  func.func @assc_kernel(%arg0: i32, %arg1: i32, %arg2: memref<1x1x4x256xf32, #tpu.memory_space<vmem>>, %arg3: memref<1x4x256xf32, #tpu.memory_space<vmem>>, %arg4: memref<1x9x4x4xbf16, #tpu.memory_space<vmem>>, %arg5: memref<1x4x1xf32, #tpu.memory_space<vmem>>, %arg6: memref<1x9x4x4xbf16, #tpu.memory_space<vmem>>, %arg7: memref<1x4x1xf32, #tpu.memory_space<vmem>>, %arg8: memref<1x9x4x4xbf16, #tpu.memory_space<vmem>>, %arg9: memref<128x256xf32, #tpu.memory_space<vmem>>, %arg10: memref<1x128xf32, #tpu.memory_space<vmem>>, %arg11: memref<9x1x256xf32, #tpu.memory_space<vmem>>, %arg12: memref<1x4x256xbf16, #tpu.memory_space<vmem>>, %arg13: memref<4x256xbf16, #tpu.memory_space<vmem>>) attributes {dimension_semantics = [#tpu.dimension_semantics<parallel>, #tpu.dimension_semantics<parallel>], iteration_bounds = array<i64: 2, 2>, scalar_prefetch = 0 : i64, scratch_operands = 0 : i64, tpu.core_type = #tpu.core_type<tc>, window_params = [{transform_indices = @transform_0, window_bounds = array<i64: 1, 1, 4, 256>}, {transform_indices = @transform_1, window_bounds = array<i64: 1, 4, 256>}, {transform_indices = @transform_2, window_bounds = array<i64: 1, 9, 4, 4>}, {transform_indices = @transform_3, window_bounds = array<i64: 1, 4, 1>}, {transform_indices = @transform_4, window_bounds = array<i64: 1, 9, 4, 4>}, {transform_indices = @transform_5, window_bounds = array<i64: 1, 4, 1>}, {transform_indices = @transform_6, window_bounds = array<i64: 1, 9, 4, 4>}, {pipeline_mode = #tpu.pipeline_mode<synchronous>, transform_indices = @transform_7, window_bounds = array<i64: 128, 256>}, {pipeline_mode = #tpu.pipeline_mode<synchronous>, transform_indices = @transform_8, window_bounds = array<i64: 1, 128>}, {pipeline_mode = #tpu.pipeline_mode<synchronous>, transform_indices = @transform_9, window_bounds = array<i64: 9, 1, 256>}, {transform_indices = @transform_10, window_bounds = array<i64: 1, 4, 256>}, {transform_indices = @transform_11, window_bounds = array<i64: 4, 256>}]} {
    %c0 = arith.constant 0 : index
    %c0_0 = arith.constant 0 : index
    %c0_1 = arith.constant 0 : index
    %c0_2 = arith.constant 0 : index
    %0 = vector.load %arg2[%c0, %c0_0, %c0_1, %c0_2] : memref<1x1x4x256xf32, #tpu.memory_space<vmem>>, vector<1x1x4x256xf32>
    %1 = vector.shape_cast %0 : vector<1x1x4x256xf32> to vector<4x256xf32>
    %c0_3 = arith.constant 0 : index
    %c0_4 = arith.constant 0 : index
    %c0_5 = arith.constant 0 : index
    %2 = vector.load %arg3[%c0_3, %c0_4, %c0_5] : memref<1x4x256xf32, #tpu.memory_space<vmem>>, vector<1x4x256xf32>
    %3 = vector.shape_cast %2 : vector<1x4x256xf32> to vector<4x256xf32>
    %c0_6 = arith.constant 0 : index
    %c0_7 = arith.constant 0 : index
    %4 = vector.load %arg10[%c0_6, %c0_7] : memref<1x128xf32, #tpu.memory_space<vmem>>, vector<1x128xf32>
    %cst = arith.constant 0.000000e+00 : f32
    %5 = vector.broadcast %cst : f32 to vector<4x256xf32>
    %c17_i32 = arith.constant 17 : i32
    %6 = tpu.dynamic_rotate %1 by %c17_i32 dim 1 : vector<4x256xf32>, i32 -> vector<4x256xf32>
    %7 = arith.truncf %6 : vector<4x256xf32> to vector<4x256xbf16>
    %c0_8 = arith.constant 0 : index
    %c0_9 = arith.constant 0 : index
    %c0_10 = arith.constant 0 : index
    %c0_11 = arith.constant 0 : index
    %8 = vector.load %arg4[%c0_8, %c0_9, %c0_10, %c0_11] : memref<1x9x4x4xbf16, #tpu.memory_space<vmem>>, vector<1x1x4x4xbf16>
    %9 = vector.shape_cast %8 : vector<1x1x4x4xbf16> to vector<4x4xbf16>
    %cst_12 = arith.constant dense<0.000000e+00> : vector<4x256xf32>
    %10 = tpu.matmul %9, %7, %cst_12 {dimension_numbers = #tpu.dot_dimension_numbers<[1], [0], [0], [1], [0, 0, 1, 1], [], []>} : vector<4x4xbf16>, vector<4x256xbf16>, vector<4x256xf32> -> vector<4x256xf32>
    %11 = arith.addf %5, %10 : vector<4x256xf32>
    %c16_i32 = arith.constant 16 : i32
    %12 = tpu.dynamic_rotate %1 by %c16_i32 dim 1 : vector<4x256xf32>, i32 -> vector<4x256xf32>
    %13 = arith.truncf %12 : vector<4x256xf32> to vector<4x256xbf16>
    %c0_13 = arith.constant 0 : index
    %c1 = arith.constant 1 : index
    %c0_14 = arith.constant 0 : index
    %c0_15 = arith.constant 0 : index
    %14 = vector.load %arg4[%c0_13, %c1, %c0_14, %c0_15] : memref<1x9x4x4xbf16, #tpu.memory_space<vmem>>, vector<1x1x4x4xbf16>
    %15 = vector.shape_cast %14 : vector<1x1x4x4xbf16> to vector<4x4xbf16>
    %cst_16 = arith.constant dense<0.000000e+00> : vector<4x256xf32>
    %16 = tpu.matmul %15, %13, %cst_16 {dimension_numbers = #tpu.dot_dimension_numbers<[1], [0], [0], [1], [0, 0, 1, 1], [], []>} : vector<4x4xbf16>, vector<4x256xbf16>, vector<4x256xf32> -> vector<4x256xf32>
    %17 = arith.addf %11, %16 : vector<4x256xf32>
    %c15_i32 = arith.constant 15 : i32
    %18 = tpu.dynamic_rotate %1 by %c15_i32 dim 1 : vector<4x256xf32>, i32 -> vector<4x256xf32>
    %19 = arith.truncf %18 : vector<4x256xf32> to vector<4x256xbf16>
    %c0_17 = arith.constant 0 : index
    %c2 = arith.constant 2 : index
    %c0_18 = arith.constant 0 : index
    %c0_19 = arith.constant 0 : index
    %20 = vector.load %arg4[%c0_17, %c2, %c0_18, %c0_19] : memref<1x9x4x4xbf16, #tpu.memory_space<vmem>>, vector<1x1x4x4xbf16>
    %21 = vector.shape_cast %20 : vector<1x1x4x4xbf16> to vector<4x4xbf16>
    %cst_20 = arith.constant dense<0.000000e+00> : vector<4x256xf32>
    %22 = tpu.matmul %21, %19, %cst_20 {dimension_numbers = #tpu.dot_dimension_numbers<[1], [0], [0], [1], [0, 0, 1, 1], [], []>} : vector<4x4xbf16>, vector<4x256xbf16>, vector<4x256xf32> -> vector<4x256xf32>
    %23 = arith.addf %17, %22 : vector<4x256xf32>
    %c1_i32 = arith.constant 1 : i32
    %24 = tpu.dynamic_rotate %1 by %c1_i32 dim 1 : vector<4x256xf32>, i32 -> vector<4x256xf32>
    %25 = arith.truncf %24 : vector<4x256xf32> to vector<4x256xbf16>
    %c0_21 = arith.constant 0 : index
    %c3 = arith.constant 3 : index
    %c0_22 = arith.constant 0 : index
    %c0_23 = arith.constant 0 : index
    %26 = vector.load %arg4[%c0_21, %c3, %c0_22, %c0_23] : memref<1x9x4x4xbf16, #tpu.memory_space<vmem>>, vector<1x1x4x4xbf16>
    %27 = vector.shape_cast %26 : vector<1x1x4x4xbf16> to vector<4x4xbf16>
    %cst_24 = arith.constant dense<0.000000e+00> : vector<4x256xf32>
    %28 = tpu.matmul %27, %25, %cst_24 {dimension_numbers = #tpu.dot_dimension_numbers<[1], [0], [0], [1], [0, 0, 1, 1], [], []>} : vector<4x4xbf16>, vector<4x256xbf16>, vector<4x256xf32> -> vector<4x256xf32>
    %29 = arith.addf %23, %28 : vector<4x256xf32>
    %30 = arith.truncf %1 : vector<4x256xf32> to vector<4x256xbf16>
    %c0_25 = arith.constant 0 : index
    %c4 = arith.constant 4 : index
    %c0_26 = arith.constant 0 : index
    %c0_27 = arith.constant 0 : index
    %31 = vector.load %arg4[%c0_25, %c4, %c0_26, %c0_27] : memref<1x9x4x4xbf16, #tpu.memory_space<vmem>>, vector<1x1x4x4xbf16>
    %32 = vector.shape_cast %31 : vector<1x1x4x4xbf16> to vector<4x4xbf16>
    %cst_28 = arith.constant dense<0.000000e+00> : vector<4x256xf32>
    %33 = tpu.matmul %32, %30, %cst_28 {dimension_numbers = #tpu.dot_dimension_numbers<[1], [0], [0], [1], [0, 0, 1, 1], [], []>} : vector<4x4xbf16>, vector<4x256xbf16>, vector<4x256xf32> -> vector<4x256xf32>
    %34 = arith.addf %29, %33 : vector<4x256xf32>
    %c255_i32 = arith.constant 255 : i32
    %35 = tpu.dynamic_rotate %1 by %c255_i32 dim 1 : vector<4x256xf32>, i32 -> vector<4x256xf32>
    %36 = arith.truncf %35 : vector<4x256xf32> to vector<4x256xbf16>
    %c0_29 = arith.constant 0 : index
    %c5 = arith.constant 5 : index
    %c0_30 = arith.constant 0 : index
    %c0_31 = arith.constant 0 : index
    %37 = vector.load %arg4[%c0_29, %c5, %c0_30, %c0_31] : memref<1x9x4x4xbf16, #tpu.memory_space<vmem>>, vector<1x1x4x4xbf16>
    %38 = vector.shape_cast %37 : vector<1x1x4x4xbf16> to vector<4x4xbf16>
    %cst_32 = arith.constant dense<0.000000e+00> : vector<4x256xf32>
    %39 = tpu.matmul %38, %36, %cst_32 {dimension_numbers = #tpu.dot_dimension_numbers<[1], [0], [0], [1], [0, 0, 1, 1], [], []>} : vector<4x4xbf16>, vector<4x256xbf16>, vector<4x256xf32> -> vector<4x256xf32>
    %40 = arith.addf %34, %39 : vector<4x256xf32>
    %c241_i32 = arith.constant 241 : i32
    %41 = tpu.dynamic_rotate %1 by %c241_i32 dim 1 : vector<4x256xf32>, i32 -> vector<4x256xf32>
    %42 = arith.truncf %41 : vector<4x256xf32> to vector<4x256xbf16>
    %c0_33 = arith.constant 0 : index
    %c6 = arith.constant 6 : index
    %c0_34 = arith.constant 0 : index
    %c0_35 = arith.constant 0 : index
    %43 = vector.load %arg4[%c0_33, %c6, %c0_34, %c0_35] : memref<1x9x4x4xbf16, #tpu.memory_space<vmem>>, vector<1x1x4x4xbf16>
    %44 = vector.shape_cast %43 : vector<1x1x4x4xbf16> to vector<4x4xbf16>
    %cst_36 = arith.constant dense<0.000000e+00> : vector<4x256xf32>
    %45 = tpu.matmul %44, %42, %cst_36 {dimension_numbers = #tpu.dot_dimension_numbers<[1], [0], [0], [1], [0, 0, 1, 1], [], []>} : vector<4x4xbf16>, vector<4x256xbf16>, vector<4x256xf32> -> vector<4x256xf32>
    %46 = arith.addf %40, %45 : vector<4x256xf32>
    %c240_i32 = arith.constant 240 : i32
    %47 = tpu.dynamic_rotate %1 by %c240_i32 dim 1 : vector<4x256xf32>, i32 -> vector<4x256xf32>
    %48 = arith.truncf %47 : vector<4x256xf32> to vector<4x256xbf16>
    %c0_37 = arith.constant 0 : index
    %c7 = arith.constant 7 : index
    %c0_38 = arith.constant 0 : index
    %c0_39 = arith.constant 0 : index
    %49 = vector.load %arg4[%c0_37, %c7, %c0_38, %c0_39] : memref<1x9x4x4xbf16, #tpu.memory_space<vmem>>, vector<1x1x4x4xbf16>
    %50 = vector.shape_cast %49 : vector<1x1x4x4xbf16> to vector<4x4xbf16>
    %cst_40 = arith.constant dense<0.000000e+00> : vector<4x256xf32>
    %51 = tpu.matmul %50, %48, %cst_40 {dimension_numbers = #tpu.dot_dimension_numbers<[1], [0], [0], [1], [0, 0, 1, 1], [], []>} : vector<4x4xbf16>, vector<4x256xbf16>, vector<4x256xf32> -> vector<4x256xf32>
    %52 = arith.addf %46, %51 : vector<4x256xf32>
    %c239_i32 = arith.constant 239 : i32
    %53 = tpu.dynamic_rotate %1 by %c239_i32 dim 1 : vector<4x256xf32>, i32 -> vector<4x256xf32>
    %54 = arith.truncf %53 : vector<4x256xf32> to vector<4x256xbf16>
    %c0_41 = arith.constant 0 : index
    %c8 = arith.constant 8 : index
    %c0_42 = arith.constant 0 : index
    %c0_43 = arith.constant 0 : index
    %55 = vector.load %arg4[%c0_41, %c8, %c0_42, %c0_43] : memref<1x9x4x4xbf16, #tpu.memory_space<vmem>>, vector<1x1x4x4xbf16>
    %56 = vector.shape_cast %55 : vector<1x1x4x4xbf16> to vector<4x4xbf16>
    %cst_44 = arith.constant dense<0.000000e+00> : vector<4x256xf32>
    %57 = tpu.matmul %56, %54, %cst_44 {dimension_numbers = #tpu.dot_dimension_numbers<[1], [0], [0], [1], [0, 0, 1, 1], [], []>} : vector<4x4xbf16>, vector<4x256xbf16>, vector<4x256xf32> -> vector<4x256xf32>
    %58 = arith.addf %52, %57 : vector<4x256xf32>
    %c0_45 = arith.constant 0 : index
    %c0_46 = arith.constant 0 : index
    %59 = vector.load %arg9[%c0_45, %c0_46] : memref<128x256xf32, #tpu.memory_space<vmem>>, vector<16x256xf32>
    %60 = vector.shape_cast %58 : vector<4x256xf32> to vector<4x1x256xf32>
    %61 = vector.shape_cast %59 : vector<16x256xf32> to vector<1x16x256xf32>
    %62 = vector.broadcast %60 : vector<4x1x256xf32> to vector<4x16x256xf32>
    %63 = vector.broadcast %61 : vector<1x16x256xf32> to vector<4x16x256xf32>
    %64 = arith.addf %62, %63 : vector<4x16x256xf32>
    %cst_47 = arith.constant dense<0xFF800000> : vector<4x16xf32>
    %65 = vector.multi_reduction <maximumf>, %64, %cst_47 [2] : vector<4x16x256xf32> to vector<4x16xf32>
    %c16 = arith.constant 16 : index
    %c0_48 = arith.constant 0 : index
    %66 = vector.load %arg9[%c16, %c0_48] : memref<128x256xf32, #tpu.memory_space<vmem>>, vector<16x256xf32>
    %67 = vector.shape_cast %58 : vector<4x256xf32> to vector<4x1x256xf32>
    %68 = vector.shape_cast %66 : vector<16x256xf32> to vector<1x16x256xf32>
    %69 = vector.broadcast %67 : vector<4x1x256xf32> to vector<4x16x256xf32>
    %70 = vector.broadcast %68 : vector<1x16x256xf32> to vector<4x16x256xf32>
    %71 = arith.addf %69, %70 : vector<4x16x256xf32>
    %cst_49 = arith.constant dense<0xFF800000> : vector<4x16xf32>
    %72 = vector.multi_reduction <maximumf>, %71, %cst_49 [2] : vector<4x16x256xf32> to vector<4x16xf32>
    %c32 = arith.constant 32 : index
    %c0_50 = arith.constant 0 : index
    %73 = vector.load %arg9[%c32, %c0_50] : memref<128x256xf32, #tpu.memory_space<vmem>>, vector<16x256xf32>
    %74 = vector.shape_cast %58 : vector<4x256xf32> to vector<4x1x256xf32>
    %75 = vector.shape_cast %73 : vector<16x256xf32> to vector<1x16x256xf32>
    %76 = vector.broadcast %74 : vector<4x1x256xf32> to vector<4x16x256xf32>
    %77 = vector.broadcast %75 : vector<1x16x256xf32> to vector<4x16x256xf32>
    %78 = arith.addf %76, %77 : vector<4x16x256xf32>
    %cst_51 = arith.constant dense<0xFF800000> : vector<4x16xf32>
    %79 = vector.multi_reduction <maximumf>, %78, %cst_51 [2] : vector<4x16x256xf32> to vector<4x16xf32>
    %c48 = arith.constant 48 : index
    %c0_52 = arith.constant 0 : index
    %80 = vector.load %arg9[%c48, %c0_52] : memref<128x256xf32, #tpu.memory_space<vmem>>, vector<16x256xf32>
    %81 = vector.shape_cast %58 : vector<4x256xf32> to vector<4x1x256xf32>
    %82 = vector.shape_cast %80 : vector<16x256xf32> to vector<1x16x256xf32>
    %83 = vector.broadcast %81 : vector<4x1x256xf32> to vector<4x16x256xf32>
    %84 = vector.broadcast %82 : vector<1x16x256xf32> to vector<4x16x256xf32>
    %85 = arith.addf %83, %84 : vector<4x16x256xf32>
    %cst_53 = arith.constant dense<0xFF800000> : vector<4x16xf32>
    %86 = vector.multi_reduction <maximumf>, %85, %cst_53 [2] : vector<4x16x256xf32> to vector<4x16xf32>
    %c64 = arith.constant 64 : index
    %c0_54 = arith.constant 0 : index
    %87 = vector.load %arg9[%c64, %c0_54] : memref<128x256xf32, #tpu.memory_space<vmem>>, vector<16x256xf32>
    %88 = vector.shape_cast %58 : vector<4x256xf32> to vector<4x1x256xf32>
    %89 = vector.shape_cast %87 : vector<16x256xf32> to vector<1x16x256xf32>
    %90 = vector.broadcast %88 : vector<4x1x256xf32> to vector<4x16x256xf32>
    %91 = vector.broadcast %89 : vector<1x16x256xf32> to vector<4x16x256xf32>
    %92 = arith.addf %90, %91 : vector<4x16x256xf32>
    %cst_55 = arith.constant dense<0xFF800000> : vector<4x16xf32>
    %93 = vector.multi_reduction <maximumf>, %92, %cst_55 [2] : vector<4x16x256xf32> to vector<4x16xf32>
    %c80 = arith.constant 80 : index
    %c0_56 = arith.constant 0 : index
    %94 = vector.load %arg9[%c80, %c0_56] : memref<128x256xf32, #tpu.memory_space<vmem>>, vector<16x256xf32>
    %95 = vector.shape_cast %58 : vector<4x256xf32> to vector<4x1x256xf32>
    %96 = vector.shape_cast %94 : vector<16x256xf32> to vector<1x16x256xf32>
    %97 = vector.broadcast %95 : vector<4x1x256xf32> to vector<4x16x256xf32>
    %98 = vector.broadcast %96 : vector<1x16x256xf32> to vector<4x16x256xf32>
    %99 = arith.addf %97, %98 : vector<4x16x256xf32>
    %cst_57 = arith.constant dense<0xFF800000> : vector<4x16xf32>
    %100 = vector.multi_reduction <maximumf>, %99, %cst_57 [2] : vector<4x16x256xf32> to vector<4x16xf32>
    %c96 = arith.constant 96 : index
    %c0_58 = arith.constant 0 : index
    %101 = vector.load %arg9[%c96, %c0_58] : memref<128x256xf32, #tpu.memory_space<vmem>>, vector<16x256xf32>
    %102 = vector.shape_cast %58 : vector<4x256xf32> to vector<4x1x256xf32>
    %103 = vector.shape_cast %101 : vector<16x256xf32> to vector<1x16x256xf32>
    %104 = vector.broadcast %102 : vector<4x1x256xf32> to vector<4x16x256xf32>
    %105 = vector.broadcast %103 : vector<1x16x256xf32> to vector<4x16x256xf32>
    %106 = arith.addf %104, %105 : vector<4x16x256xf32>
    %cst_59 = arith.constant dense<0xFF800000> : vector<4x16xf32>
    %107 = vector.multi_reduction <maximumf>, %106, %cst_59 [2] : vector<4x16x256xf32> to vector<4x16xf32>
    %c112 = arith.constant 112 : index
    %c0_60 = arith.constant 0 : index
    %108 = vector.load %arg9[%c112, %c0_60] : memref<128x256xf32, #tpu.memory_space<vmem>>, vector<16x256xf32>
    %109 = vector.shape_cast %58 : vector<4x256xf32> to vector<4x1x256xf32>
    %110 = vector.shape_cast %108 : vector<16x256xf32> to vector<1x16x256xf32>
    %111 = vector.broadcast %109 : vector<4x1x256xf32> to vector<4x16x256xf32>
    %112 = vector.broadcast %110 : vector<1x16x256xf32> to vector<4x16x256xf32>
    %113 = arith.addf %111, %112 : vector<4x16x256xf32>
    %cst_61 = arith.constant dense<0xFF800000> : vector<4x16xf32>
    %114 = vector.multi_reduction <maximumf>, %113, %cst_61 [2] : vector<4x16x256xf32> to vector<4x16xf32>
    %115 = tpu.concatenate %65, %72, %79, %86, %93, %100, %107, %114 in 1 : vector<4x16xf32>, vector<4x16xf32>, vector<4x16xf32>, vector<4x16xf32>, vector<4x16xf32>, vector<4x16xf32>, vector<4x16xf32>, vector<4x16xf32> -> vector<4x128xf32>
    %c0_62 = arith.constant 0 : index
    %c0_63 = arith.constant 0 : index
    %c0_64 = arith.constant 0 : index
    %116 = vector.load %arg5[%c0_62, %c0_63, %c0_64] : memref<1x4x1xf32, #tpu.memory_space<vmem>>, vector<1x4x1xf32>
    %117 = vector.shape_cast %116 : vector<1x4x1xf32> to vector<4x1xf32>
    %118 = vector.broadcast %117 : vector<4x1xf32> to vector<4x128xf32>
    %119 = arith.addf %115, %118 : vector<4x128xf32>
    %120 = vector.broadcast %4 : vector<1x128xf32> to vector<4x128xf32>
    %121 = arith.mulf %119, %120 : vector<4x128xf32>
    %cst_65 = arith.constant 0.000000e+00 : f32
    %122 = vector.broadcast %cst_65 : f32 to vector<4x256xf32>
    %c17_i32_66 = arith.constant 17 : i32
    %123 = tpu.dynamic_rotate %3 by %c17_i32_66 dim 1 : vector<4x256xf32>, i32 -> vector<4x256xf32>
    %124 = arith.truncf %123 : vector<4x256xf32> to vector<4x256xbf16>
    %c0_67 = arith.constant 0 : index
    %c0_68 = arith.constant 0 : index
    %c0_69 = arith.constant 0 : index
    %c0_70 = arith.constant 0 : index
    %125 = vector.load %arg6[%c0_67, %c0_68, %c0_69, %c0_70] : memref<1x9x4x4xbf16, #tpu.memory_space<vmem>>, vector<1x1x4x4xbf16>
    %126 = vector.shape_cast %125 : vector<1x1x4x4xbf16> to vector<4x4xbf16>
    %cst_71 = arith.constant dense<0.000000e+00> : vector<4x256xf32>
    %127 = tpu.matmul %126, %124, %cst_71 {dimension_numbers = #tpu.dot_dimension_numbers<[1], [0], [0], [1], [0, 0, 1, 1], [], []>} : vector<4x4xbf16>, vector<4x256xbf16>, vector<4x256xf32> -> vector<4x256xf32>
    %128 = arith.addf %122, %127 : vector<4x256xf32>
    %c16_i32_72 = arith.constant 16 : i32
    %129 = tpu.dynamic_rotate %3 by %c16_i32_72 dim 1 : vector<4x256xf32>, i32 -> vector<4x256xf32>
    %130 = arith.truncf %129 : vector<4x256xf32> to vector<4x256xbf16>
    %c0_73 = arith.constant 0 : index
    %c1_74 = arith.constant 1 : index
    %c0_75 = arith.constant 0 : index
    %c0_76 = arith.constant 0 : index
    %131 = vector.load %arg6[%c0_73, %c1_74, %c0_75, %c0_76] : memref<1x9x4x4xbf16, #tpu.memory_space<vmem>>, vector<1x1x4x4xbf16>
    %132 = vector.shape_cast %131 : vector<1x1x4x4xbf16> to vector<4x4xbf16>
    %cst_77 = arith.constant dense<0.000000e+00> : vector<4x256xf32>
    %133 = tpu.matmul %132, %130, %cst_77 {dimension_numbers = #tpu.dot_dimension_numbers<[1], [0], [0], [1], [0, 0, 1, 1], [], []>} : vector<4x4xbf16>, vector<4x256xbf16>, vector<4x256xf32> -> vector<4x256xf32>
    %134 = arith.addf %128, %133 : vector<4x256xf32>
    %c15_i32_78 = arith.constant 15 : i32
    %135 = tpu.dynamic_rotate %3 by %c15_i32_78 dim 1 : vector<4x256xf32>, i32 -> vector<4x256xf32>
    %136 = arith.truncf %135 : vector<4x256xf32> to vector<4x256xbf16>
    %c0_79 = arith.constant 0 : index
    %c2_80 = arith.constant 2 : index
    %c0_81 = arith.constant 0 : index
    %c0_82 = arith.constant 0 : index
    %137 = vector.load %arg6[%c0_79, %c2_80, %c0_81, %c0_82] : memref<1x9x4x4xbf16, #tpu.memory_space<vmem>>, vector<1x1x4x4xbf16>
    %138 = vector.shape_cast %137 : vector<1x1x4x4xbf16> to vector<4x4xbf16>
    %cst_83 = arith.constant dense<0.000000e+00> : vector<4x256xf32>
    %139 = tpu.matmul %138, %136, %cst_83 {dimension_numbers = #tpu.dot_dimension_numbers<[1], [0], [0], [1], [0, 0, 1, 1], [], []>} : vector<4x4xbf16>, vector<4x256xbf16>, vector<4x256xf32> -> vector<4x256xf32>
    %140 = arith.addf %134, %139 : vector<4x256xf32>
    %c1_i32_84 = arith.constant 1 : i32
    %141 = tpu.dynamic_rotate %3 by %c1_i32_84 dim 1 : vector<4x256xf32>, i32 -> vector<4x256xf32>
    %142 = arith.truncf %141 : vector<4x256xf32> to vector<4x256xbf16>
    %c0_85 = arith.constant 0 : index
    %c3_86 = arith.constant 3 : index
    %c0_87 = arith.constant 0 : index
    %c0_88 = arith.constant 0 : index
    %143 = vector.load %arg6[%c0_85, %c3_86, %c0_87, %c0_88] : memref<1x9x4x4xbf16, #tpu.memory_space<vmem>>, vector<1x1x4x4xbf16>
    %144 = vector.shape_cast %143 : vector<1x1x4x4xbf16> to vector<4x4xbf16>
    %cst_89 = arith.constant dense<0.000000e+00> : vector<4x256xf32>
    %145 = tpu.matmul %144, %142, %cst_89 {dimension_numbers = #tpu.dot_dimension_numbers<[1], [0], [0], [1], [0, 0, 1, 1], [], []>} : vector<4x4xbf16>, vector<4x256xbf16>, vector<4x256xf32> -> vector<4x256xf32>
    %146 = arith.addf %140, %145 : vector<4x256xf32>
    %147 = arith.truncf %3 : vector<4x256xf32> to vector<4x256xbf16>
    %c0_90 = arith.constant 0 : index
    %c4_91 = arith.constant 4 : index
    %c0_92 = arith.constant 0 : index
    %c0_93 = arith.constant 0 : index
    %148 = vector.load %arg6[%c0_90, %c4_91, %c0_92, %c0_93] : memref<1x9x4x4xbf16, #tpu.memory_space<vmem>>, vector<1x1x4x4xbf16>
    %149 = vector.shape_cast %148 : vector<1x1x4x4xbf16> to vector<4x4xbf16>
    %cst_94 = arith.constant dense<0.000000e+00> : vector<4x256xf32>
    %150 = tpu.matmul %149, %147, %cst_94 {dimension_numbers = #tpu.dot_dimension_numbers<[1], [0], [0], [1], [0, 0, 1, 1], [], []>} : vector<4x4xbf16>, vector<4x256xbf16>, vector<4x256xf32> -> vector<4x256xf32>
    %151 = arith.addf %146, %150 : vector<4x256xf32>
    %c255_i32_95 = arith.constant 255 : i32
    %152 = tpu.dynamic_rotate %3 by %c255_i32_95 dim 1 : vector<4x256xf32>, i32 -> vector<4x256xf32>
    %153 = arith.truncf %152 : vector<4x256xf32> to vector<4x256xbf16>
    %c0_96 = arith.constant 0 : index
    %c5_97 = arith.constant 5 : index
    %c0_98 = arith.constant 0 : index
    %c0_99 = arith.constant 0 : index
    %154 = vector.load %arg6[%c0_96, %c5_97, %c0_98, %c0_99] : memref<1x9x4x4xbf16, #tpu.memory_space<vmem>>, vector<1x1x4x4xbf16>
    %155 = vector.shape_cast %154 : vector<1x1x4x4xbf16> to vector<4x4xbf16>
    %cst_100 = arith.constant dense<0.000000e+00> : vector<4x256xf32>
    %156 = tpu.matmul %155, %153, %cst_100 {dimension_numbers = #tpu.dot_dimension_numbers<[1], [0], [0], [1], [0, 0, 1, 1], [], []>} : vector<4x4xbf16>, vector<4x256xbf16>, vector<4x256xf32> -> vector<4x256xf32>
    %157 = arith.addf %151, %156 : vector<4x256xf32>
    %c241_i32_101 = arith.constant 241 : i32
    %158 = tpu.dynamic_rotate %3 by %c241_i32_101 dim 1 : vector<4x256xf32>, i32 -> vector<4x256xf32>
    %159 = arith.truncf %158 : vector<4x256xf32> to vector<4x256xbf16>
    %c0_102 = arith.constant 0 : index
    %c6_103 = arith.constant 6 : index
    %c0_104 = arith.constant 0 : index
    %c0_105 = arith.constant 0 : index
    %160 = vector.load %arg6[%c0_102, %c6_103, %c0_104, %c0_105] : memref<1x9x4x4xbf16, #tpu.memory_space<vmem>>, vector<1x1x4x4xbf16>
    %161 = vector.shape_cast %160 : vector<1x1x4x4xbf16> to vector<4x4xbf16>
    %cst_106 = arith.constant dense<0.000000e+00> : vector<4x256xf32>
    %162 = tpu.matmul %161, %159, %cst_106 {dimension_numbers = #tpu.dot_dimension_numbers<[1], [0], [0], [1], [0, 0, 1, 1], [], []>} : vector<4x4xbf16>, vector<4x256xbf16>, vector<4x256xf32> -> vector<4x256xf32>
    %163 = arith.addf %157, %162 : vector<4x256xf32>
    %c240_i32_107 = arith.constant 240 : i32
    %164 = tpu.dynamic_rotate %3 by %c240_i32_107 dim 1 : vector<4x256xf32>, i32 -> vector<4x256xf32>
    %165 = arith.truncf %164 : vector<4x256xf32> to vector<4x256xbf16>
    %c0_108 = arith.constant 0 : index
    %c7_109 = arith.constant 7 : index
    %c0_110 = arith.constant 0 : index
    %c0_111 = arith.constant 0 : index
    %166 = vector.load %arg6[%c0_108, %c7_109, %c0_110, %c0_111] : memref<1x9x4x4xbf16, #tpu.memory_space<vmem>>, vector<1x1x4x4xbf16>
    %167 = vector.shape_cast %166 : vector<1x1x4x4xbf16> to vector<4x4xbf16>
    %cst_112 = arith.constant dense<0.000000e+00> : vector<4x256xf32>
    %168 = tpu.matmul %167, %165, %cst_112 {dimension_numbers = #tpu.dot_dimension_numbers<[1], [0], [0], [1], [0, 0, 1, 1], [], []>} : vector<4x4xbf16>, vector<4x256xbf16>, vector<4x256xf32> -> vector<4x256xf32>
    %169 = arith.addf %163, %168 : vector<4x256xf32>
    %c239_i32_113 = arith.constant 239 : i32
    %170 = tpu.dynamic_rotate %3 by %c239_i32_113 dim 1 : vector<4x256xf32>, i32 -> vector<4x256xf32>
    %171 = arith.truncf %170 : vector<4x256xf32> to vector<4x256xbf16>
    %c0_114 = arith.constant 0 : index
    %c8_115 = arith.constant 8 : index
    %c0_116 = arith.constant 0 : index
    %c0_117 = arith.constant 0 : index
    %172 = vector.load %arg6[%c0_114, %c8_115, %c0_116, %c0_117] : memref<1x9x4x4xbf16, #tpu.memory_space<vmem>>, vector<1x1x4x4xbf16>
    %173 = vector.shape_cast %172 : vector<1x1x4x4xbf16> to vector<4x4xbf16>
    %cst_118 = arith.constant dense<0.000000e+00> : vector<4x256xf32>
    %174 = tpu.matmul %173, %171, %cst_118 {dimension_numbers = #tpu.dot_dimension_numbers<[1], [0], [0], [1], [0, 0, 1, 1], [], []>} : vector<4x4xbf16>, vector<4x256xbf16>, vector<4x256xf32> -> vector<4x256xf32>
    %175 = arith.addf %169, %174 : vector<4x256xf32>
    %c0_119 = arith.constant 0 : index
    %c0_120 = arith.constant 0 : index
    %176 = vector.load %arg9[%c0_119, %c0_120] : memref<128x256xf32, #tpu.memory_space<vmem>>, vector<16x256xf32>
    %177 = vector.shape_cast %175 : vector<4x256xf32> to vector<4x1x256xf32>
    %178 = vector.shape_cast %176 : vector<16x256xf32> to vector<1x16x256xf32>
    %179 = vector.broadcast %177 : vector<4x1x256xf32> to vector<4x16x256xf32>
    %180 = vector.broadcast %178 : vector<1x16x256xf32> to vector<4x16x256xf32>
    %181 = arith.addf %179, %180 : vector<4x16x256xf32>
    %cst_121 = arith.constant dense<0xFF800000> : vector<4x16xf32>
    %182 = vector.multi_reduction <maximumf>, %181, %cst_121 [2] : vector<4x16x256xf32> to vector<4x16xf32>
    %c16_122 = arith.constant 16 : index
    %c0_123 = arith.constant 0 : index
    %183 = vector.load %arg9[%c16_122, %c0_123] : memref<128x256xf32, #tpu.memory_space<vmem>>, vector<16x256xf32>
    %184 = vector.shape_cast %175 : vector<4x256xf32> to vector<4x1x256xf32>
    %185 = vector.shape_cast %183 : vector<16x256xf32> to vector<1x16x256xf32>
    %186 = vector.broadcast %184 : vector<4x1x256xf32> to vector<4x16x256xf32>
    %187 = vector.broadcast %185 : vector<1x16x256xf32> to vector<4x16x256xf32>
    %188 = arith.addf %186, %187 : vector<4x16x256xf32>
    %cst_124 = arith.constant dense<0xFF800000> : vector<4x16xf32>
    %189 = vector.multi_reduction <maximumf>, %188, %cst_124 [2] : vector<4x16x256xf32> to vector<4x16xf32>
    %c32_125 = arith.constant 32 : index
    %c0_126 = arith.constant 0 : index
    %190 = vector.load %arg9[%c32_125, %c0_126] : memref<128x256xf32, #tpu.memory_space<vmem>>, vector<16x256xf32>
    %191 = vector.shape_cast %175 : vector<4x256xf32> to vector<4x1x256xf32>
    %192 = vector.shape_cast %190 : vector<16x256xf32> to vector<1x16x256xf32>
    %193 = vector.broadcast %191 : vector<4x1x256xf32> to vector<4x16x256xf32>
    %194 = vector.broadcast %192 : vector<1x16x256xf32> to vector<4x16x256xf32>
    %195 = arith.addf %193, %194 : vector<4x16x256xf32>
    %cst_127 = arith.constant dense<0xFF800000> : vector<4x16xf32>
    %196 = vector.multi_reduction <maximumf>, %195, %cst_127 [2] : vector<4x16x256xf32> to vector<4x16xf32>
    %c48_128 = arith.constant 48 : index
    %c0_129 = arith.constant 0 : index
    %197 = vector.load %arg9[%c48_128, %c0_129] : memref<128x256xf32, #tpu.memory_space<vmem>>, vector<16x256xf32>
    %198 = vector.shape_cast %175 : vector<4x256xf32> to vector<4x1x256xf32>
    %199 = vector.shape_cast %197 : vector<16x256xf32> to vector<1x16x256xf32>
    %200 = vector.broadcast %198 : vector<4x1x256xf32> to vector<4x16x256xf32>
    %201 = vector.broadcast %199 : vector<1x16x256xf32> to vector<4x16x256xf32>
    %202 = arith.addf %200, %201 : vector<4x16x256xf32>
    %cst_130 = arith.constant dense<0xFF800000> : vector<4x16xf32>
    %203 = vector.multi_reduction <maximumf>, %202, %cst_130 [2] : vector<4x16x256xf32> to vector<4x16xf32>
    %c64_131 = arith.constant 64 : index
    %c0_132 = arith.constant 0 : index
    %204 = vector.load %arg9[%c64_131, %c0_132] : memref<128x256xf32, #tpu.memory_space<vmem>>, vector<16x256xf32>
    %205 = vector.shape_cast %175 : vector<4x256xf32> to vector<4x1x256xf32>
    %206 = vector.shape_cast %204 : vector<16x256xf32> to vector<1x16x256xf32>
    %207 = vector.broadcast %205 : vector<4x1x256xf32> to vector<4x16x256xf32>
    %208 = vector.broadcast %206 : vector<1x16x256xf32> to vector<4x16x256xf32>
    %209 = arith.addf %207, %208 : vector<4x16x256xf32>
    %cst_133 = arith.constant dense<0xFF800000> : vector<4x16xf32>
    %210 = vector.multi_reduction <maximumf>, %209, %cst_133 [2] : vector<4x16x256xf32> to vector<4x16xf32>
    %c80_134 = arith.constant 80 : index
    %c0_135 = arith.constant 0 : index
    %211 = vector.load %arg9[%c80_134, %c0_135] : memref<128x256xf32, #tpu.memory_space<vmem>>, vector<16x256xf32>
    %212 = vector.shape_cast %175 : vector<4x256xf32> to vector<4x1x256xf32>
    %213 = vector.shape_cast %211 : vector<16x256xf32> to vector<1x16x256xf32>
    %214 = vector.broadcast %212 : vector<4x1x256xf32> to vector<4x16x256xf32>
    %215 = vector.broadcast %213 : vector<1x16x256xf32> to vector<4x16x256xf32>
    %216 = arith.addf %214, %215 : vector<4x16x256xf32>
    %cst_136 = arith.constant dense<0xFF800000> : vector<4x16xf32>
    %217 = vector.multi_reduction <maximumf>, %216, %cst_136 [2] : vector<4x16x256xf32> to vector<4x16xf32>
    %c96_137 = arith.constant 96 : index
    %c0_138 = arith.constant 0 : index
    %218 = vector.load %arg9[%c96_137, %c0_138] : memref<128x256xf32, #tpu.memory_space<vmem>>, vector<16x256xf32>
    %219 = vector.shape_cast %175 : vector<4x256xf32> to vector<4x1x256xf32>
    %220 = vector.shape_cast %218 : vector<16x256xf32> to vector<1x16x256xf32>
    %221 = vector.broadcast %219 : vector<4x1x256xf32> to vector<4x16x256xf32>
    %222 = vector.broadcast %220 : vector<1x16x256xf32> to vector<4x16x256xf32>
    %223 = arith.addf %221, %222 : vector<4x16x256xf32>
    %cst_139 = arith.constant dense<0xFF800000> : vector<4x16xf32>
    %224 = vector.multi_reduction <maximumf>, %223, %cst_139 [2] : vector<4x16x256xf32> to vector<4x16xf32>
    %c112_140 = arith.constant 112 : index
    %c0_141 = arith.constant 0 : index
    %225 = vector.load %arg9[%c112_140, %c0_141] : memref<128x256xf32, #tpu.memory_space<vmem>>, vector<16x256xf32>
    %226 = vector.shape_cast %175 : vector<4x256xf32> to vector<4x1x256xf32>
    %227 = vector.shape_cast %225 : vector<16x256xf32> to vector<1x16x256xf32>
    %228 = vector.broadcast %226 : vector<4x1x256xf32> to vector<4x16x256xf32>
    %229 = vector.broadcast %227 : vector<1x16x256xf32> to vector<4x16x256xf32>
    %230 = arith.addf %228, %229 : vector<4x16x256xf32>
    %cst_142 = arith.constant dense<0xFF800000> : vector<4x16xf32>
    %231 = vector.multi_reduction <maximumf>, %230, %cst_142 [2] : vector<4x16x256xf32> to vector<4x16xf32>
    %232 = tpu.concatenate %182, %189, %196, %203, %210, %217, %224, %231 in 1 : vector<4x16xf32>, vector<4x16xf32>, vector<4x16xf32>, vector<4x16xf32>, vector<4x16xf32>, vector<4x16xf32>, vector<4x16xf32>, vector<4x16xf32> -> vector<4x128xf32>
    %c0_143 = arith.constant 0 : index
    %c0_144 = arith.constant 0 : index
    %c0_145 = arith.constant 0 : index
    %233 = vector.load %arg7[%c0_143, %c0_144, %c0_145] : memref<1x4x1xf32, #tpu.memory_space<vmem>>, vector<1x4x1xf32>
    %234 = vector.shape_cast %233 : vector<1x4x1xf32> to vector<4x1xf32>
    %235 = vector.broadcast %234 : vector<4x1xf32> to vector<4x128xf32>
    %236 = arith.addf %232, %235 : vector<4x128xf32>
    %237 = vector.broadcast %4 : vector<1x128xf32> to vector<4x128xf32>
    %238 = arith.mulf %236, %237 : vector<4x128xf32>
    %239 = arith.truncf %121 : vector<4x128xf32> to vector<4x128xbf16>
    %240 = arith.truncf %238 : vector<4x128xf32> to vector<4x128xbf16>
    %cst_146 = arith.constant dense<0.000000e+00> : vector<4x4xf32>
    %241 = tpu.matmul %239, %240, %cst_146 {dimension_numbers = #tpu.dot_dimension_numbers<[1], [1], [0], [0], [0, 0, 1, 0], [], []>} : vector<4x128xbf16>, vector<4x128xbf16>, vector<4x4xf32> -> vector<4x4xf32>
    %242 = arith.negf %241 : vector<4x4xf32>
    %243 = math.exp %242 : vector<4x4xf32>
    %cst_147 = arith.constant 1.000000e+00 : f32
    %244 = vector.broadcast %cst_147 : f32 to vector<4x4xf32>
    %245 = arith.addf %244, %243 : vector<4x4xf32>
    %246 = arith.divf %244, %245 : vector<4x4xf32>
    %cst_148 = arith.constant 0.000000e+00 : f32
    %247 = vector.broadcast %cst_148 : f32 to vector<4x256xf32>
    %c34_i32 = arith.constant 34 : i32
    %248 = tpu.dynamic_rotate %1 by %c34_i32 dim 1 : vector<4x256xf32>, i32 -> vector<4x256xf32>
    %c0_149 = arith.constant 0 : index
    %c0_150 = arith.constant 0 : index
    %c0_151 = arith.constant 0 : index
    %249 = vector.load %arg11[%c0_149, %c0_150, %c0_151] : memref<9x1x256xf32, #tpu.memory_space<vmem>>, vector<1x1x256xf32>
    %250 = vector.shape_cast %249 : vector<1x1x256xf32> to vector<1x256xf32>
    %251 = vector.broadcast %250 : vector<1x256xf32> to vector<4x256xf32>
    %252 = arith.mulf %248, %251 : vector<4x256xf32>
    %c0_152 = arith.constant 0 : index
    %c0_153 = arith.constant 0 : index
    %c0_154 = arith.constant 0 : index
    %c0_155 = arith.constant 0 : index
    %253 = vector.load %arg8[%c0_152, %c0_153, %c0_154, %c0_155] : memref<1x9x4x4xbf16, #tpu.memory_space<vmem>>, vector<1x1x4x4xbf16>
    %254 = vector.shape_cast %253 : vector<1x1x4x4xbf16> to vector<4x4xbf16>
    %255 = arith.truncf %252 : vector<4x256xf32> to vector<4x256xbf16>
    %cst_156 = arith.constant dense<0.000000e+00> : vector<4x256xf32>
    %256 = tpu.matmul %254, %255, %cst_156 {dimension_numbers = #tpu.dot_dimension_numbers<[1], [0], [0], [1], [0, 0, 1, 1], [], []>} : vector<4x4xbf16>, vector<4x256xbf16>, vector<4x256xf32> -> vector<4x256xf32>
    %257 = arith.addf %247, %256 : vector<4x256xf32>
    %c32_i32 = arith.constant 32 : i32
    %258 = tpu.dynamic_rotate %1 by %c32_i32 dim 1 : vector<4x256xf32>, i32 -> vector<4x256xf32>
    %c1_157 = arith.constant 1 : index
    %c0_158 = arith.constant 0 : index
    %c0_159 = arith.constant 0 : index
    %259 = vector.load %arg11[%c1_157, %c0_158, %c0_159] : memref<9x1x256xf32, #tpu.memory_space<vmem>>, vector<1x1x256xf32>
    %260 = vector.shape_cast %259 : vector<1x1x256xf32> to vector<1x256xf32>
    %261 = vector.broadcast %260 : vector<1x256xf32> to vector<4x256xf32>
    %262 = arith.mulf %258, %261 : vector<4x256xf32>
    %c0_160 = arith.constant 0 : index
    %c1_161 = arith.constant 1 : index
    %c0_162 = arith.constant 0 : index
    %c0_163 = arith.constant 0 : index
    %263 = vector.load %arg8[%c0_160, %c1_161, %c0_162, %c0_163] : memref<1x9x4x4xbf16, #tpu.memory_space<vmem>>, vector<1x1x4x4xbf16>
    %264 = vector.shape_cast %263 : vector<1x1x4x4xbf16> to vector<4x4xbf16>
    %265 = arith.truncf %262 : vector<4x256xf32> to vector<4x256xbf16>
    %cst_164 = arith.constant dense<0.000000e+00> : vector<4x256xf32>
    %266 = tpu.matmul %264, %265, %cst_164 {dimension_numbers = #tpu.dot_dimension_numbers<[1], [0], [0], [1], [0, 0, 1, 1], [], []>} : vector<4x4xbf16>, vector<4x256xbf16>, vector<4x256xf32> -> vector<4x256xf32>
    %267 = arith.addf %257, %266 : vector<4x256xf32>
    %c30_i32 = arith.constant 30 : i32
    %268 = tpu.dynamic_rotate %1 by %c30_i32 dim 1 : vector<4x256xf32>, i32 -> vector<4x256xf32>
    %c2_165 = arith.constant 2 : index
    %c0_166 = arith.constant 0 : index
    %c0_167 = arith.constant 0 : index
    %269 = vector.load %arg11[%c2_165, %c0_166, %c0_167] : memref<9x1x256xf32, #tpu.memory_space<vmem>>, vector<1x1x256xf32>
    %270 = vector.shape_cast %269 : vector<1x1x256xf32> to vector<1x256xf32>
    %271 = vector.broadcast %270 : vector<1x256xf32> to vector<4x256xf32>
    %272 = arith.mulf %268, %271 : vector<4x256xf32>
    %c0_168 = arith.constant 0 : index
    %c2_169 = arith.constant 2 : index
    %c0_170 = arith.constant 0 : index
    %c0_171 = arith.constant 0 : index
    %273 = vector.load %arg8[%c0_168, %c2_169, %c0_170, %c0_171] : memref<1x9x4x4xbf16, #tpu.memory_space<vmem>>, vector<1x1x4x4xbf16>
    %274 = vector.shape_cast %273 : vector<1x1x4x4xbf16> to vector<4x4xbf16>
    %275 = arith.truncf %272 : vector<4x256xf32> to vector<4x256xbf16>
    %cst_172 = arith.constant dense<0.000000e+00> : vector<4x256xf32>
    %276 = tpu.matmul %274, %275, %cst_172 {dimension_numbers = #tpu.dot_dimension_numbers<[1], [0], [0], [1], [0, 0, 1, 1], [], []>} : vector<4x4xbf16>, vector<4x256xbf16>, vector<4x256xf32> -> vector<4x256xf32>
    %277 = arith.addf %267, %276 : vector<4x256xf32>
    %c2_i32 = arith.constant 2 : i32
    %278 = tpu.dynamic_rotate %1 by %c2_i32 dim 1 : vector<4x256xf32>, i32 -> vector<4x256xf32>
    %c3_173 = arith.constant 3 : index
    %c0_174 = arith.constant 0 : index
    %c0_175 = arith.constant 0 : index
    %279 = vector.load %arg11[%c3_173, %c0_174, %c0_175] : memref<9x1x256xf32, #tpu.memory_space<vmem>>, vector<1x1x256xf32>
    %280 = vector.shape_cast %279 : vector<1x1x256xf32> to vector<1x256xf32>
    %281 = vector.broadcast %280 : vector<1x256xf32> to vector<4x256xf32>
    %282 = arith.mulf %278, %281 : vector<4x256xf32>
    %c0_176 = arith.constant 0 : index
    %c3_177 = arith.constant 3 : index
    %c0_178 = arith.constant 0 : index
    %c0_179 = arith.constant 0 : index
    %283 = vector.load %arg8[%c0_176, %c3_177, %c0_178, %c0_179] : memref<1x9x4x4xbf16, #tpu.memory_space<vmem>>, vector<1x1x4x4xbf16>
    %284 = vector.shape_cast %283 : vector<1x1x4x4xbf16> to vector<4x4xbf16>
    %285 = arith.truncf %282 : vector<4x256xf32> to vector<4x256xbf16>
    %cst_180 = arith.constant dense<0.000000e+00> : vector<4x256xf32>
    %286 = tpu.matmul %284, %285, %cst_180 {dimension_numbers = #tpu.dot_dimension_numbers<[1], [0], [0], [1], [0, 0, 1, 1], [], []>} : vector<4x4xbf16>, vector<4x256xbf16>, vector<4x256xf32> -> vector<4x256xf32>
    %287 = arith.addf %277, %286 : vector<4x256xf32>
    %c4_181 = arith.constant 4 : index
    %c0_182 = arith.constant 0 : index
    %c0_183 = arith.constant 0 : index
    %288 = vector.load %arg11[%c4_181, %c0_182, %c0_183] : memref<9x1x256xf32, #tpu.memory_space<vmem>>, vector<1x1x256xf32>
    %289 = vector.shape_cast %288 : vector<1x1x256xf32> to vector<1x256xf32>
    %290 = vector.broadcast %289 : vector<1x256xf32> to vector<4x256xf32>
    %291 = arith.mulf %1, %290 : vector<4x256xf32>
    %c0_184 = arith.constant 0 : index
    %c4_185 = arith.constant 4 : index
    %c0_186 = arith.constant 0 : index
    %c0_187 = arith.constant 0 : index
    %292 = vector.load %arg8[%c0_184, %c4_185, %c0_186, %c0_187] : memref<1x9x4x4xbf16, #tpu.memory_space<vmem>>, vector<1x1x4x4xbf16>
    %293 = vector.shape_cast %292 : vector<1x1x4x4xbf16> to vector<4x4xbf16>
    %294 = arith.truncf %291 : vector<4x256xf32> to vector<4x256xbf16>
    %cst_188 = arith.constant dense<0.000000e+00> : vector<4x256xf32>
    %295 = tpu.matmul %293, %294, %cst_188 {dimension_numbers = #tpu.dot_dimension_numbers<[1], [0], [0], [1], [0, 0, 1, 1], [], []>} : vector<4x4xbf16>, vector<4x256xbf16>, vector<4x256xf32> -> vector<4x256xf32>
    %296 = arith.addf %287, %295 : vector<4x256xf32>
    %c254_i32 = arith.constant 254 : i32
    %297 = tpu.dynamic_rotate %1 by %c254_i32 dim 1 : vector<4x256xf32>, i32 -> vector<4x256xf32>
    %c5_189 = arith.constant 5 : index
    %c0_190 = arith.constant 0 : index
    %c0_191 = arith.constant 0 : index
    %298 = vector.load %arg11[%c5_189, %c0_190, %c0_191] : memref<9x1x256xf32, #tpu.memory_space<vmem>>, vector<1x1x256xf32>
    %299 = vector.shape_cast %298 : vector<1x1x256xf32> to vector<1x256xf32>
    %300 = vector.broadcast %299 : vector<1x256xf32> to vector<4x256xf32>
    %301 = arith.mulf %297, %300 : vector<4x256xf32>
    %c0_192 = arith.constant 0 : index
    %c5_193 = arith.constant 5 : index
    %c0_194 = arith.constant 0 : index
    %c0_195 = arith.constant 0 : index
    %302 = vector.load %arg8[%c0_192, %c5_193, %c0_194, %c0_195] : memref<1x9x4x4xbf16, #tpu.memory_space<vmem>>, vector<1x1x4x4xbf16>
    %303 = vector.shape_cast %302 : vector<1x1x4x4xbf16> to vector<4x4xbf16>
    %304 = arith.truncf %301 : vector<4x256xf32> to vector<4x256xbf16>
    %cst_196 = arith.constant dense<0.000000e+00> : vector<4x256xf32>
    %305 = tpu.matmul %303, %304, %cst_196 {dimension_numbers = #tpu.dot_dimension_numbers<[1], [0], [0], [1], [0, 0, 1, 1], [], []>} : vector<4x4xbf16>, vector<4x256xbf16>, vector<4x256xf32> -> vector<4x256xf32>
    %306 = arith.addf %296, %305 : vector<4x256xf32>
    %c226_i32 = arith.constant 226 : i32
    %307 = tpu.dynamic_rotate %1 by %c226_i32 dim 1 : vector<4x256xf32>, i32 -> vector<4x256xf32>
    %c6_197 = arith.constant 6 : index
    %c0_198 = arith.constant 0 : index
    %c0_199 = arith.constant 0 : index
    %308 = vector.load %arg11[%c6_197, %c0_198, %c0_199] : memref<9x1x256xf32, #tpu.memory_space<vmem>>, vector<1x1x256xf32>
    %309 = vector.shape_cast %308 : vector<1x1x256xf32> to vector<1x256xf32>
    %310 = vector.broadcast %309 : vector<1x256xf32> to vector<4x256xf32>
    %311 = arith.mulf %307, %310 : vector<4x256xf32>
    %c0_200 = arith.constant 0 : index
    %c6_201 = arith.constant 6 : index
    %c0_202 = arith.constant 0 : index
    %c0_203 = arith.constant 0 : index
    %312 = vector.load %arg8[%c0_200, %c6_201, %c0_202, %c0_203] : memref<1x9x4x4xbf16, #tpu.memory_space<vmem>>, vector<1x1x4x4xbf16>
    %313 = vector.shape_cast %312 : vector<1x1x4x4xbf16> to vector<4x4xbf16>
    %314 = arith.truncf %311 : vector<4x256xf32> to vector<4x256xbf16>
    %cst_204 = arith.constant dense<0.000000e+00> : vector<4x256xf32>
    %315 = tpu.matmul %313, %314, %cst_204 {dimension_numbers = #tpu.dot_dimension_numbers<[1], [0], [0], [1], [0, 0, 1, 1], [], []>} : vector<4x4xbf16>, vector<4x256xbf16>, vector<4x256xf32> -> vector<4x256xf32>
    %316 = arith.addf %306, %315 : vector<4x256xf32>
    %c224_i32 = arith.constant 224 : i32
    %317 = tpu.dynamic_rotate %1 by %c224_i32 dim 1 : vector<4x256xf32>, i32 -> vector<4x256xf32>
    %c7_205 = arith.constant 7 : index
    %c0_206 = arith.constant 0 : index
    %c0_207 = arith.constant 0 : index
    %318 = vector.load %arg11[%c7_205, %c0_206, %c0_207] : memref<9x1x256xf32, #tpu.memory_space<vmem>>, vector<1x1x256xf32>
    %319 = vector.shape_cast %318 : vector<1x1x256xf32> to vector<1x256xf32>
    %320 = vector.broadcast %319 : vector<1x256xf32> to vector<4x256xf32>
    %321 = arith.mulf %317, %320 : vector<4x256xf32>
    %c0_208 = arith.constant 0 : index
    %c7_209 = arith.constant 7 : index
    %c0_210 = arith.constant 0 : index
    %c0_211 = arith.constant 0 : index
    %322 = vector.load %arg8[%c0_208, %c7_209, %c0_210, %c0_211] : memref<1x9x4x4xbf16, #tpu.memory_space<vmem>>, vector<1x1x4x4xbf16>
    %323 = vector.shape_cast %322 : vector<1x1x4x4xbf16> to vector<4x4xbf16>
    %324 = arith.truncf %321 : vector<4x256xf32> to vector<4x256xbf16>
    %cst_212 = arith.constant dense<0.000000e+00> : vector<4x256xf32>
    %325 = tpu.matmul %323, %324, %cst_212 {dimension_numbers = #tpu.dot_dimension_numbers<[1], [0], [0], [1], [0, 0, 1, 1], [], []>} : vector<4x4xbf16>, vector<4x256xbf16>, vector<4x256xf32> -> vector<4x256xf32>
    %326 = arith.addf %316, %325 : vector<4x256xf32>
    %c222_i32 = arith.constant 222 : i32
    %327 = tpu.dynamic_rotate %1 by %c222_i32 dim 1 : vector<4x256xf32>, i32 -> vector<4x256xf32>
    %c8_213 = arith.constant 8 : index
    %c0_214 = arith.constant 0 : index
    %c0_215 = arith.constant 0 : index
    %328 = vector.load %arg11[%c8_213, %c0_214, %c0_215] : memref<9x1x256xf32, #tpu.memory_space<vmem>>, vector<1x1x256xf32>
    %329 = vector.shape_cast %328 : vector<1x1x256xf32> to vector<1x256xf32>
    %330 = vector.broadcast %329 : vector<1x256xf32> to vector<4x256xf32>
    %331 = arith.mulf %327, %330 : vector<4x256xf32>
    %c0_216 = arith.constant 0 : index
    %c8_217 = arith.constant 8 : index
    %c0_218 = arith.constant 0 : index
    %c0_219 = arith.constant 0 : index
    %332 = vector.load %arg8[%c0_216, %c8_217, %c0_218, %c0_219] : memref<1x9x4x4xbf16, #tpu.memory_space<vmem>>, vector<1x1x4x4xbf16>
    %333 = vector.shape_cast %332 : vector<1x1x4x4xbf16> to vector<4x4xbf16>
    %334 = arith.truncf %331 : vector<4x256xf32> to vector<4x256xbf16>
    %cst_220 = arith.constant dense<0.000000e+00> : vector<4x256xf32>
    %335 = tpu.matmul %333, %334, %cst_220 {dimension_numbers = #tpu.dot_dimension_numbers<[1], [0], [0], [1], [0, 0, 1, 1], [], []>} : vector<4x4xbf16>, vector<4x256xbf16>, vector<4x256xf32> -> vector<4x256xf32>
    %336 = arith.addf %326, %335 : vector<4x256xf32>
    %337 = arith.truncf %246 : vector<4x4xf32> to vector<4x4xbf16>
    %338 = arith.truncf %336 : vector<4x256xf32> to vector<4x256xbf16>
    %cst_221 = arith.constant dense<0.000000e+00> : vector<4x256xf32>
    %339 = tpu.matmul %337, %338, %cst_221 {dimension_numbers = #tpu.dot_dimension_numbers<[1], [0], [0], [1], [0, 0, 1, 1], [], []>} : vector<4x4xbf16>, vector<4x256xbf16>, vector<4x256xf32> -> vector<4x256xf32>
    %340 = arith.truncf %339 : vector<4x256xf32> to vector<4x256xbf16>
    %c0_222 = arith.constant 0 : index
    %c0_223 = arith.constant 0 : index
    %c0_224 = arith.constant 0 : index
    %341 = vector.load %arg12[%c0_222, %c0_223, %c0_224] : memref<1x4x256xbf16, #tpu.memory_space<vmem>>, vector<1x4x256xbf16>
    %342 = vector.shape_cast %341 : vector<1x4x256xbf16> to vector<4x256xbf16>
    %343 = vector.shape_cast %340 : vector<4x256xbf16> to vector<1x4x256xbf16>
    tpu.vector_store %arg12[%c0_222, %c0_223, %c0_224], %343 {strides = array<i32>} : memref<1x4x256xbf16, #tpu.memory_space<vmem>>, vector<1x4x256xbf16>,
    %344 = arith.truncf %3 : vector<4x256xf32> to vector<4x256xbf16>
    %c0_225 = arith.constant 0 : index
    %c0_226 = arith.constant 0 : index
    %345 = vector.load %arg13[%c0_225, %c0_226] : memref<4x256xbf16, #tpu.memory_space<vmem>>, vector<4x256xbf16>
    tpu.vector_store %arg13[%c0_225, %c0_226], %344 {strides = array<i32>} : memref<4x256xbf16, #tpu.memory_space<vmem>>, vector<4x256xbf16>,
    return
  }
  func.func @transform_0(%arg0: i32, %arg1: i32) -> (i32, i32, i32, i32) {
    %c0_i32 = arith.constant 0 : i32
    %c0_i32_0 = arith.constant 0 : i32
    %c0_i32_1 = arith.constant 0 : i32
    return %arg0, %arg1, %c0_i32, %c0_i32_0 : i32, i32, i32, i32
  }
  func.func @transform_1(%arg0: i32, %arg1: i32) -> (i32, i32, i32) {
    %c0_i32 = arith.constant 0 : i32
    %c0_i32_0 = arith.constant 0 : i32
    %c0_i32_1 = arith.constant 0 : i32
    return %arg1, %c0_i32, %c0_i32_0 : i32, i32, i32
  }
  func.func @transform_2(%arg0: i32, %arg1: i32) -> (i32, i32, i32, i32) {
    %c0_i32 = arith.constant 0 : i32
    %c0_i32_0 = arith.constant 0 : i32
    %c0_i32_1 = arith.constant 0 : i32
    %c0_i32_2 = arith.constant 0 : i32
    return %arg0, %c0_i32, %c0_i32_0, %c0_i32_1 : i32, i32, i32, i32
  }
  func.func @transform_3(%arg0: i32, %arg1: i32) -> (i32, i32, i32) {
    %c0_i32 = arith.constant 0 : i32
    %c0_i32_0 = arith.constant 0 : i32
    %c0_i32_1 = arith.constant 0 : i32
    return %arg0, %c0_i32, %c0_i32_0 : i32, i32, i32
  }
  func.func @transform_4(%arg0: i32, %arg1: i32) -> (i32, i32, i32, i32) {
    %c0_i32 = arith.constant 0 : i32
    %c0_i32_0 = arith.constant 0 : i32
    %c0_i32_1 = arith.constant 0 : i32
    %c0_i32_2 = arith.constant 0 : i32
    return %arg0, %c0_i32, %c0_i32_0, %c0_i32_1 : i32, i32, i32, i32
  }
  func.func @transform_5(%arg0: i32, %arg1: i32) -> (i32, i32, i32) {
    %c0_i32 = arith.constant 0 : i32
    %c0_i32_0 = arith.constant 0 : i32
    %c0_i32_1 = arith.constant 0 : i32
    return %arg0, %c0_i32, %c0_i32_0 : i32, i32, i32
  }
  func.func @transform_6(%arg0: i32, %arg1: i32) -> (i32, i32, i32, i32) {
    %c0_i32 = arith.constant 0 : i32
    %c0_i32_0 = arith.constant 0 : i32
    %c0_i32_1 = arith.constant 0 : i32
    %c0_i32_2 = arith.constant 0 : i32
    return %arg0, %c0_i32, %c0_i32_0, %c0_i32_1 : i32, i32, i32, i32
  }
  func.func @transform_7(%arg0: i32, %arg1: i32) -> (i32, i32) {
    %c0_i32 = arith.constant 0 : i32
    %c0_i32_0 = arith.constant 0 : i32
    %c0_i32_1 = arith.constant 0 : i32
    return %c0_i32, %c0_i32_0 : i32, i32
  }
  func.func @transform_8(%arg0: i32, %arg1: i32) -> (i32, i32) {
    %c0_i32 = arith.constant 0 : i32
    %c0_i32_0 = arith.constant 0 : i32
    %c0_i32_1 = arith.constant 0 : i32
    return %c0_i32, %c0_i32_0 : i32, i32
  }
  func.func @transform_9(%arg0: i32, %arg1: i32) -> (i32, i32, i32) {
    %c0_i32 = arith.constant 0 : i32
    %c0_i32_0 = arith.constant 0 : i32
    %c0_i32_1 = arith.constant 0 : i32
    %c0_i32_2 = arith.constant 0 : i32
    return %c0_i32, %c0_i32_0, %c0_i32_1 : i32, i32, i32
  }
  func.func @transform_10(%arg0: i32, %arg1: i32) -> (i32, i32, i32) {
    %c0_i32 = arith.constant 0 : i32
    %c0_i32_0 = arith.constant 0 : i32
    return %arg0, %c0_i32, %arg1 : i32, i32, i32
  }
  func.func @transform_11(%arg0: i32, %arg1: i32) -> (i32, i32) {
    %c0_i32 = arith.constant 0 : i32
    %c0_i32_0 = arith.constant 0 : i32
    return %c0_i32, %arg1 : i32, i32
  }
}

module attributes {stable_mosaic.version = 11 : i64} {
  func.func @outconv_bn_kernel(%arg0: i32, %arg1: memref<2x4x512xbf16, #tpu.memory_space<vmem>>, %arg2: memref<4x512xbf16, #tpu.memory_space<vmem>>, %arg3: memref<3x4x4xbf16, #tpu.memory_space<vmem>>, %arg4: memref<4x1xf32, #tpu.memory_space<vmem>>, %arg5: memref<4x1xf32, #tpu.memory_space<vmem>>, %arg6: memref<4x512xf32, #tpu.memory_space<vmem>>) attributes {dimension_semantics = [#tpu.dimension_semantics<parallel>], iteration_bounds = array<i64: 1>, scalar_prefetch = 0 : i64, scratch_operands = 0 : i64, tpu.core_type = #tpu.core_type<tc>, window_params = [{pipeline_mode = #tpu.pipeline_mode<synchronous>, transform_indices = @transform_0, window_bounds = array<i64: 2, 4, 512>}, {pipeline_mode = #tpu.pipeline_mode<synchronous>, transform_indices = @transform_1, window_bounds = array<i64: 4, 512>}, {transform_indices = @transform_2, window_bounds = array<i64: 3, 4, 4>}, {transform_indices = @transform_3, window_bounds = array<i64: 4, 1>}, {transform_indices = @transform_4, window_bounds = array<i64: 4, 1>}, {transform_indices = @transform_5, window_bounds = array<i64: 4, 512>}]} {
    %c0 = arith.constant 0 : index
    %c0_0 = arith.constant 0 : index
    %c0_1 = arith.constant 0 : index
    %0 = vector.load %arg3[%c0, %c0_0, %c0_1] : memref<3x4x4xbf16, #tpu.memory_space<vmem>>, vector<1x4x4xbf16>
    %1 = vector.shape_cast %0 : vector<1x4x4xbf16> to vector<4x4xbf16>
    %c0_2 = arith.constant 0 : index
    %c0_3 = arith.constant 0 : index
    %c0_4 = arith.constant 0 : index
    %2 = vector.load %arg1[%c0_2, %c0_3, %c0_4] : memref<2x4x512xbf16, #tpu.memory_space<vmem>>, vector<1x4x512xbf16>
    %3 = vector.shape_cast %2 : vector<1x4x512xbf16> to vector<4x512xbf16>
    %cst = arith.constant dense<0.000000e+00> : vector<4x512xf32>
    %4 = tpu.matmul %1, %3, %cst {dimension_numbers = #tpu.dot_dimension_numbers<[1], [0], [0], [1], [0, 0, 1, 1], [], []>} : vector<4x4xbf16>, vector<4x512xbf16>, vector<4x512xf32> -> vector<4x512xf32>
    %c1 = arith.constant 1 : index
    %c0_5 = arith.constant 0 : index
    %c0_6 = arith.constant 0 : index
    %5 = vector.load %arg3[%c1, %c0_5, %c0_6] : memref<3x4x4xbf16, #tpu.memory_space<vmem>>, vector<1x4x4xbf16>
    %6 = vector.shape_cast %5 : vector<1x4x4xbf16> to vector<4x4xbf16>
    %c0_7 = arith.constant 0 : index
    %c0_8 = arith.constant 0 : index
    %7 = vector.load %arg2[%c0_7, %c0_8] : memref<4x512xbf16, #tpu.memory_space<vmem>>, vector<4x512xbf16>
    %cst_9 = arith.constant dense<0.000000e+00> : vector<4x512xf32>
    %8 = tpu.matmul %6, %7, %cst_9 {dimension_numbers = #tpu.dot_dimension_numbers<[1], [0], [0], [1], [0, 0, 1, 1], [], []>} : vector<4x4xbf16>, vector<4x512xbf16>, vector<4x512xf32> -> vector<4x512xf32>
    %9 = arith.addf %4, %8 : vector<4x512xf32>
    %c2 = arith.constant 2 : index
    %c0_10 = arith.constant 0 : index
    %c0_11 = arith.constant 0 : index
    %10 = vector.load %arg3[%c2, %c0_10, %c0_11] : memref<3x4x4xbf16, #tpu.memory_space<vmem>>, vector<1x4x4xbf16>
    %11 = vector.shape_cast %10 : vector<1x4x4xbf16> to vector<4x4xbf16>
    %c1_12 = arith.constant 1 : index
    %c0_13 = arith.constant 0 : index
    %c0_14 = arith.constant 0 : index
    %12 = vector.load %arg1[%c1_12, %c0_13, %c0_14] : memref<2x4x512xbf16, #tpu.memory_space<vmem>>, vector<1x4x512xbf16>
    %13 = vector.shape_cast %12 : vector<1x4x512xbf16> to vector<4x512xbf16>
    %cst_15 = arith.constant dense<0.000000e+00> : vector<4x512xf32>
    %14 = tpu.matmul %11, %13, %cst_15 {dimension_numbers = #tpu.dot_dimension_numbers<[1], [0], [0], [1], [0, 0, 1, 1], [], []>} : vector<4x4xbf16>, vector<4x512xbf16>, vector<4x512xf32> -> vector<4x512xf32>
    %15 = arith.addf %9, %14 : vector<4x512xf32>
    %cst_16 = arith.constant dense<0.000000e+00> : vector<4xf32>
    %16 = vector.multi_reduction <add>, %15, %cst_16 [1] : vector<4x512xf32> to vector<4xf32>
    %17 = vector.shape_cast %16 : vector<4xf32> to vector<4x1xf32>
    %cst_17 = arith.constant 5.120000e+02 : f32
    %18 = vector.broadcast %cst_17 : f32 to vector<4x1xf32>
    %19 = arith.divf %17, %18 : vector<4x1xf32>
    %20 = vector.broadcast %19 : vector<4x1xf32> to vector<4x512xf32>
    %21 = arith.subf %15, %20 : vector<4x512xf32>
    %22 = arith.mulf %21, %21 : vector<4x512xf32>
    %cst_18 = arith.constant dense<0.000000e+00> : vector<4xf32>
    %23 = vector.multi_reduction <add>, %22, %cst_18 [1] : vector<4x512xf32> to vector<4xf32>
    %24 = vector.shape_cast %23 : vector<4xf32> to vector<4x1xf32>
    %cst_19 = arith.constant 5.120000e+02 : f32
    %25 = vector.broadcast %cst_19 : f32 to vector<4x1xf32>
    %26 = arith.divf %24, %25 : vector<4x1xf32>
    %27 = vector.broadcast %19 : vector<4x1xf32> to vector<4x512xf32>
    %28 = arith.subf %15, %27 : vector<4x512xf32>
    %c0_20 = arith.constant 0 : index
    %c0_21 = arith.constant 0 : index
    %29 = vector.load %arg4[%c0_20, %c0_21] : memref<4x1xf32, #tpu.memory_space<vmem>>, vector<4x1xf32>
    %cst_22 = arith.constant 9.99999974E-6 : f32
    %30 = vector.broadcast %cst_22 : f32 to vector<4x1xf32>
    %31 = arith.addf %26, %30 : vector<4x1xf32>
    %32 = math.rsqrt %31 : vector<4x1xf32>
    %33 = arith.mulf %29, %32 : vector<4x1xf32>
    %34 = vector.broadcast %33 : vector<4x1xf32> to vector<4x512xf32>
    %35 = arith.mulf %28, %34 : vector<4x512xf32>
    %c0_23 = arith.constant 0 : index
    %c0_24 = arith.constant 0 : index
    %36 = vector.load %arg5[%c0_23, %c0_24] : memref<4x1xf32, #tpu.memory_space<vmem>>, vector<4x1xf32>
    %37 = vector.broadcast %36 : vector<4x1xf32> to vector<4x512xf32>
    %38 = arith.addf %35, %37 : vector<4x512xf32>
    %c0_25 = arith.constant 0 : index
    %c0_26 = arith.constant 0 : index
    %39 = vector.load %arg6[%c0_25, %c0_26] : memref<4x512xf32, #tpu.memory_space<vmem>>, vector<4x512xf32>
    tpu.vector_store %arg6[%c0_25, %c0_26], %38 {strides = array<i32>} : memref<4x512xf32, #tpu.memory_space<vmem>>, vector<4x512xf32>,
    return
  }
  func.func @transform_0(%arg0: i32) -> (i32, i32, i32) {
    %c0_i32 = arith.constant 0 : i32
    %c0_i32_0 = arith.constant 0 : i32
    %c0_i32_1 = arith.constant 0 : i32
    %c0_i32_2 = arith.constant 0 : i32
    return %c0_i32, %c0_i32_0, %c0_i32_1 : i32, i32, i32
  }
  func.func @transform_1(%arg0: i32) -> (i32, i32) {
    %c0_i32 = arith.constant 0 : i32
    %c0_i32_0 = arith.constant 0 : i32
    %c0_i32_1 = arith.constant 0 : i32
    return %c0_i32, %c0_i32_0 : i32, i32
  }
  func.func @transform_2(%arg0: i32) -> (i32, i32, i32) {
    %c0_i32 = arith.constant 0 : i32
    %c0_i32_0 = arith.constant 0 : i32
    %c0_i32_1 = arith.constant 0 : i32
    return %c0_i32, %arg0, %c0_i32_0 : i32, i32, i32
  }
  func.func @transform_3(%arg0: i32) -> (i32, i32) {
    %c0_i32 = arith.constant 0 : i32
    %c0_i32_0 = arith.constant 0 : i32
    return %arg0, %c0_i32 : i32, i32
  }
  func.func @transform_4(%arg0: i32) -> (i32, i32) {
    %c0_i32 = arith.constant 0 : i32
    %c0_i32_0 = arith.constant 0 : i32
    return %arg0, %c0_i32 : i32, i32
  }
  func.func @transform_5(%arg0: i32) -> (i32, i32) {
    %c0_i32 = arith.constant 0 : i32
    %c0_i32_0 = arith.constant 0 : i32
    return %arg0, %c0_i32 : i32, i32
  }
}

</mosaic_0001>

<bundles_post_ra>
// kernel: squeeze.5
= control target key start
LH: loop header
LB: loop body
LE: loop exit
PB: predicated region body
PF: predicated region fallthrough
CT: control target
= control target key end

     0   :  { %vm35_vm0 = vcmask 1043458   ;;  %vm40_vm1 = vcmask 1045508   ;;  %vm45_vm2 = vcmask 1047558   ;;  %s79_s6 = smov 3  ;;  %s82_s7 = smov 12  ;;  %vm4_vm3 = vcmask 1047556   ;;  %s726_s0 = inlined_call_operand.vmem [shape: f32[2,4,1,16,16], index: 0, kind: input, shape index: {}]   ;;  %s727_s1 = inlined_call_operand.vmem [shape: f32[2,4,256], index: 1, kind: output, shape index: {}]  }
   0x1   :  { %v406_v0 = vld [vmem:[%s726_s0 + $0x6] ss:$16 sm:%s79_s6]   ;;  %s87_s12 = smov 48  ;;  %s92_s13 = smov 192  ;;  %vm6_vm4 = vcmask 130048   ;;  %vm49_vm5 = vcmask 1048448  }
   0x2   :  { %v407_v1 = vld [vmem:[%s726_s0 + $0x6] ss:$16 sm:%s82_s7]   ;;  %v408_v3 = vld [vmem:[%s726_s0 - $0x32] ss:$16 sm:%s87_s12]   ;;  %s30_s18 = smov 3  ;;  %s33_s21 = smov 12 }
   0x3   :  { %v85_v2 = vsel %vm35_vm0, %v407_v1, %v406_v0  ;;  %v409_v4 = vld [vmem:[%s726_s0 - $0x32] ss:$16 sm:%s92_s13]   ;;  %v398_v6 = vld [vmem:[%s726_s0 + $0x7] ss:$16 sm:%s30_s18]   ;;  %s38_s22 = smov 48  ;;  %s43_s27 = smov 192 }
   0x4   :  { %v90_v5 = vsel %vm40_vm1, %v408_v3, %v85_v2  ;;  %v399_v8 = vld [vmem:[%s726_s0 + $0x7] ss:$16 sm:%s33_s21]   ;;  %v400_v9 = vld [vmem:[%s726_s0 - $0x31] ss:$16 sm:%s38_s22]   ;;  %s464_s28 = smov 96   ;;  %s103_s2 = smov 3 }
   0x5   :  { %v95_v7 = vsel %vm45_vm2, %v409_v4, %v90_v5  ;;  %v36_v10 = vsel %vm35_vm0, %v399_v8, %v398_v6  ;;  %v401_v11 = vld [vmem:[%s726_s0 - $0x31] ss:$16 sm:%s43_s27]   ;;  %s106_s3 = smov 12  ;;  %v410_v13 = vld [vmem:[%s726_s0 + $0x46] ss:$16 sm:%s103_s2]   ;;  %s111_s8 = smov 48 }
   0x6   :  { %96 = vrot.lane.b32.xlu1 %v95_v7, %s464_s28  ;;  %v41_v12 = vsel %vm40_vm1, %v400_v9, %v36_v10  ;;  %v411_v14 = vld [vmem:[%s726_s0 + $0x46] ss:$16 sm:%s106_s3]   ;;  %s116_s9 = smov 192  ;;  %s54_s14 = smov 3  ;;  %vm98_vm6 = vcmask 917248   ;;  %vm147_vm7 = vcmask 786048  }
   0x7   :  { %v46_v15 = vsel %vm45_vm2, %v401_v11, %v41_v12  ;;  %v109_v16 = vsel %vm35_vm0, %v411_v14, %v410_v13  ;;  %v412_v17 = vld [vmem:[%s726_s0 + $0xe] ss:$16 sm:%s111_s8]   ;;  %s57_s15 = smov 12  ;;  %s465_s16 = smov 112   ;;  %v402_v20 = vld [vmem:[%s726_s0 + $0x47] ss:$16 sm:%s54_s14]  }
   0x8   :  { %v413_v18 = vld [vmem:[%s726_s0 + $0xe] ss:$16 sm:%s116_s9]   ;;  %47 = vrot.lane.b32.xlu0 %v46_v15, %s465_s16  ;;  %v114_v19 = vsel %vm40_vm1, %v412_v17, %v109_v16  ;;  %s62_s19 = smov 48  ;;  %s67_s20 = smov 192  ;;  %vm196_vm8 = vcmask 654848   ;;  %vm245_vm9 = vcmask 523648  }
   0x9   :  { %v403_v21 = vld [vmem:[%s726_s0 + $0x47] ss:$16 sm:%s57_s15]   ;;  %v404_v22 = vld [vmem:[%s726_s0 + $0xf] ss:$16 sm:%s62_s19]   ;;  %s201_s25 = smov 3  ;;  %v119_v23 = vsel %vm45_vm2, %v413_v18, %v114_v19  ;;  %s204_s2 = smov 12 }
   0xa   :  { %v60_v24 = vsel %vm35_vm0, %v403_v21, %v402_v20  ;;  %v405_v25 = vld [vmem:[%s726_s0 + $0xf] ss:$16 sm:%s67_s20]   ;;  %v426_v26 = vld [vmem:[%s726_s0 + $0x44] ss:$16 sm:%s201_s25]   ;;  %s209_s3 = smov 48  ;;  %s214_s6 = smov 192 }
   0xb   :  { %v65_v27 = vsel %vm40_vm1, %v404_v22, %v60_v24  ;;  %v427_v28 = vld [vmem:[%s726_s0 + $0x44] ss:$16 sm:%s204_s2]   ;;  %s177_s7 = smov 3  ;;  %v428_v30 = vld [vmem:[%s726_s0 + $0xc] ss:$16 sm:%s209_s3]   ;;  %s180_s12 = smov 12 }
   0xc   :  { %v207_v29 = vsel %vm35_vm0, %v427_v28, %v426_v26  ;;  %v422_v31 = vld [vmem:[%s726_s0 + $0x4] ss:$16 sm:%s177_s7]   ;;  %s185_s13 = smov 48  ;;  %v70_v32 = vsel %vm45_vm2, %v405_v25, %v65_v27  ;;  %s190_s15 = smov 192  ;;  %v429_v35 = vld [vmem:[%s726_s0 + $0xc] ss:$16 sm:%s214_s6]  }
   0xd   :  { %v423_v33 = vld [vmem:[%s726_s0 + $0x4] ss:$16 sm:%s180_s12]   ;;  %s275_s17 = smov 3  ;;  %s278_s18 = smov 12  ;;  %v212_v34 = vsel %vm40_vm1, %v428_v30, %v207_v29  ;;  %v424_v37 = vld [vmem:[%s726_s0 - $0x34] ss:$16 sm:%s185_s13]  }
   0xe   :  { %120 = vrot.lane.b32.xlu1 %v119_v23, %s464_s28  ;;  %v183_v36 = vsel %vm35_vm0, %v423_v33, %v422_v31  ;;  %s283_s23 = smov 48  ;;  %v425_v38 = vld [vmem:[%s726_s0 - $0x34] ss:$16 sm:%s190_s15]   ;;  %s250_s25 = smov 3  ;;  %v217_v41 = vsel %vm45_vm2, %v429_v35, %v212_v34  ;;  %vm294_vm10 = vcmask 392448   ;;  %vm343_vm11 = vcmask 261248  }
   0xf   :  { %v438_v39 = vld [vmem:[%s726_s0 + $0x2] ss:$16 sm:%s275_s17]   ;;  %s288_s2 = smov 192  ;;  %s253_s3 = smov 12  ;;  %v188_v42 = vsel %vm40_vm1, %v424_v37, %v183_v36  ;;  %v440_v43 = vld [vmem:[%s726_s0 - $0x36] ss:$16 sm:%s283_s23]  }
  0x10   :  { %71 = vrot.lane.b32.xlu0 %v70_v32, %s465_s16  ;;  %v439_v40 = vld [vmem:[%s726_s0 + $0x2] ss:$16 sm:%s278_s18]   ;;  %s128_s8 = smov 3  ;;  %s131_s13 = smov 12  ;;  %v193_v50 = vsel %vm45_vm2, %v425_v38, %v188_v42 }
  0x11   :  { %v434_v44 = vld [vmem:[%s726_s0 + $0x43] ss:$16 sm:%s250_s25]   ;;  %v414_v46 = vld [vmem:[%s726_s0 + $0x5] ss:$16 sm:%s128_s8]   ;;  %s136_s28 = smov 48  ;;  %v281_v47 = vsel %vm35_vm0, %v439_v40, %v438_v39  ;;  %s258_s14 = smov 48 }
  0x12   :  { %v435_v45 = vld [vmem:[%s726_s0 + $0x43] ss:$16 sm:%s253_s3]   ;;  %v415_v48 = vld [vmem:[%s726_s0 + $0x5] ss:$16 sm:%s131_s13]   ;;  %s141_s20 = smov 192  ;;  %s466_s21 = smov 64   ;;  %v286_v54 = vsel %vm40_vm1, %v440_v43, %v281_v47 }
  0x13   :  { %v416_v49 = vld [vmem:[%s726_s0 - $0x33] ss:$16 sm:%s136_s28]   ;;  %s263_s22 = smov 192  ;;  %v134_v51 = vsel %vm35_vm0, %v415_v48, %v414_v46  ;;  %s348_s24 = smov 3  ;;  %v441_v55 = vld [vmem:[%s726_s0 - $0x36] ss:$16 sm:%s288_s2]   ;;  %v256_v56 = vsel %vm35_vm0, %v435_v45, %v434_v44 }
  0x14   :  { %v417_v52 = vld [vmem:[%s726_s0 - $0x33] ss:$16 sm:%s141_s20]   ;;  %v139_v53 = vsel %vm40_vm1, %v416_v49, %v134_v51  ;;  %s351_s25 = smov 12  ;;  %v436_v57 = vld [vmem:[%s726_s0 + $0xb] ss:$16 sm:%s258_s14]   ;;  %s356_s2 = smov 48  ;;  %v291_v62 = vsel %vm45_vm2, %v441_v55, %v286_v54 }
  0x15   :  { %v144_v58 = vsel %vm45_vm2, %v417_v52, %v139_v53  ;;  %s324_s3 = smov 3  ;;  %v437_v59 = vld [vmem:[%s726_s0 + $0xb] ss:$16 sm:%s263_s22]   ;;  %s467_s6 = smov 80   ;;  %v450_v60 = vld [vmem:[%s726_s0 + $0x41] ss:$16 sm:%s348_s24]   ;;  %v261_v63 = vsel %vm40_vm1, %v436_v57, %v256_v56 }
  0x16   :  { %218 = vrot.lane.b32.xlu1 %v217_v41, %s466_s21  ;;  %145 = vrot.lane.b32.xlu2 %v144_v58, %s467_s6  ;;  %s361_s7 = smov 192  ;;  %s327_s8 = smov 12  ;;  %v451_v61 = vld [vmem:[%s726_s0 + $0x41] ss:$16 sm:%s351_s25]   ;;  %v266_v9 = vsel %vm45_vm2, %v437_v59, %v261_v63 }
  0x17   :  { %s624_s13 = smov 48  ;;  %s152_s28 = smov 3  ;;  %v452_v0 = vld [vmem:[%s726_s0 + $0x9] ss:$16 sm:%s356_s2]   ;;  %v446_v1 = vld [vmem:[%s726_s0 + $0x1] ss:$16 sm:%s324_s3]   ;;  %v354_v5 = vsel %vm35_vm0, %v451_v61, %v450_v60 }
  0x18   :  { %194 = vrot.lane.b32.xlu0 %v193_v50, %s466_s21  ;;  %v447_v2 = vld [vmem:[%s726_s0 + $0x1] ss:$16 sm:%s327_s8]   ;;  %s155_s21 = smov 12  ;;  %s160_s22 = smov 48  ;;  %v359_v15 = vsel %vm40_vm1, %v452_v0, %v354_v5 }
  0x19   :  { %v418_v3 = vld [vmem:[%s726_s0 + $0x45] ss:$16 sm:%s152_s28]   ;;  %s165_s26 = smov 192  ;;  %s226_s27 = smov 3  ;;  %v420_v7 = vld [vmem:[%s726_s0 + $0xd] ss:$16 sm:%s160_s22]   ;;  %v330_v16 = vsel %vm35_vm0, %v447_v2, %v446_v1 }
  0x1a   :  { %v419_v4 = vld [vmem:[%s726_s0 + $0x45] ss:$16 sm:%s155_s21]   ;;  %v421_v8 = vld [vmem:[%s726_s0 + $0xd] ss:$16 sm:%s165_s26]   ;;  %s229_s4 = smov 12  ;;  %s234_s5 = smov 48 }
  0x1b   :  { %v158_v6 = vsel %vm35_vm0, %v419_v4, %v418_v3  ;;  %s468_s8 = smov 32   ;;  %v430_v11 = vld [vmem:[%s726_s0 + $0x3] ss:$16 sm:%s226_s27]   ;;  %v453_v12 = vld [vmem:[%s726_s0 + $0x9] ss:$16 sm:%s361_s7]   ;;  %s239_s19 = smov 192 }
  0x1c   :  { %v163_v10 = vsel %vm40_vm1, %v420_v7, %v158_v6  ;;  %v431_v14 = vld [vmem:[%s726_s0 + $0x3] ss:$16 sm:%s229_s4]   ;;  %v448_v17 = vld [vmem:[%s726_s0 - $0x37] ss:$16 sm:%s624_s13]   ;;  %s337_s13 = smov 192  ;;  %s469_s20 = smov 48   ;;  %v364_v20 = vsel %vm45_vm2, %v453_v12, %v359_v15 }
  0x1d   :  { %v168_v13 = vsel %vm45_vm2, %v421_v8, %v163_v10  ;;  %v232_v18 = vsel %vm35_vm0, %v431_v14, %v430_v11  ;;  %v432_v19 = vld [vmem:[%s726_s0 - $0x35] ss:$16 sm:%s234_s5]   ;;  %s302_s21 = smov 12  ;;  %v335_v21 = vsel %vm40_vm1, %v448_v17, %v330_v16  ;;  %v449_v22 = vld [vmem:[%s726_s0 - $0x37] ss:$16 sm:%s337_s13]   ;;  %s307_s30 = smov 48 }
  0x1e   :  { %292 = vrot.lane.b32.xlu1 %v291_v62, %s468_s8  ;;  %169 = vrot.lane.b32.xlu2 %v168_v13, %s467_s6  ;;  %s299_s6 = smov 3  ;;  %v237_v23 = vsel %vm40_vm1, %v432_v19, %v232_v18  ;;  %v433_v24 = vld [vmem:[%s726_s0 - $0x35] ss:$16 sm:%s239_s19]   ;;  %s470_s2 = smov 16   ;;  %v340_v27 = vsel %vm45_vm2, %v449_v22, %v335_v21 }
  0x1f   :  { %v442_v25 = vld [vmem:[%s726_s0 + $0x42] ss:$16 sm:%s299_s6]   ;;  %v242_v28 = vsel %vm45_vm2, %v433_v24, %v237_v23  ;;  %v444_v30 = vld [vmem:[%s726_s0 + $0xa] ss:$16 sm:%s307_s30]   ;;  %s312_s5 = smov 192 }
  0x20   :  { %267 = vrot.lane.b32.xlu0 %v266_v9, %s469_s20  ;;  %v443_v26 = vld [vmem:[%s726_s0 + $0x42] ss:$16 sm:%s302_s21]   ;;  %v2_v34 = vld [vmem:[%s726_s0] ss:$8 sm:$0xf]  }
  0x21   :  { %v305_v29 = vsel %vm35_vm0, %v443_v26, %v442_v25  ;;  %v445_v32 = vld [vmem:[%s726_s0 + $0xa] ss:$16 sm:%s312_s5]   ;;  %v3_v35 = vld [vmem:[%s726_s0] ss:$8 sm:$0xf0]  }
  0x22   :  { %v310_v31 = vsel %vm40_vm1, %v444_v30, %v305_v29  ;;  %v5_v36 = vsel %vm4_vm3, %v3_v35, %v2_v34  ;;  %v396_v37 = vld [vmem:[%s726_s0 + $0x40] ss:$8 sm:$0xf]  }
  0x23   :  { %v315_v33 = vsel %vm45_vm2, %v445_v32, %v310_v31  ;;  %7 = vst.msk [vmem:[#allocation0] ss:$8 sm:$0x3] %vm6_vm4, %v5_v36   ;;  %v397_v38 = vld [vmem:[%s726_s0 + $0x40] ss:$8 sm:$0xf0]  }
  0x24   :  { %9 = vst.msk [vmem:[#allocation0 - $0xf] ss:$8 sm:$0xc] %vm6_vm4, %v5_v36   ;;  %v19_v39 = vsel %vm4_vm3, %v397_v38, %v396_v37 }
  0x25   :  { %11 = vst.msk [vmem:[#allocation0 - $0x1e] ss:$8 sm:$0x30] %vm6_vm4, %v5_v36  }
  0x26   :  { %365 = vrot.lane.b32.xlu1 %v364_v20, %s470_s2  ;;  %243 = vrot.lane.b32.xlu2 %v242_v28, %s469_s20  ;;  %13 = vst.msk [vmem:[#allocation0 - $0x2d] ss:$8 sm:$0xc0] %vm6_vm4, %v5_v36  }
  0x27   :  { %22 = vst.msk [vmem:[#allocation0 + $0x10] ss:$8 sm:$0x3] %vm6_vm4, %v19_v39  }
  0x28   :  { %341 = vrot.lane.b32.xlu0 %v340_v27, %s470_s2  ;;  %24 = vst.msk [vmem:[#allocation0 + $0x1] ss:$8 sm:$0xc] %vm6_vm4, %v19_v39  }
  0x29   :  { %26 = vst.msk [vmem:[#allocation0 - $0xe] ss:$8 sm:$0x30] %vm6_vm4, %v19_v39  }
  0x2a   :  { %28 = vst.msk [vmem:[#allocation0 - $0x1d] ss:$8 sm:$0xc0] %vm6_vm4, %v19_v39  }
  0x2e   :  { %316 = vrot.lane.b32.xlu2 %v315_v33, %s468_s8 }
  0x70   :  { %v146_v40 = vpop.permute.xlu2 %145  }
  0x78   :  { %v97_v41 = vpop.permute.xlu1 %96   ;;  %v170_v43 = vpop.permute.xlu2 %169  }
  0x7a   :  { %v48_v42 = vpop.permute.xlu0 %47  }
  0x7b   :  { %50 = vst.msk [vmem:[#allocation0] sm:$0xf] %vm49_vm5, %v48_v42  }
  0x7c   :  { %52 = vst.msk [vmem:[#allocation0 + $0x4] sm:$0xf0] %vm49_vm5, %v48_v42  }
  0x7d   :  { %99 = vst.msk [vmem:[#allocation0] sm:$0xf] %vm98_vm6, %v97_v41  }
  0x7e   :  { %101 = vst.msk [vmem:[#allocation0 + $0x4] sm:$0xf0] %vm98_vm6, %v97_v41  }
  0x7f   :  { %148 = vst.msk [vmem:[#allocation0] sm:$0xf] %vm147_vm7, %v146_v40  }
  0x80   :  { %v121_v44 = vpop.permute.xlu1 %120   ;;  %150 = vst.msk [vmem:[#allocation0 + $0x4] sm:$0xf0] %vm147_vm7, %v146_v40   ;;  %v244_v46 = vpop.permute.xlu2 %243  }
  0x82   :  { %v72_v45 = vpop.permute.xlu0 %71  }
  0x83   :  { %75 = vst.msk [vmem:[#allocation0 + $0x10] sm:$0xf] %vm49_vm5, %v72_v45  }
  0x84   :  { %77 = vst.msk [vmem:[#allocation0 + $0x14] sm:$0xf0] %vm49_vm5, %v72_v45  }
  0x85   :  { %124 = vst.msk [vmem:[#allocation0 + $0x10] sm:$0xf] %vm98_vm6, %v121_v44  }
  0x86   :  { %126 = vst.msk [vmem:[#allocation0 + $0x14] sm:$0xf0] %vm98_vm6, %v121_v44  }
  0x87   :  { %173 = vst.msk [vmem:[#allocation0 + $0x10] sm:$0xf] %vm147_vm7, %v170_v43  }
  0x88   :  { %v219_v47 = vpop.permute.xlu1 %218   ;;  %175 = vst.msk [vmem:[#allocation0 + $0x14] sm:$0xf0] %vm147_vm7, %v170_v43   ;;  %v317_v49 = vpop.permute.xlu2 %316  }
  0x89   :  { %222 = vst.msk [vmem:[#allocation0 + $0x10] sm:$0xf] %vm196_vm8, %v219_v47  }
  0x8a   :  { %224 = vst.msk [vmem:[#allocation0 + $0x14] sm:$0xf0] %vm196_vm8, %v219_v47   ;;  %v195_v48 = vpop.permute.xlu0 %194  }
  0x8b   :  { %197 = vst.msk [vmem:[#allocation0] sm:$0xf] %vm196_vm8, %v195_v48  }
  0x8c   :  { %199 = vst.msk [vmem:[#allocation0 + $0x4] sm:$0xf0] %vm196_vm8, %v195_v48  }
  0x8d   :  { %246 = vst.msk [vmem:[#allocation0] sm:$0xf] %vm245_vm9, %v244_v46  }
  0x8e   :  { %248 = vst.msk [vmem:[#allocation0 + $0x4] sm:$0xf0] %vm245_vm9, %v244_v46  }
  0x90   :  { %v293_v50 = vpop.permute.xlu1 %292  }
  0x91   :  { %295 = vst.msk [vmem:[#allocation0] sm:$0xf] %vm294_vm10, %v293_v50  }
  0x92   :  { %297 = vst.msk [vmem:[#allocation0 + $0x4] sm:$0xf0] %vm294_vm10, %v293_v50   ;;  %v268_v51 = vpop.permute.xlu0 %267  }
  0x93   :  { %271 = vst.msk [vmem:[#allocation0 + $0x10] sm:$0xf] %vm245_vm9, %v268_v51  }
  0x94   :  { %273 = vst.msk [vmem:[#allocation0 + $0x14] sm:$0xf0] %vm245_vm9, %v268_v51  }
  0x95   :  { %320 = vst.msk [vmem:[#allocation0 + $0x10] sm:$0xf] %vm294_vm10, %v317_v49  }
  0x96   :  { %322 = vst.msk [vmem:[#allocation0 + $0x14] sm:$0xf0] %vm294_vm10, %v317_v49  }
  0x98   :  { %v366_v52 = vpop.permute.xlu1 %365  }
  0x99   :  { %369 = vst.msk [vmem:[#allocation0 + $0x10] sm:$0xf] %vm343_vm11, %v366_v52  }
  0x9a   :  { %371 = vst.msk [vmem:[#allocation0 + $0x14] sm:$0xf0] %vm343_vm11, %v366_v52   ;;  %v342_v53 = vpop.permute.xlu0 %341  }
  0x9b   :  { %344 = vst.msk [vmem:[#allocation0] sm:$0xf] %vm343_vm11, %v342_v53  }
  0x9c   :  { %346 = vst.msk [vmem:[#allocation0 + $0x4] sm:$0xf0] %vm343_vm11, %v342_v53  }
  0xa0   :  { %v385_v54 = vld [vmem:[#allocation0 + $0x10] sm:$0xf] }
  0xa1   :  { %455 = vst [vmem:[%s727_s1 + $0x8] sm:$0xf] %v385_v54  ;;  %v391_v55 = vld [vmem:[#allocation0 + $0x18] sm:$0xf] }
  0xa2   :  { %456 = vst [vmem:[%s727_s1 + $0xc] sm:$0xf] %v391_v55  ;;  %v374_v56 = vld [vmem:[#allocation0] sm:$0xf] }
  0xa3   :  { %377 = vst [vmem:[%s727_s1] sm:$0xf] %v374_v56  ;;  %v379_v57 = vld [vmem:[#allocation0 + $0x8] sm:$0xf] }
  0xa4   :  { %454 = vst [vmem:[%s727_s1 + $0x4] sm:$0xf] %v379_v57 }

// kernel: bssf_forward.3
= control target key start
LH: loop header
LB: loop body
LE: loop exit
PB: predicated region body
PF: predicated region fallthrough
CT: control target
= control target key end

     0   :  { %vm36_vm0 = vcmask 1041408   ;;  %vm32_vm1 = vcmask 31744   ;;  %vm243_vm2 = vcmask 1043456   ;;  %s446_s1 = inlined_call_operand.vmem [shape: bf16[4,512], index: 1, kind: input, shape index: {}]   ;;  %s447_s0 = inlined_call_operand.vmem [shape: bf16[2,4,512], index: 0, kind: input, shape index: {}]   ;;  %s448_s2 = inlined_call_operand.vmem [shape: bf16[3,4,4], index: 2, kind: input, shape index: {}]   ;;  %s449_s3 = inlined_call_operand.vmem [shape: f32[4,1], index: 3, kind: input, shape index: {}]   ;;  %s450_s4 = inlined_call_operand.vmem [shape: f32[4,1], index: 4, kind: input, shape index: {}]   ;;  %s451_s5 = inlined_call_operand.vmem [shape: f32[4,512], index: 5, kind: output, shape index: {}]  }
   0x1   :  { %v25_v0 = vld [vmem:[%s446_s1] sm:$0xff]  ;;  %v337_v11 = vld [vmem:[%s447_s0 + $0x8] sm:$0xff] }
   0x2   :  { %27 = vst [vmem:[#allocation1] ss:$4 sm:$0xff] %v25_v0  ;;  %v22_v1 = vld [vmem:[%s447_s0] sm:$0xff] }
   0x3   :  { %v327_v9 = vld [vmem:[%s448_s2 + $0x2] sm:$0x3]  ;;  %v21_v20 = vld [vmem:[%s448_s2] sm:$0x3]  ;;  %v336_v29 = vld [vmem:[%s448_s2 + $0x4] sm:$0x3] }
   0x9   :  { %v28_v2 = vld.sshfl [vmem:[#allocation1] sm:$0xff pattern:$0x73625140]  ;;  %v29_v3 = vld.sshfl [vmem:[#allocation1 + $0x8] sm:$0xff pattern:$0x73625140] }
   0xa   :  { %v37_v4 = vsel %vm36_vm0, %v28_v2, 0  ;;  %v39_v5 = vsel %vm36_vm0, %v29_v3, 0  ;;  %v30_v6 = vld.sshfl [vmem:[#allocation1 + $0x10] sm:$0xff pattern:$0x73625140] }
   0xb   :  { %52 = vmatpush.bf16.msra.mxu0 %v37_v4  ;;  %65 = vmatpush.bf16.msra.mxu1 %v39_v5  ;;  %v41_v7 = vsel %vm36_vm0, %v30_v6, 0  ;;  %v31_v8 = vld.sshfl [vmem:[#allocation1 + $0x18] sm:$0xff pattern:$0x73625140]  ;;  %v350_v5 = vmov 512.0  }
   0xc   :  { %78 = vmatpush.bf16.msra.mxu2 %v41_v7  ;;  %v43_v10 = vsel %vm36_vm0, %v31_v8, 0  ;;  %98 = vst [vmem:[#allocation1] ss:$4 sm:$0xff] %v22_v1  ;;  %346 = vrcp.f32 %v350_v5 }
   0xd   :  { %91 = vmatpush.bf16.msra.mxu3 %v43_v10 }
   0xe   :  { %328 = vmatmul.msk.bf16.vlgmr.msra.gmra.mxu0 %vm32_vm1, %v327_v9  ;;  %329 = vmatmul.msk.bf16.vlgmr.msra.gmra.mxu1 %vm32_vm1, %v327_v9 }
   0xf   :  { %330 = vmatmul.msk.bf16.vlgmr.msra.gmra.mxu2 %vm32_vm1, %v327_v9 }
  0x10   :  { %331 = vmatmul.msk.bf16.vlgmr.msra.gmra.mxu3 %vm32_vm1, %v327_v9 }
  0x12   :  { %v347_v6 = vpop.eup %346 }
  0x13   :  { %v101_v12 = vld.sshfl [vmem:[#allocation1 + $0x10] sm:$0xff pattern:$0x73625140]  ;;  %v102_v13 = vld.sshfl [vmem:[#allocation1 + $0x18] sm:$0xff pattern:$0x73625140]  ;;  %vm258_vm3 = vweird.f32 %v347_v6 }
  0x14   :  { %v110_v14 = vsel %vm36_vm0, %v101_v12, 0  ;;  %v112_v15 = vsel %vm36_vm0, %v102_v13, 0  ;;  %v99_v16 = vld.sshfl [vmem:[#allocation1] sm:$0xff pattern:$0x73625140]  ;;  %v254_v7 = vmul.f32 512.0, %v347_v6 }
  0x15   :  { %147 = vmatpush.bf16.msrb.mxu2 %v110_v14  ;;  %160 = vmatpush.bf16.msrb.mxu3 %v112_v15  ;;  %v106_v17 = vsel %vm36_vm0, %v99_v16, 0  ;;  %v100_v18 = vld.sshfl [vmem:[#allocation1 + $0x8] sm:$0xff pattern:$0x73625140] }
  0x16   :  { %121 = vmatpush.bf16.msrb.mxu0 %v106_v17  ;;  %v108_v19 = vsel %vm36_vm0, %v100_v18, 0  ;;  %171 = vst [vmem:[#allocation1] ss:$4 sm:$0xff] %v337_v11  ;;  %v255_v8 = vsub.f32 1.0, %v254_v7 }
  0x17   :  { %134 = vmatpush.bf16.msrb.mxu1 %v108_v19 }
  0x18   :  { %v256_v9 = vmul.f32 %v347_v6, %v255_v8 }
  0x1a   :  { %v257_v10 = vadd.f32 %v347_v6, %v256_v9 }
  0x1c   :  { %v259_v11 = vsel %vm258_vm3, %v347_v6, %v257_v10 }
  0x1d   :  { %v174_v21 = vld.sshfl [vmem:[#allocation1 + $0x10] sm:$0xff pattern:$0x73625140]  ;;  %v175_v22 = vld.sshfl [vmem:[#allocation1 + $0x18] sm:$0xff pattern:$0x73625140] }
  0x1e   :  { %332 = vmatmul.msk.bf16.vlgmr.msrb.gmra.mxu0 %vm32_vm1, %v21_v20  ;;  %333 = vmatmul.msk.bf16.vlgmr.msrb.gmra.mxu1 %vm32_vm1, %v21_v20  ;;  %v183_v23 = vsel %vm36_vm0, %v174_v21, 0  ;;  %v185_v24 = vsel %vm36_vm0, %v175_v22, 0  ;;  %v172_v25 = vld.sshfl [vmem:[#allocation1] sm:$0xff pattern:$0x73625140] }
  0x1f   :  { %334 = vmatmul.msk.bf16.vlgmr.msrb.gmra.mxu2 %vm32_vm1, %v21_v20  ;;  %233 = vmatpush.bf16.msra.mxu3 %v185_v24  ;;  %v179_v26 = vsel %vm36_vm0, %v172_v25, 0  ;;  %v173_v27 = vld.sshfl [vmem:[#allocation1 + $0x8] sm:$0xff pattern:$0x73625140] }
  0x20   :  { %335 = vmatmul.msk.bf16.vlgmr.msrb.gmra.mxu3 %vm32_vm1, %v21_v20  ;;  %220 = vmatpush.bf16.msra.mxu2 %v183_v23  ;;  %v181_v28 = vsel %vm36_vm0, %v173_v27, 0 }
  0x21   :  { %194 = vmatpush.bf16.msra.mxu0 %v179_v26  ;;  %207 = vmatpush.bf16.msra.mxu1 %v181_v28 }
  0x2e   :  { %338 = vmatmul.msk.bf16.vlgmr.msra.gmra.mxu0 %vm32_vm1, %v336_v29  ;;  %339 = vmatmul.msk.bf16.vlgmr.msra.gmra.mxu1 %vm32_vm1, %v336_v29 }
  0x2f   :  { %340 = vmatmul.msk.bf16.vlgmr.msra.gmra.mxu2 %vm32_vm1, %v336_v29 }
  0x30   :  { %341 = vmatmul.msk.bf16.vlgmr.msra.gmra.mxu3 %vm32_vm1, %v336_v29  ;;  %v351_v29 = vmov 0  }
  0x31   :  { %344 = vset.pattern.permute.xlu1 %v351_v29  ;;  %345 = vset.pattern.permute.xlu0 %v351_v29 }
  0x8b   :  { %v54_v30 = vpop.f32.mrf.mxu0  ;;  %v67_v31 = vpop.f32.mrf.mxu1 }
  0x92   :  { %v80_v32 = vpop.f32.mrf.mxu2 }
  0x93   :  { %v93_v33 = vpop.f32.mrf.mxu3  ;;  %v56_v34 = vpop.f32.mrf.mxu0 }
  0x94   :  { %v69_v35 = vpop.f32.mrf.mxu1 }
  0x9a   :  { %v82_v36 = vpop.f32.mrf.mxu2 }
  0x9b   :  { %v95_v37 = vpop.f32.mrf.mxu3  ;;  %v123_v38 = vpop.f32.mrf.mxu0 }
  0x9c   :  { %v136_v39 = vpop.f32.mrf.mxu1  ;;  %v124_v45 = vadd.f32 %v123_v38, %v54_v30  ;;  %v279_v38 = vld [vmem:[%s449_s3] sm:$0xf] }
  0x9d   :  { %v137_v46 = vadd.f32 %v136_v39, %v67_v31 }
  0xa2   :  { %v149_v40 = vpop.f32.mrf.mxu2 }
  0xa3   :  { %v162_v41 = vpop.f32.mrf.mxu3  ;;  %v125_v42 = vpop.f32.mrf.mxu0  ;;  %v150_v52 = vadd.f32 %v149_v40, %v80_v32 }
  0xa4   :  { %v138_v43 = vpop.f32.mrf.mxu1  ;;  %v163_v55 = vadd.f32 %v162_v41, %v93_v33  ;;  %v301_v42 = vld [vmem:[%s450_s4] sm:$0xf] }
  0xaa   :  { %v151_v44 = vpop.f32.mrf.mxu2 }
  0xab   :  { %v164_v47 = vpop.f32.mrf.mxu3  ;;  %v196_v48 = vpop.f32.mrf.mxu0 }
  0xac   :  { %v209_v49 = vpop.f32.mrf.mxu1  ;;  %v239_v50 = vadd.f32 %v196_v48, %v124_v45 }
  0xad   :  { %v240_v51 = vadd.f32 %v209_v49, %v137_v46 }
  0xae   :  { %v244_v53 = vsel %vm243_vm2, %v239_v50, 0.0 }
  0xaf   :  { %v245_v54 = vsel %vm243_vm2, %v240_v51, 0.0 }
  0xb0   :  { %v246_v60 = vadd.f32 %v245_v54, %v244_v53 }
  0xb2   :  { %v222_v56 = vpop.f32.mrf.mxu2 }
  0xb3   :  { %v241_v57 = vadd.f32 %v222_v56, %v150_v52  ;;  %v235_v58 = vpop.f32.mrf.mxu3  ;;  %v198_v59 = vpop.f32.mrf.mxu0 }
  0xb4   :  { %v242_v61 = vadd.f32 %v235_v58, %v163_v55  ;;  %v211_v62 = vpop.f32.mrf.mxu1 }
  0xb5   :  { %v247_v63 = vsel %vm243_vm2, %v241_v57, 0.0 }
  0xb6   :  { %v248_v0 = vadd.f32 %v247_v63, %v246_v60  ;;  %v249_v1 = vsel %vm243_vm2, %v242_v61, 0.0 }
  0xb8   :  { %v250_v2 = vadd.f32 %v249_v1, %v248_v0 }
  0xba   :  { %v224_v3 = vpop.f32.mrf.mxu2  ;;  %251 = vadd.xlane.f32.xlu0 %v250_v2 }
  0xbb   :  { %v237_v4 = vpop.f32.mrf.mxu3 }
 0x12d   :  { %v252_v12 = vpop.xlane.xlu0 %251 }
 0x12e   :  { %v260_v13 = vmul.f32 %v259_v11, %v252_v12 }
 0x130   :  { %v261_v14 = vsub.f32 %v239_v50, %v260_v13  ;;  %v262_v15 = vsub.f32 %v240_v51, %v260_v13  ;;  %v263_v16 = vsub.f32 %v241_v57, %v260_v13  ;;  %v264_v17 = vsub.f32 %v242_v61, %v260_v13 }
 0x132   :  { %v265_v18 = vmul.f32 %v261_v14, %v261_v14  ;;  %v266_v19 = vmul.f32 %v262_v15, %v262_v15  ;;  %v267_v20 = vmul.f32 %v263_v16, %v263_v16  ;;  %v268_v21 = vmul.f32 %v264_v17, %v264_v17 }
 0x134   :  { %v269_v22 = vsel %vm243_vm2, %v265_v18, 0.0  ;;  %v270_v23 = vsel %vm243_vm2, %v266_v19, 0.0  ;;  %v272_v25 = vsel %vm243_vm2, %v267_v20, 0.0  ;;  %v274_v27 = vsel %vm243_vm2, %v268_v21, 0.0 }
 0x135   :  { %v271_v24 = vadd.f32 %v270_v23, %v269_v22 }
 0x137   :  { %v273_v26 = vadd.f32 %v272_v25, %v271_v24 }
 0x139   :  { %v275_v28 = vadd.f32 %v274_v27, %v273_v26 }
 0x13b   :  { %276 = vadd.xlane.f32.xlu0 %v275_v28 }
 0x1ae   :  { %v277_v30 = vpop.xlane.xlu0 %276 }
 0x1af   :  { %v278_v31 = vmul.f32 %v277_v30, %v259_v11 }
 0x1b1   :  { %v280_v32 = vadd.f32 1e-05, %v278_v31 }
 0x1b3   :  { %348 = vrsqrt.f32 %v280_v32  ;;  %vm287_vm5 = vweird.f32 %v280_v32 }
 0x1b9   :  { %v349_v33 = vpop.eup %348 }
 0x1ba   :  { %v282_v34 = vmul.f32 %v349_v33, %v280_v32  ;;  %vm288_vm4 = vweird.f32 %v349_v33 }
 0x1bb   :  { %vm289_vm6 = vmor %vm287_vm5, %vm288_vm4 }
 0x1bc   :  { %v283_v35 = vmul.f32 %v349_v33, %v282_v34 }
 0x1be   :  { %v284_v36 = vmul.f32 0.5, %v283_v35 }
 0x1c0   :  { %v285_v37 = vsub.f32 1.5, %v284_v36 }
 0x1c2   :  { %v286_v39 = vmul.f32 %v349_v33, %v285_v37 }
 0x1c4   :  { %v290_v40 = vsel %vm289_vm6, %v349_v33, %v286_v39 }
 0x1c5   :  { %v291_v41 = vmul.f32 %v290_v40, %v279_v38 }
 0x1c7   :  { %294 = vperm.xlu1 %344, %v291_v41  }
 0x1cf   :  { %304 = vperm.xlu1 %344, %v301_v42  }
 0x239   :  { %v295_v43 = vpop.permute.xlu1 %294 }
 0x23a   :  { %v298_v44 = vmul.f32 %v295_v43, %v262_v15  ;;  %v300_v45 = vmul.f32 %v295_v43, %v264_v17  ;;  %v297_v47 = vmul.f32 %v295_v43, %v261_v14  ;;  %v299_v48 = vmul.f32 %v295_v43, %v263_v16 }
 0x241   :  { %v305_v46 = vpop.permute.xlu1 %304 }
 0x242   :  { %v308_v49 = vadd.f32 %v305_v46, %v298_v44  ;;  %v310_v50 = vadd.f32 %v305_v46, %v300_v45  ;;  %v307_v51 = vadd.f32 %v305_v46, %v297_v47  ;;  %v309_v52 = vadd.f32 %v305_v46, %v299_v48 }
 0x244   :  { %v315_v53 = vrot.slane %v308_v49, 4  ;;  %v316_v54 = vrot.slane %v310_v50, 4 }
 0x246   :  { %v317_v55 = vsel %vm243_vm2, %v307_v51, %v315_v53  ;;  %v318_v56 = vsel %vm243_vm2, %v309_v52, %v316_v54 }
 0x247   :  { %321 = vst [vmem:[%s451_s5] sm:$0xff] %v317_v55 }
 0x248   :  { %322 = vst [vmem:[%s451_s5 + $0x8] sm:$0xff] %v318_v56 }

// kernel: bssf_forward.2
= control target key start
LH: loop header
LB: loop body
LE: loop exit
PB: predicated region body
PF: predicated region fallthrough
CT: control target
= control target key end

     0   :  { %s3893_s17 = smov 0   ;;  %s3895_s18 = smov 0   ;;  %s6202_s0 = inlined_call_operand.vmem [shape: f32[2,2,4,256], index: 0, kind: input, shape index: {}]   ;;  %s6203_s1 = inlined_call_operand.vmem [shape: f32[2,4,256], index: 1, kind: input, shape index: {}]   ;;  %s6204_s2 = inlined_call_operand.vmem [shape: bf16[2,9,4,4], index: 2, kind: input, shape index: {}]   ;;  %s6205_s3 = inlined_call_operand.vmem [shape: f32[2,4,1], index: 3, kind: input, shape index: {}]   ;;  %s6206_s4 = inlined_call_operand.vmem [shape: bf16[2,9,4,4], index: 4, kind: input, shape index: {}]   ;;  %s6207_s5 = inlined_call_operand.vmem [shape: f32[2,4,1], index: 5, kind: input, shape index: {}]   ;;  %s6208_s6 = inlined_call_operand.vmem [shape: bf16[2,9,4,4], index: 6, kind: input, shape index: {}]   ;;  %s6209_s7 = inlined_call_operand.vmem [shape: f32[128,256], index: 7, kind: input, shape index: {}]   ;;  %s6210_s8 = inlined_call_operand.vmem [shape: f32[1,128], index: 8, kind: input, shape index: {}]   ;;  %s6211_s9 = inlined_call_operand.vmem [shape: f32[9,1,256], index: 9, kind: input, shape index: {}]   ;;  %s6212_s10 = inlined_call_operand.vmem [shape: bf16[2,4,512], index: 10, kind: output, shape index: {0}]   ;;  %s6213_s11 = inlined_call_operand.vmem [shape: bf16[4,512], index: 11, kind: output, shape index: {1}]  }
   0x1   :  { %s3897_s19 = smov 0   ;;  %s3899_s20 = smov 0  }
   0x2   :  { %s3901_s21 = smov 0  }
   0x3 LB: > { %s31_s22 = sadd.s32 1, %s3806_s19  ;;  %s34_s23 = sadd.s32 1, %s3810_s20  ;;  %s3814_s21 = sphi %s3901_s21, %s22_s21   ;;  %s3810_s20 = sphi %s3899_s20, %s6663_s20   ;;  %s3806_s19 = sphi %s3897_s19, %s6662_s19   ;;  %s3802_s18 = sphi %s3895_s18, %s6661_s18   ;;  %s3798_s17 = sphi %s3893_s17, %s6660_s17  }
   0x4   : > { %p32_p0 = scmp.ge.s32.totalorder %s31_s22, 2  ;;  %p3499_p1 = scmp.ge.s32.totalorder %s3814_s21, 1 }
   0x5   : > { %p418_p2 = scmp.lt.s32.totalorder %s3814_s21, 5 }
   0x6   : > { %s6665_s22 = smov (%p32_p0, %s31_s22), 0  ;;  %s6667_s23 = smov (!%p32_p0, %s34_s23), %s3810_s20 }
   0x7   : > { %p419_p3 = pnand %p3499_p1, %p418_p2  ;;  %p36_p4 = scmp.ge.s32.totalorder %s6667_s23, 2 }
   0x9   : > { %s6669_s23 = smov (%p36_p4, %s6667_s23), 0  ;;  %422 = sbr.rel (%p419_p3) target bundleno = 1240 (0x4d8), region = 60 }
   0xe   : > { %p499_p5 = scmp.lt.s32.totalorder %s3802_s18, 1  ;;  %p501_p6 = scmp.lt.s32.totalorder %s3798_s17, 1  ;;  %v566_v37 = vlaneseq  ;;  %vm6342_vm1 = vcmask 1041408   ;;  %vm6341_vm2 = vcmask 31744   ;;  %vm1033_vm10 = vcmask 1040384  }
   0xf   : > { %s3816_s13 = smov 17   ;;  %s3817_s14 = smov 16   ;;  %vm1035_vm11 = vcmask 1041409   ;;  %vm1041_vm12 = vcmask 1043459   ;;  %vm1038_vm13 = vcmask 1042434   ;;  %vm1419_vm14 = vcmask 130112  }
  0x10   : > { %s6671_s18 = smov (!%p499_p5, %s3802_s18), 1  ;;  %s3818_s15 = smov 15   ;;  %v3980_v40 = vand.u32 127, %v566_v37  ;;  %vm1473_vm15 = vcmask 392512  }
  0x11   : > { %s3929_s24 = scalar_select %p501_p6, %s3798_s17, 1 }
  0x12   : > { %s3932_s25 = sshll.u32 %s6671_s18, 2  ;;  %s6214_s16 = smov 1   ;;  %6345 = vst [vmem:[#allocation3_spill] sm:$0xff] %v3980_v40  ;;  %vm568_vm0 = vcmp.lt.s32.totalorder %v3980_v40, 17  ;;  %vm583_vm3 = vcmp.lt.s32.totalorder %v3980_v40, 16  ;;  %vm671_vm4 = vcmp.lt.s32.totalorder %v3980_v40, 15 }
  0x13   : > { %s3500_s26 = sshll.u32 %s3929_s24, 1  ;;  %s3822_s29 = smov 112   ;;  %vm823_vm5 = vcmp.lt.s32.totalorder %v3980_v40, 127  ;;  %vm724_vm6 = vcmp.lt.s32.totalorder %v3980_v40, 1  ;;  %vm929_vm7 = vcmp.lt.s32.totalorder %v3980_v40, 112  ;;  %vm982_vm8 = vcmp.lt.s32.totalorder %v3980_v40, 111 }
  0x14   : > { %s505_s27 = sadd.s32 %s3932_s25, %s3500_s26  ;;  %s3820_s26 = smov 127   ;;  %vm876_vm9 = vcmp.lt.s32.totalorder %v3980_v40, 113 }
  0x15   : > { %s3502_s28 = sshll.u32 %s505_s27, 2  ;;  %s3821_s27 = smov 113  }
  0x16   : > { %s507_s12 = scalar_lea.vmem %s6202_s0, %s3502_s28  ;;  %s3606_s28 = sshll.u32 %s3929_s24, 3 }
  0x17   : > { %v3939_v0 = vld [vmem:[%s507_s12] sm:$0xff]  ;;  %s3823_s24 = smov 111  }
  0x18   : > { %6344 = vst [vmem:[#allocation2_spill] sm:$0xff] %v3939_v0 }
  0x19   : > { %557 = vst [vmem:[#allocation1] ss:$2 sm:$0xff] %v3939_v0 }
  0x20   : > { %v558_v1 = vld.sshfl [vmem:[#allocation1] sm:$0xff pattern:$0x75316420]  ;;  %v559_v2 = vld.sshfl [vmem:[#allocation1 + $0x8] sm:$0xff pattern:$0x75316420] }
  0x21   : > { %v3665_v3 = vpack.i.bf16 %v559_v2, %v558_v1  ;;  %574 = vst [vmem:[#allocation1] ss:$2 sm:$0xff] %v3939_v0 }
  0x23   : > { %3666 = vrot.lane.b32.xlu0 %v3665_v3, %s3816_s13 }
  0x28   : > { %v575_v4 = vld.sshfl [vmem:[#allocation1] sm:$0xff pattern:$0x75316420]  ;;  %v576_v5 = vld.sshfl [vmem:[#allocation1 + $0x8] sm:$0xff pattern:$0x75316420] }
  0x29   : > { %v3670_v6 = vpack.i.bf16 %v576_v5, %v575_v4  ;;  %662 = vst [vmem:[#allocation1] ss:$2 sm:$0xff] %v3939_v0 }
  0x2b   : > { %3671 = vrot.lane.b32.xlu0 %v3670_v6, %s3817_s14 }
  0x30   : > { %v663_v7 = vld.sshfl [vmem:[#allocation1] sm:$0xff pattern:$0x75316420]  ;;  %v664_v8 = vld.sshfl [vmem:[#allocation1 + $0x8] sm:$0xff pattern:$0x75316420] }
  0x31   : > { %v3675_v9 = vpack.i.bf16 %v664_v8, %v663_v7  ;;  %715 = vst [vmem:[#allocation1] ss:$2 sm:$0xff] %v3939_v0 }
  0x33   : > { %3676 = vrot.lane.b32.xlu1 %v3675_v9, %s3818_s15 }
  0x38   : > { %v716_v10 = vld.sshfl [vmem:[#allocation1] sm:$0xff pattern:$0x75316420]  ;;  %v717_v11 = vld.sshfl [vmem:[#allocation1 + $0x8] sm:$0xff pattern:$0x75316420] }
  0x39   : > { %v3680_v12 = vpack.i.bf16 %v717_v11, %v716_v10  ;;  %768 = vst [vmem:[#allocation1] ss:$2 sm:$0xff] %v3939_v0 }
  0x3b   : > { %3681 = vrot.lane.b32.xlu1 %v3680_v12, %s6214_s16  ;;  %s512_s16 = scalar_lea.vmem %s6203_s1, %s3606_s28 }
  0x3c   : > { %v3965_v24 = vld [vmem:[%s512_s16] sm:$0xff]  ;;  %s6346_s16 = smov 1  }
  0x40   : > { %v3950_v13 = vld.sshfl [vmem:[#allocation1] sm:$0xff pattern:$0x75316420]  ;;  %v3952_v14 = vld.sshfl [vmem:[#allocation1 + $0x8] sm:$0xff pattern:$0x75316420] }
  0x41   : > { %814 = vst [vmem:[#allocation1] ss:$2 sm:$0xff] %v3939_v0  ;;  %v773_v6 = vpack.c.bf16 %v3950_v13, %v3950_v13  ;;  %v774_v7 = vpack.c.bf16 %v3952_v14, %v3952_v14 }
  0x43   : > { %v781_v14 = vsel %vm6342_vm1, %v773_v6, 0 }
  0x48   : > { %v815_v15 = vld.sshfl [vmem:[#allocation1] sm:$0xff pattern:$0x75316420]  ;;  %v816_v16 = vld.sshfl [vmem:[#allocation1 + $0x8] sm:$0xff pattern:$0x75316420] }
  0x49   : > { %867 = vst [vmem:[#allocation1] ss:$2 sm:$0xff] %v3939_v0  ;;  %v3685_v17 = vpack.i.bf16 %v816_v16, %v815_v15 }
  0x4b   : > { %3686 = vrot.lane.b32.xlu2 %v3685_v17, %s3820_s26  ;;  %v784_v17 = vsel %vm6342_vm1, %v774_v7, 0 }
  0x50   : > { %v868_v18 = vld.sshfl [vmem:[#allocation1] sm:$0xff pattern:$0x75316420]  ;;  %v869_v19 = vld.sshfl [vmem:[#allocation1 + $0x8] sm:$0xff pattern:$0x75316420] }
  0x51   : > { %v3690_v20 = vpack.i.bf16 %v869_v19, %v868_v18  ;;  %920 = vst [vmem:[#allocation1] ss:$2 sm:$0xff] %v3939_v0 }
  0x53   : > { %3691 = vrot.lane.b32.xlu0 %v3690_v20, %s3821_s27 }
  0x58   : > { %v921_v21 = vld.sshfl [vmem:[#allocation1] sm:$0xff pattern:$0x75316420]  ;;  %v922_v22 = vld.sshfl [vmem:[#allocation1 + $0x8] sm:$0xff pattern:$0x75316420] }
  0x59   : > { %v3695_v23 = vpack.i.bf16 %v922_v22, %v921_v21  ;;  %973 = vst [vmem:[#allocation1] ss:$2 sm:$0xff] %v3939_v0 }
  0x5b   : > { %3696 = vrot.lane.b32.xlu2 %v3695_v23, %s3822_s29 }
  0x60   : > { %v974_v25 = vld.sshfl [vmem:[#allocation1] sm:$0xff pattern:$0x75316420]  ;;  %v975_v26 = vld.sshfl [vmem:[#allocation1 + $0x8] sm:$0xff pattern:$0x75316420] }
  0x61   : > { %v3700_v27 = vpack.i.bf16 %v975_v26, %v974_v25  ;;  %1649 = vst [vmem:[#allocation1] ss:$2 sm:$0xff] %v3965_v24 }
  0x63   : > { %3701 = vrot.lane.b32.xlu2 %v3700_v27, %s3823_s24 }
  0x68   : > { %v1650_v28 = vld.sshfl [vmem:[#allocation1] sm:$0xff pattern:$0x75316420]  ;;  %v1651_v29 = vld.sshfl [vmem:[#allocation1 + $0x8] sm:$0xff pattern:$0x75316420] }
  0x69   : > { %v3705_v30 = vpack.i.bf16 %v1651_v29, %v1650_v28  ;;  %1663 = vst [vmem:[#allocation1] ss:$2 sm:$0xff] %v3965_v24 }
  0x6b   : > { %3706 = vrot.lane.b32.xlu1 %v3705_v30, %s3816_s13  ;;  %s3984_s13 = smul.u32 18, %s6671_s18  ;;  %s3828_s18 = smov 2  }
  0x6d   : > { %s4109_s28 = scalar_lea.vmem %s6206_s4, %s3984_s13 }
  0x70   : > { %v1664_v31 = vld.sshfl [vmem:[#allocation1] sm:$0xff pattern:$0x75316420]  ;;  %v1665_v32 = vld.sshfl [vmem:[#allocation1 + $0x8] sm:$0xff pattern:$0x75316420] }
  0x71   : > { %v3710_v33 = vpack.i.bf16 %v1665_v32, %v1664_v31  ;;  %1748 = vst [vmem:[#allocation1] ss:$2 sm:$0xff] %v3965_v24 }
  0x73   : > { %3711 = vrot.lane.b32.xlu1 %v3710_v33, %s3817_s14  ;;  %s3829_s14 = smov 126  }
  0x78   : > { %v1749_v34 = vld.sshfl [vmem:[#allocation1] sm:$0xff pattern:$0x75316420]  ;;  %v1750_v35 = vld.sshfl [vmem:[#allocation1 + $0x8] sm:$0xff pattern:$0x75316420] }
  0x79   : > { %v3715_v36 = vpack.i.bf16 %v1750_v35, %v1749_v34  ;;  %1800 = vst [vmem:[#allocation1] ss:$2 sm:$0xff] %v3965_v24 }
  0x7b   : > { %3716 = vrot.lane.b32.xlu0 %v3715_v36, %s3818_s15  ;;  %s3999_s15 = scalar_lea.vmem %s6204_s2, %s3984_s13 }
  0x7c   : > { %v573_v52 = vld [vmem:[%s3999_s15] sm:$0x3]  ;;  %v3515_v1 = vld [vmem:[%s3999_s15 + $0x2] sm:$0x3] }
  0x80   : > { %v3975_v38 = vld.sshfl [vmem:[#allocation1] sm:$0xff pattern:$0x75316420]  ;;  %v3977_v39 = vld.sshfl [vmem:[#allocation1 + $0x8] sm:$0xff pattern:$0x75316420] }
  0x81   : > { %1852 = vst [vmem:[#allocation1] ss:$2 sm:$0xff] %v3965_v24 }
  0x88   : > { %v3986_v44 = vld.sshfl [vmem:[#allocation1] sm:$0xff pattern:$0x75316420]  ;;  %v3988_v45 = vld.sshfl [vmem:[#allocation1 + $0x8] sm:$0xff pattern:$0x75316420] }
  0x89   : > { %1902 = vst [vmem:[#allocation1] ss:$2 sm:$0xff] %v3965_v24 }
  0x90   : > { %v1903_v56 = vld.sshfl [vmem:[#allocation1] sm:$0xff pattern:$0x75316420]  ;;  %v1904_v57 = vld.sshfl [vmem:[#allocation1 + $0x8] sm:$0xff pattern:$0x75316420] }
  0x91   : > { %1954 = vst [vmem:[#allocation1] ss:$2 sm:$0xff] %v3965_v24  ;;  %v3725_v19 = vpack.i.bf16 %v1904_v57, %v1903_v56 }
  0x93   : > { %3726 = vrot.lane.b32.xlu1 %v3725_v19, %s3820_s26  ;;  %s3832_s26 = smov 94  }
  0x95   : > { %v3667_v41 = vpop.permute.xlu0 %3666 }
  0x96   : > { %v3669_v42 = vunpack.i.h.bf16 %v3667_v41  ;;  %v3668_v43 = vunpack.i.l.bf16 %v3667_v41  ;;  %v3520_v41 = vld [vmem:[%s3999_s15 + $0x4] sm:$0x3] }
  0x98   : > { %v570_v46 = vsel %vm568_vm0, %v3669_v42, %v3668_v43  ;;  %v569_v47 = vsel %vm568_vm0, %v3668_v43, %v3669_v42  ;;  %v1955_v12 = vld.sshfl [vmem:[#allocation1] sm:$0xff pattern:$0x75316420]  ;;  %v1956_v15 = vld.sshfl [vmem:[#allocation1 + $0x8] sm:$0xff pattern:$0x75316420] }
  0x99   : > { %v571_v48 = vpack.c.bf16 %v570_v46, %v570_v46  ;;  %v572_v49 = vpack.c.bf16 %v569_v47, %v569_v47  ;;  %2006 = vst [vmem:[#allocation1] ss:$2 sm:$0xff] %v3965_v24  ;;  %v3730_v18 = vpack.i.bf16 %v1956_v15, %v1955_v12  ;;  %v3523_v42 = vld [vmem:[%s3999_s15 + $0x6] sm:$0x3] }
  0x9b   : > { %v631_v50 = vsel %vm6342_vm1, %v571_v48, 0  ;;  %v634_v51 = vsel %vm6342_vm1, %v572_v49, 0  ;;  %3731 = vrot.lane.b32.xlu0 %v3730_v18, %s3821_s27  ;;  %v3720_v48 = vpack.i.bf16 %v3977_v39, %v3975_v38  ;;  %v3535_v18 = vld [vmem:[%s3999_s15 + $0xe] sm:$0x3]  ;;  %s521_s27 = scalar_lea.vmem %s6205_s3, %s3932_s25 }
  0x9c   : > { %643 = vmatpush.bf16.msra.mxu2 %v631_v50  ;;  %656 = vmatpush.bf16.msra.mxu3 %v634_v51 }
  0x9d   : > { %v3672_v53 = vpop.permute.xlu0 %3671  ;;  %3721 = vrot.lane.b32.xlu2 %v3720_v48, %s6346_s16  ;;  %s3831_s16 = smov 96  }
  0x9e   : > { %v3674_v54 = vunpack.i.h.bf16 %v3672_v53  ;;  %v3673_v55 = vunpack.i.l.bf16 %v3672_v53 }
  0x9f   : > { %3519 = vmatmul.msk.bf16.vlgmr.msra.gmra.mxu3 %vm6341_vm2, %v573_v52  ;;  %3518 = vmatmul.msk.bf16.vlgmr.msra.gmra.mxu2 %vm6341_vm2, %v573_v52 }
  0xa0   : > { %v585_v58 = vsel %vm583_vm3, %v3674_v54, %v3673_v55  ;;  %v584_v59 = vsel %vm583_vm3, %v3673_v55, %v3674_v54  ;;  %v2007_v51 = vld.sshfl [vmem:[#allocation1] sm:$0xff pattern:$0x75316420]  ;;  %v2008_v52 = vld.sshfl [vmem:[#allocation1 + $0x8] sm:$0xff pattern:$0x75316420] }
  0xa1   : > { %v586_v60 = vpack.c.bf16 %v585_v58, %v585_v58  ;;  %v587_v61 = vpack.c.bf16 %v584_v59, %v584_v59  ;;  %v3735_v38 = vpack.i.bf16 %v2008_v52, %v2007_v51  ;;  %2058 = vst [vmem:[#allocation1] ss:$2 sm:$0xff] %v3965_v24  ;;  %v3526_v24 = vld [vmem:[%s3999_s15 + $0x8] sm:$0x3] }
  0xa3   : > { %v596_v62 = vsel %vm6342_vm1, %v586_v60, 0  ;;  %v599_v63 = vsel %vm6342_vm1, %v587_v61, 0  ;;  %3736 = vrot.lane.b32.xlu0 %v3735_v38, %s3822_s29  ;;  %v3529_v61 = vld [vmem:[%s3999_s15 + $0xa] sm:$0x3]  ;;  %v1662_v38 = vld [vmem:[%s4109_s28] sm:$0x3] }
  0xa4   : > { %608 = vmatpush.bf16.msra.mxu0 %v596_v62  ;;  %621 = vmatpush.bf16.msra.mxu1 %v599_v63  ;;  %s3826_s29 = smov 34  }
  0xa5   : > { %v3677_v2 = vpop.permute.xlu1 %3676  ;;  %v3687_v3 = vpop.permute.xlu2 %3686 }
  0xa6   : > { %v3679_v4 = vunpack.i.h.bf16 %v3677_v2  ;;  %v3678_v5 = vunpack.i.l.bf16 %v3677_v2  ;;  %v3689_v8 = vunpack.i.h.bf16 %v3687_v3  ;;  %v3688_v9 = vunpack.i.l.bf16 %v3687_v3 }
  0xa7   : > { %3516 = vmatmul.msk.bf16.vlgmr.msra.gmra.mxu0 %vm6341_vm2, %v3515_v1  ;;  %3517 = vmatmul.msk.bf16.vlgmr.msra.gmra.mxu1 %vm6341_vm2, %v3515_v1 }
  0xa8   : > { %v673_v10 = vsel %vm671_vm4, %v3679_v4, %v3678_v5  ;;  %v672_v11 = vsel %vm671_vm4, %v3678_v5, %v3679_v4  ;;  %v824_v22 = vsel %vm823_vm5, %v3688_v9, %v3689_v8  ;;  %v825_v23 = vsel %vm823_vm5, %v3689_v8, %v3688_v9  ;;  %v2059_v4 = vld.sshfl [vmem:[#allocation1] sm:$0xff pattern:$0x75316420]  ;;  %v2060_v5 = vld.sshfl [vmem:[#allocation1 + $0x8] sm:$0xff pattern:$0x75316420] }
  0xa9   : > { %v674_v13 = vpack.c.bf16 %v673_v10, %v673_v10  ;;  %v675_v16 = vpack.c.bf16 %v672_v11, %v672_v11  ;;  %v826_v28 = vpack.c.bf16 %v824_v22, %v824_v22  ;;  %v827_v29 = vpack.c.bf16 %v825_v23, %v825_v23  ;;  %2697 = vst [vmem:[#allocation1] ss:$2 sm:$0xff] %v3939_v0 }
  0xaa   : > { %v3740_v8 = vpack.i.bf16 %v2060_v5, %v2059_v4  ;;  %v3549_v5 = vld [vmem:[%s4109_s28 + $0x6] sm:$0x3] }
  0xab   : > { %v682_v20 = vsel %vm6342_vm1, %v674_v13, 0  ;;  %v685_v21 = vsel %vm6342_vm1, %v675_v16, 0  ;;  %v834_v34 = vsel %vm6342_vm1, %v826_v28, 0  ;;  %v837_v35 = vsel %vm6342_vm1, %v827_v29, 0 }
  0xac   : > { %694 = vmatpush.bf16.msrb.mxu0 %v682_v20  ;;  %707 = vmatpush.bf16.msrb.mxu1 %v685_v21  ;;  %v3538_v20 = vld [vmem:[%s3999_s15 + $0x10] sm:$0x3] }
  0xad   : > { %v3682_v25 = vpop.permute.xlu1 %3681  ;;  %3741 = vrot.lane.b32.xlu2 %v3740_v8, %s3823_s24  ;;  %s3827_s24 = smov 30  }
  0xae   : > { %v3684_v26 = vunpack.i.h.bf16 %v3682_v25  ;;  %v3683_v27 = vunpack.i.l.bf16 %v3682_v25 }
  0xb0   : > { %793 = vmatpush.bf16.msra.mxu0 %v781_v14  ;;  %806 = vmatpush.bf16.msra.mxu1 %v784_v17  ;;  %v726_v30 = vsel %vm724_vm6, %v3684_v26, %v3683_v27  ;;  %v725_v31 = vsel %vm724_vm6, %v3683_v27, %v3684_v26  ;;  %v4087_v16 = vld.sshfl [vmem:[#allocation1] sm:$0xff pattern:$0x75316420]  ;;  %v4089_v14 = vld.sshfl [vmem:[#allocation1 + $0x8] sm:$0xff pattern:$0x75316420] }
  0xb1   : > { %v727_v32 = vpack.c.bf16 %v726_v30, %v726_v30  ;;  %v728_v33 = vpack.c.bf16 %v725_v31, %v725_v31  ;;  %6347 = vst [vmem:[#allocation4_spill] sm:$0xff] %v4087_v16  ;;  %v3532_v17 = vld [vmem:[%s3999_s15 + $0xc] sm:$0x3]  ;;  %v3541_v31 = vld [vmem:[%s4109_s28 + $0x2] sm:$0x3]  ;;  %s530_s15 = scalar_lea.vmem %s6207_s5, %s3932_s25 }
  0xb2   : > { %6348 = vst [vmem:[#allocation5_spill] sm:$0xff] %v4089_v14 }
  0xb3   : > { %v735_v36 = vsel %vm6342_vm1, %v727_v32, 0  ;;  %v738_v37 = vsel %vm6342_vm1, %v728_v33, 0  ;;  %2720 = vst [vmem:[#allocation1] ss:$2 sm:$0xff] %v3939_v0 }
  0xb4   : > { %747 = vmatpush.bf16.msrb.mxu2 %v735_v36  ;;  %760 = vmatpush.bf16.msrb.mxu3 %v738_v37 }
  0xb5   : > { %v3697_v43 = vpop.permute.xlu2 %3696 }
  0xb6   : > { %v3699_v46 = vunpack.i.h.bf16 %v3697_v43  ;;  %v3698_v47 = vunpack.i.l.bf16 %v3697_v43 }
  0xb7   : > { %3521 = vmatmul.msk.bf16.vlgmr.msrb.gmra.mxu0 %vm6341_vm2, %v3520_v41  ;;  %3522 = vmatmul.msk.bf16.vlgmr.msrb.gmra.mxu1 %vm6341_vm2, %v3520_v41 }
  0xb8   : > { %846 = vmatpush.bf16.msra.mxu2 %v834_v34  ;;  %859 = vmatpush.bf16.msra.mxu3 %v837_v35  ;;  %v930_v49 = vsel %vm929_vm7, %v3698_v47, %v3699_v46  ;;  %v931_v50 = vsel %vm929_vm7, %v3699_v46, %v3698_v47  ;;  %v3546_v47 = vld [vmem:[%s4109_s28 + $0x4] sm:$0x3] }
  0xb9   : > { %3524 = vmatmul.msk.bf16.vlgmr.msrb.gmra.mxu2 %vm6341_vm2, %v3523_v42  ;;  %3525 = vmatmul.msk.bf16.vlgmr.msrb.gmra.mxu3 %vm6341_vm2, %v3523_v42  ;;  %v932_v53 = vpack.c.bf16 %v930_v49, %v930_v49  ;;  %v933_v54 = vpack.c.bf16 %v931_v50, %v931_v50 }
  0xbb   : > { %v940_v39 = vsel %vm6342_vm1, %v932_v53, 0  ;;  %v943_v55 = vsel %vm6342_vm1, %v933_v54, 0 }
  0xbc   : > { %952 = vmatpush.bf16.msrb.mxu2 %v940_v39  ;;  %965 = vmatpush.bf16.msrb.mxu3 %v943_v55  ;;  %v4136_v39 = vpack.c.bf16 %v3988_v45, %v3986_v44 }
  0xbd   : > { %v3702_v56 = vpop.permute.xlu2 %3701 }
  0xbe   : > { %v3704_v57 = vunpack.i.h.bf16 %v3702_v56  ;;  %v3703_v58 = vunpack.i.l.bf16 %v3702_v56  ;;  %6349 = vst [vmem:[#allocation6_spill] sm:$0xff] %v4136_v39  ;;  %v1862_v55 = vunpack.c.h.b16 %v4136_v39 }
  0xc0   : > { %v983_v59 = vsel %vm982_vm8, %v3703_v58, %v3704_v57  ;;  %v984_v60 = vsel %vm982_vm8, %v3704_v57, %v3703_v58  ;;  %v1864_v56 = vpack.c.b16 %v1862_v55, %v1862_v55  ;;  %v1861_v57 = vunpack.c.l.b16 %v4136_v39 }
  0xc1   : > { %v985_v2 = vpack.c.bf16 %v983_v59, %v983_v59  ;;  %v986_v3 = vpack.c.bf16 %v984_v60, %v984_v60 }
  0xc3   : > { %v993_v11 = vsel %vm6342_vm1, %v985_v2, 0  ;;  %v996_v12 = vsel %vm6342_vm1, %v986_v3, 0 }
  0xc5   : > { %v3692_v62 = vpop.permute.xlu0 %3691 }
  0xc6   : > { %v3694_v63 = vunpack.i.h.bf16 %v3692_v62  ;;  %v3693_v1 = vunpack.i.l.bf16 %v3692_v62  ;;  %v3552_v62 = vld [vmem:[%s4109_s28 + $0x8] sm:$0x3] }
  0xc7   : > { %3527 = vmatmul.msk.bf16.vlgmr.msra.gmra.mxu0 %vm6341_vm2, %v3526_v24  ;;  %3528 = vmatmul.msk.bf16.vlgmr.msra.gmra.mxu1 %vm6341_vm2, %v3526_v24  ;;  %v1872_v24 = vsel %vm6342_vm1, %v1864_v56, 0 }
  0xc8   : > { %v877_v6 = vsel %vm876_vm9, %v3693_v1, %v3694_v63  ;;  %v878_v7 = vsel %vm876_vm9, %v3694_v63, %v3693_v1 }
  0xc9   : > { %3530 = vmatmul.msk.bf16.vlgmr.msra.gmra.mxu2 %vm6341_vm2, %v3529_v61  ;;  %3531 = vmatmul.msk.bf16.vlgmr.msra.gmra.mxu3 %vm6341_vm2, %v3529_v61  ;;  %v879_v9 = vpack.c.bf16 %v877_v6, %v877_v6  ;;  %v880_v10 = vpack.c.bf16 %v878_v7, %v878_v7  ;;  %v1863_v61 = vpack.c.b16 %v1861_v57, %v1861_v57  ;;  %v3564_v57 = vld [vmem:[%s4109_s28 + $0x10] sm:$0x3] }
  0xcb   : > { %v887_v15 = vsel %vm6342_vm1, %v879_v9, 0  ;;  %v890_v13 = vsel %vm6342_vm1, %v880_v10, 0  ;;  %v1869_v63 = vsel %vm6342_vm1, %v1863_v61, 0 }
  0xcc   : > { %899 = vmatpush.bf16.msrb.mxu0 %v887_v15  ;;  %912 = vmatpush.bf16.msrb.mxu1 %v890_v13 }
  0xd0   : > { %1005 = vmatpush.bf16.msra.mxu0 %v993_v11  ;;  %1018 = vmatpush.bf16.msra.mxu1 %v996_v12 }
  0xd7   : > { %3534 = vmatmul.msk.bf16.vlgmr.msrb.gmra.mxu1 %vm6341_vm2, %v3532_v17  ;;  %3533 = vmatmul.msk.bf16.vlgmr.msrb.gmra.mxu0 %vm6341_vm2, %v3532_v17 }
  0xd9   : > { %3536 = vmatmul.msk.bf16.vlgmr.msrb.gmra.mxu2 %vm6341_vm2, %v3535_v18  ;;  %3537 = vmatmul.msk.bf16.vlgmr.msrb.gmra.mxu3 %vm6341_vm2, %v3535_v18 }
  0xdd   : > { %v3707_v19 = vpop.permute.xlu1 %3706 }
  0xde   : > { %v3709_v35 = vunpack.i.h.bf16 %v3707_v19  ;;  %v3708_v36 = vunpack.i.l.bf16 %v3707_v19 }
  0xe0   : > { %v1658_v48 = vsel %vm568_vm0, %v3708_v36, %v3709_v35  ;;  %v1659_v49 = vsel %vm568_vm0, %v3709_v35, %v3708_v36  ;;  %vm1500_vm0 = vcmask 523712  }
  0xe1   : > { %v1661_v51 = vpack.c.bf16 %v1658_v48, %v1658_v48  ;;  %v1660_v52 = vpack.c.bf16 %v1659_v49, %v1659_v49 }
  0xe3   : > { %v1720_v53 = vsel %vm6342_vm1, %v1661_v51, 0  ;;  %v1717_v54 = vsel %vm6342_vm1, %v1660_v52, 0 }
  0xe4   : > { %1742 = vmatpush.bf16.msrb.mxu1 %v1720_v53  ;;  %1729 = vmatpush.bf16.msrb.mxu0 %v1717_v54 }
  0xe5   : > { %v3712_v21 = vpop.permute.xlu1 %3711 }
  0xe6   : > { %v3714_v22 = vunpack.i.h.bf16 %v3712_v21  ;;  %v3713_v23 = vunpack.i.l.bf16 %v3712_v21 }
  0xe7   : > { %3539 = vmatmul.msk.bf16.vlgmr.msra.gmra.mxu0 %vm6341_vm2, %v3538_v20  ;;  %3540 = vmatmul.msk.bf16.vlgmr.msra.gmra.mxu1 %vm6341_vm2, %v3538_v20 }
  0xe8   : > { %v1672_v25 = vsel %vm583_vm3, %v3713_v23, %v3714_v22  ;;  %v1673_v26 = vsel %vm583_vm3, %v3714_v22, %v3713_v23  ;;  %vm1527_vm3 = vcmask 654912  }
  0xe9   : > { %v1675_v27 = vpack.c.bf16 %v1672_v25, %v1672_v25  ;;  %v1674_v28 = vpack.c.bf16 %v1673_v26, %v1673_v26 }
  0xeb   : > { %v1685_v29 = vsel %vm6342_vm1, %v1675_v27, 0  ;;  %v1682_v30 = vsel %vm6342_vm1, %v1674_v28, 0  ;;  %v3558_v27 = vld [vmem:[%s4109_s28 + $0xc] sm:$0x3] }
  0xec   : > { %1707 = vmatpush.bf16.msra.mxu3 %v1685_v29  ;;  %1694 = vmatpush.bf16.msra.mxu2 %v1682_v30 }
  0xed   : > { %v3717_v32 = vpop.permute.xlu0 %3716 }
  0xee   : > { %v3719_v33 = vunpack.i.h.bf16 %v3717_v32  ;;  %v3718_v34 = vunpack.i.l.bf16 %v3717_v32 }
  0xef   : > { %3543 = vmatmul.msk.bf16.vlgmr.msra.gmra.mxu3 %vm6341_vm2, %v3541_v31  ;;  %3542 = vmatmul.msk.bf16.vlgmr.msra.gmra.mxu2 %vm6341_vm2, %v3541_v31 }
  0xf0   : > { %v1757_v37 = vsel %vm671_vm4, %v3718_v34, %v3719_v33  ;;  %v1758_v42 = vsel %vm671_vm4, %v3719_v33, %v3718_v34  ;;  %v3555_v34 = vld [vmem:[%s4109_s28 + $0xa] sm:$0x3]  ;;  %vm1581_vm4 = vcmask 917312  }
  0xf1   : > { %v1760_v41 = vpack.c.bf16 %v1757_v37, %v1757_v37  ;;  %v1759_v46 = vpack.c.bf16 %v1758_v42, %v1758_v42 }
  0xf3   : > { %v1770_v43 = vsel %vm6342_vm1, %v1760_v41, 0  ;;  %v1767_v50 = vsel %vm6342_vm1, %v1759_v46, 0 }
  0xf4   : > { %1792 = vmatpush.bf16.msrb.mxu3 %v1770_v43  ;;  %1779 = vmatpush.bf16.msrb.mxu2 %v1767_v50 }
  0xf7   : > { %3545 = vmatmul.msk.bf16.vlgmr.msrb.gmra.mxu1 %vm6341_vm2, %v1662_v38  ;;  %3544 = vmatmul.msk.bf16.vlgmr.msrb.gmra.mxu0 %vm6341_vm2, %v1662_v38  ;;  %v3722_v58 = vpop.permute.xlu2 %3721 }
  0xf8   : > { %v3724_v59 = vunpack.i.h.bf16 %v3722_v58  ;;  %v3723_v60 = vunpack.i.l.bf16 %v3722_v58  ;;  %1894 = vmatpush.bf16.msra.mxu3 %v1872_v24  ;;  %1881 = vmatpush.bf16.msra.mxu2 %v1869_v63  ;;  %v3561_v63 = vld [vmem:[%s4109_s28 + $0xe] sm:$0x3]  ;;  %s3825_s28 = smov 32  }
  0xfa   : > { %v1809_v44 = vsel %vm724_vm6, %v3723_v60, %v3724_v59  ;;  %v1810_v1 = vsel %vm724_vm6, %v3724_v59, %v3723_v60  ;;  %vm1446_vm6 = vcmask 261312  }
  0xfb   : > { %v1812_v45 = vpack.c.bf16 %v1809_v44, %v1809_v44  ;;  %v1811_v2 = vpack.c.bf16 %v1810_v1, %v1810_v1 }
  0xfd   : > { %v1822_v3 = vsel %vm6342_vm1, %v1812_v45, 0  ;;  %v1819_v4 = vsel %vm6342_vm1, %v1811_v2, 0 }
  0xfe   : > { %1844 = vmatpush.bf16.msra.mxu1 %v1822_v3  ;;  %1831 = vmatpush.bf16.msra.mxu0 %v1819_v4 }
  0xff   : > { %3548 = vmatmul.msk.bf16.vlgmr.msrb.gmra.mxu3 %vm6341_vm2, %v3546_v47  ;;  %3547 = vmatmul.msk.bf16.vlgmr.msrb.gmra.mxu2 %vm6341_vm2, %v3546_v47 }
 0x105   : > { %v3727_v7 = vpop.permute.xlu1 %3726 }
 0x106   : > { %v3729_v10 = vunpack.i.h.bf16 %v3727_v7  ;;  %v3728_v11 = vunpack.i.l.bf16 %v3727_v7 }
 0x107   : > { %3551 = vmatmul.msk.bf16.vlgmr.msra.gmra.mxu1 %vm6341_vm2, %v3549_v5  ;;  %3550 = vmatmul.msk.bf16.vlgmr.msra.gmra.mxu0 %vm6341_vm2, %v3549_v5  ;;  %v3742_v37 = vpop.permute.xlu2 %3741 }
 0x108   : > { %v1912_v22 = vsel %vm823_vm5, %v3729_v10, %v3728_v11  ;;  %v1911_v28 = vsel %vm823_vm5, %v3728_v11, %v3729_v10  ;;  %v3744_v41 = vunpack.i.h.bf16 %v3742_v37  ;;  %v3743_v42 = vunpack.i.l.bf16 %v3742_v37 }
 0x109   : > { %v1914_v26 = vpack.c.bf16 %v1912_v22, %v1912_v22  ;;  %v1913_v30 = vpack.c.bf16 %v1911_v28, %v1911_v28  ;;  %vm1608_vm5 = vcmask 1048512  }
 0x10a   : > { %v2068_v48 = vsel %vm982_vm8, %v3744_v41, %v3743_v42  ;;  %v2067_v50 = vsel %vm982_vm8, %v3743_v42, %v3744_v41  ;;  %vm1625_vm8 = vcmask 261120  }
 0x10b   : > { %v1924_v29 = vsel %vm6342_vm1, %v1914_v26, 0  ;;  %v1921_v33 = vsel %vm6342_vm1, %v1913_v30, 0  ;;  %v2070_v49 = vpack.c.bf16 %v2068_v48, %v2068_v48  ;;  %v2069_v54 = vpack.c.bf16 %v2067_v50, %v2067_v50  ;;  %v4208_v48 = vld [vmem:[%s6209_s7 + $0x30] sm:$0xff] }
 0x10c   : > { %1946 = vmatpush.bf16.msrb.mxu1 %v1924_v29  ;;  %1933 = vmatpush.bf16.msrb.mxu0 %v1921_v33  ;;  %6350 = vst [vmem:[#allocation7_spill] sm:$0xff] %v4208_v48  ;;  %v4218_v50 = vld [vmem:[%s6209_s7 + $0x10] sm:$0xff] }
 0x10d   : > { %v3732_v6 = vpop.permute.xlu0 %3731  ;;  %v2080_v53 = vsel %vm6342_vm1, %v2070_v49, 0  ;;  %v2077_v55 = vsel %vm6342_vm1, %v2069_v54, 0  ;;  %v4213_v49 = vld [vmem:[%s6209_s7 + $0x38] sm:$0xff]  ;;  %v4235_v54 = vld [vmem:[%s6209_s7 + $0x8] sm:$0xff] }
 0x10e   : > { %v3734_v8 = vunpack.i.h.bf16 %v3732_v6  ;;  %v3733_v9 = vunpack.i.l.bf16 %v3732_v6  ;;  %6351 = vst [vmem:[#allocation8_spill] sm:$0xff] %v4213_v49 }
 0x10f   : > { %3554 = vmatmul.msk.bf16.vlgmr.msra.gmra.mxu3 %vm6341_vm2, %v3552_v62  ;;  %3553 = vmatmul.msk.bf16.vlgmr.msra.gmra.mxu2 %vm6341_vm2, %v3552_v62  ;;  %6353 = vst [vmem:[#allocation10_spill] sm:$0xff] %v4235_v54 }
 0x110   : > { %v1964_v13 = vsel %vm876_vm9, %v3734_v8, %v3733_v9  ;;  %v1963_v17 = vsel %vm876_vm9, %v3733_v9, %v3734_v8  ;;  %vm1627_vm9 = vcmask 392192  }
 0x111   : > { %v1966_v20 = vpack.c.bf16 %v1964_v13, %v1964_v13  ;;  %v1965_v21 = vpack.c.bf16 %v1963_v17, %v1963_v17 }
 0x113   : > { %v1976_v23 = vsel %vm6342_vm1, %v1966_v20, 0  ;;  %v1973_v25 = vsel %vm6342_vm1, %v1965_v21, 0 }
 0x114   : > { %1998 = vmatpush.bf16.msrb.mxu3 %v1976_v23  ;;  %1985 = vmatpush.bf16.msrb.mxu2 %v1973_v25 }
 0x115   : > { %v3737_v43 = vpop.permute.xlu0 %3736 }
 0x116   : > { %v3739_v46 = vunpack.i.h.bf16 %v3737_v43  ;;  %v3738_v47 = vunpack.i.l.bf16 %v3737_v43 }
 0x117   : > { %3557 = vmatmul.msk.bf16.vlgmr.msrb.gmra.mxu1 %vm6341_vm2, %v3555_v34  ;;  %3556 = vmatmul.msk.bf16.vlgmr.msrb.gmra.mxu0 %vm6341_vm2, %v3555_v34 }
 0x118   : > { %2102 = vmatpush.bf16.msra.mxu3 %v2080_v53  ;;  %v2016_v38 = vsel %vm929_vm7, %v3739_v46, %v3738_v47  ;;  %2089 = vmatpush.bf16.msra.mxu2 %v2077_v55  ;;  %v2015_v58 = vsel %vm929_vm7, %v3738_v47, %v3739_v46  ;;  %v4230_v53 = vld [vmem:[%s6209_s7] sm:$0xff]  ;;  %vm1623_vm7 = vcmask 130048  }
 0x119   : > { %v2018_v56 = vpack.c.bf16 %v2016_v38, %v2016_v38  ;;  %v2017_v60 = vpack.c.bf16 %v2015_v58, %v2015_v58  ;;  %6352 = vst [vmem:[#allocation9_spill] sm:$0xff] %v4230_v53 }
 0x11b   : > { %v2028_v59 = vsel %vm6342_vm1, %v2018_v56, 0  ;;  %v2025_v24 = vsel %vm6342_vm1, %v2017_v60, 0  ;;  %vm6343_vm1 = vcmask 654336  }
 0x11c   : > { %2050 = vmatpush.bf16.msra.mxu1 %v2028_v59  ;;  %2037 = vmatpush.bf16.msra.mxu0 %v2025_v24 }
 0x11f   : > { %3560 = vmatmul.msk.bf16.vlgmr.msrb.gmra.mxu3 %vm6341_vm2, %v3558_v27  ;;  %3559 = vmatmul.msk.bf16.vlgmr.msrb.gmra.mxu2 %vm6341_vm2, %v3558_v27 }
 0x122   : > { %v4154_v12 = vpop.f32.mrf.mxu3  ;;  %v4156_v15 = vpop.f32.mrf.mxu2 }
 0x124   : > { %v4162_v18 = vpop.f32.mrf.mxu0  ;;  %v4164_v19 = vpop.f32.mrf.mxu1 }
 0x125   : > { %v659_v17 = vadd.f32 %v4154_v12, %v4164_v19  ;;  %v646_v20 = vadd.f32 %v4156_v15, %v4162_v18 }
 0x127   : > { %3563 = vmatmul.msk.bf16.vlgmr.msra.gmra.mxu1 %vm6341_vm2, %v3561_v63  ;;  %3562 = vmatmul.msk.bf16.vlgmr.msra.gmra.mxu0 %vm6341_vm2, %v3561_v63 }
 0x12a   : > { %v647_v31 = vpop.f32.mrf.mxu2  ;;  %v660_v32 = vpop.f32.mrf.mxu3 }
 0x12c   : > { %v612_v35 = vpop.f32.mrf.mxu0  ;;  %v625_v36 = vpop.f32.mrf.mxu1 }
 0x12f   : > { %3566 = vmatmul.msk.bf16.vlgmr.msra.gmra.mxu3 %vm6341_vm2, %v3564_v57  ;;  %3565 = vmatmul.msk.bf16.vlgmr.msra.gmra.mxu2 %vm6341_vm2, %v3564_v57  ;;  %vm1629_vm2 = vcmask 523264  }
 0x134   : > { %v696_v51 = vpop.f32.mrf.mxu0  ;;  %v709_v52 = vpop.f32.mrf.mxu1 }
 0x135   : > { %v714_v21 = vadd.f32 %v709_v52, %v659_v17  ;;  %v713_v22 = vadd.f32 %v696_v51, %v646_v20  ;;  %v4225_v52 = vld [vmem:[%s6209_s7 + $0x18] sm:$0xff] }
 0x13c   : > { %v749_v61 = vpop.f32.mrf.mxu2  ;;  %v762_v62 = vpop.f32.mrf.mxu3 }
 0x13d   : > { %v698_v44 = vpop.f32.mrf.mxu0  ;;  %v711_v45 = vpop.f32.mrf.mxu1  ;;  %v767_v23 = vadd.f32 %v762_v62, %v714_v21  ;;  %v766_v29 = vadd.f32 %v749_v61, %v713_v22  ;;  %v4297_v21 = vld [vmem:[%s6209_s7 + $0xd0] sm:$0xff] }
 0x13e   : > { %v4252_v44 = vld [vmem:[%s6209_s7 + $0xa0] sm:$0xff]  ;;  %v4257_v45 = vld [vmem:[%s6209_s7 + $0xa8] sm:$0xff]  ;;  %6357 = vst [vmem:[#allocation14_spill] sm:$0xff] %v4297_v21 }
 0x13f   : > { %6354 = vst [vmem:[#allocation11_spill] sm:$0xff] %v4252_v44 }
 0x140   : > { %6355 = vst [vmem:[#allocation12_spill] sm:$0xff] %v4257_v45 }
 0x144   : > { %v751_v1 = vpop.f32.mrf.mxu2  ;;  %v764_v2 = vpop.f32.mrf.mxu3 }
 0x145   : > { %v795_v3 = vpop.f32.mrf.mxu0  ;;  %v808_v4 = vpop.f32.mrf.mxu1  ;;  %v4262_v1 = vld [vmem:[%s6209_s7 + $0x20] sm:$0xff]  ;;  %v4267_v2 = vld [vmem:[%s6209_s7 + $0x28] sm:$0xff] }
 0x146   : > { %v813_v30 = vadd.f32 %v808_v4, %v767_v23  ;;  %v812_v31 = vadd.f32 %v795_v3, %v766_v29  ;;  %6356 = vst [vmem:[#allocation13_spill] sm:$0xff] %v4267_v2  ;;  %v4272_v3 = vld [vmem:[%s6209_s7 + $0x40] sm:$0xff]  ;;  %v4277_v4 = vld [vmem:[%s6209_s7 + $0x48] sm:$0xff]  ;;  %v4302_v23 = vld [vmem:[%s6209_s7 + $0xd8] sm:$0xff] }
 0x147   : > { %6358 = vst [vmem:[#allocation15_spill] sm:$0xff] %v4302_v23 }
 0x14c   : > { %v848_v5 = vpop.f32.mrf.mxu2  ;;  %v861_v6 = vpop.f32.mrf.mxu3 }
 0x14d   : > { %v797_v7 = vpop.f32.mrf.mxu0  ;;  %v810_v8 = vpop.f32.mrf.mxu1  ;;  %v866_v32 = vadd.f32 %v861_v6, %v813_v30  ;;  %v865_v33 = vadd.f32 %v848_v5, %v812_v31  ;;  %v4317_v30 = vld [vmem:[%s6209_s7 + $0x60] sm:$0xff]  ;;  %v4322_v31 = vld [vmem:[%s6209_s7 + $0x68] sm:$0xff] }
 0x154   : > { %v850_v9 = vpop.f32.mrf.mxu2  ;;  %v863_v10 = vpop.f32.mrf.mxu3 }
 0x155   : > { %v901_v11 = vpop.f32.mrf.mxu0  ;;  %v914_v13 = vpop.f32.mrf.mxu1 }
 0x156   : > { %v919_v34 = vadd.f32 %v914_v13, %v866_v32  ;;  %v918_v35 = vadd.f32 %v901_v11, %v865_v33 }
 0x15c   : > { %v954_v25 = vpop.f32.mrf.mxu2  ;;  %v967_v26 = vpop.f32.mrf.mxu3 }
 0x15d   : > { %v903_v27 = vpop.f32.mrf.mxu0  ;;  %v916_v28 = vpop.f32.mrf.mxu1  ;;  %v972_v36 = vadd.f32 %v967_v26, %v919_v34  ;;  %v971_v15 = vadd.f32 %v954_v25, %v918_v35  ;;  %v4307_v25 = vld [vmem:[%s6209_s7 + $0x50] sm:$0xff]  ;;  %v4312_v26 = vld [vmem:[%s6209_s7 + $0x58] sm:$0xff] }
 0x164   : > { %v969_v37 = vpop.f32.mrf.mxu3  ;;  %v956_v12 = vpop.f32.mrf.mxu2 }
 0x165   : > { %v1007_v19 = vpop.f32.mrf.mxu0  ;;  %v1020_v41 = vpop.f32.mrf.mxu1 }
 0x166   : > { %v1025_v18 = vadd.f32 %v1020_v41, %v972_v36  ;;  %v1024_v42 = vadd.f32 %v1007_v19, %v971_v15 }
 0x168   : > { %v1032_v43 = vrot.slane %v1025_v18, 7 }
 0x16a   : > { %v1034_v46 = vsel %vm1033_vm10, %v1024_v42, %v1032_v43  ;;  %v1036_v5 = vsel %vm1035_vm11, %v1024_v42, %v1032_v43  ;;  %v1042_v13 = vsel %vm1041_vm12, %v1024_v42, %v1032_v43  ;;  %v1039_v20 = vsel %vm1038_vm13, %v1024_v42, %v1032_v43 }
 0x16b   : > { %v4203_v47 = vperm.slane %v1034_v46, 0  ;;  %v4220_v51 = vperm.slane %v1034_v46, 1  ;;  %v1037_v17 = vrot.slane %v1036_v5, 1  ;;  %v1043_v27 = vrot.slane %v1042_v13, 3  ;;  %v4351_v46 = vld [vmem:[%s6209_s7 + $0x70] sm:$0xff]  ;;  %v4392_v5 = vld [vmem:[%s6209_s7 + $0xb8] sm:$0xff] }
 0x16c   : > { %v1040_v32 = vrot.slane %v1039_v20, 2  ;;  %6364 = vst [vmem:[#allocation21_spill] sm:$0xff] %v4392_v5 }
 0x16d   : > { %v1009_v38 = vpop.f32.mrf.mxu0  ;;  %v1022_v55 = vpop.f32.mrf.mxu1  ;;  %v1106_v56 = vadd.f32 %v4208_v48, %v4203_v47  ;;  %v1107_v57 = vadd.f32 %v4213_v49, %v4220_v51  ;;  %v1062_v58 = vadd.f32 %v4203_v47, %v4218_v50  ;;  %v1063_v59 = vadd.f32 %v4220_v51, %v4225_v52 }
 0x16e   : > { %v1060_v60 = vadd.f32 %v4203_v47, %v4230_v53  ;;  %v1061_v24 = vadd.f32 %v4220_v51, %v4235_v54  ;;  %v1280_v6 = vadd.f32 %v4252_v44, %v4203_v47  ;;  %v1281_v7 = vadd.f32 %v4257_v45, %v4220_v51  ;;  %v4356_v38 = vld [vmem:[%s6209_s7 + $0x78] sm:$0xff] }
 0x16f   : > { %v1123_v61 = vmax.f32 %v1106_v56, %v1107_v57  ;;  %v1079_v62 = vmax.f32 %v1062_v58, %v1063_v59  ;;  %v1104_v8 = vadd.f32 %v4262_v1, %v4203_v47  ;;  %v1105_v9 = vadd.f32 %v4267_v2, %v4220_v51  ;;  %v4363_v56 = vld [vmem:[%s6209_s7 + $0x80] sm:$0xff]  ;;  %v4368_v57 = vld [vmem:[%s6209_s7 + $0x88] sm:$0xff]  ;;  %v4373_v58 = vld [vmem:[%s6209_s7 + $0x90] sm:$0xff] }
 0x170   : > { %v1076_v63 = vmax.f32 %v1060_v60, %v1061_v24  ;;  %v1148_v10 = vadd.f32 %v4272_v3, %v4203_v47  ;;  %v1149_v11 = vadd.f32 %v4277_v4, %v4220_v51  ;;  %v1296_v22 = vmax.f32 %v1280_v6, %v1281_v7  ;;  %6359 = vst [vmem:[#allocation16_spill] sm:$0xff] %v4363_v56 }
 0x171   : > { %1124 = vmax.xlane.f32.xlu0 %v1123_v61  ;;  %1080 = vmax.xlane.f32.xlu2 %v1079_v62  ;;  %v1120_v28 = vmax.f32 %v1104_v8, %v1105_v9  ;;  %v1326_v33 = vadd.f32 %v4297_v21, %v4203_v47  ;;  %v4326_v34 = vperm.slane %v1037_v17, 0  ;;  %v1327_v35 = vadd.f32 %v4302_v23, %v4220_v51  ;;  %v4382_v62 = vld [vmem:[%s6209_s7 + $0x98] sm:$0xff] }
 0x172   : > { %1077 = vmax.xlane.f32.xlu1 %v1076_v63  ;;  %v1164_v29 = vmax.f32 %v1148_v10, %v1149_v11  ;;  %v1150_v36 = vadd.f32 %v4307_v25, %v4203_v47  ;;  %v1151_v37 = vadd.f32 %v4312_v26, %v4220_v51  ;;  %v4334_v12 = vpop.f32.mrf.mxu3  ;;  %v4336_v19 = vpop.f32.mrf.mxu2  ;;  %v4338_v41 = vperm.slane %v1037_v17, 1  ;;  %6360 = vst [vmem:[#allocation17_spill] sm:$0xff] %v4368_v57  ;;  %v4387_v63 = vld [vmem:[%s6209_s7 + $0xb0] sm:$0xff]  ;;  %v4403_v10 = vld [vmem:[%s6209_s7 + $0xc0] sm:$0xff] }
 0x173   : > { %v1192_v15 = vadd.f32 %v4317_v30, %v4203_v47  ;;  %v1193_v18 = vadd.f32 %v4322_v31, %v4220_v51  ;;  %v4344_v42 = vperm.slane %v1043_v27, 0  ;;  %v4346_v43 = vperm.slane %v1043_v27, 1  ;;  %6361 = vst [vmem:[#allocation18_spill] sm:$0xff] %v4373_v58  ;;  %v4425_v27 = vld [vmem:[%s6209_s7 + $0xe0] sm:$0xff] }
 0x174   : > { %v4358_v55 = vperm.slane %v1040_v32, 0  ;;  %v4375_v59 = vperm.slane %v1040_v32, 1  ;;  %v1343_v60 = vmax.f32 %v1326_v33, %v1327_v35  ;;  %v1167_v24 = vmax.f32 %v1150_v36, %v1151_v37  ;;  %6362 = vst [vmem:[#allocation19_spill] sm:$0xff] %v4382_v62 }
 0x175   : > { %v1064_v61 = vadd.f32 %v4326_v34, %v4230_v53  ;;  %6363 = vst [vmem:[#allocation20_spill] sm:$0xff] %v4387_v63  ;;  %v1208_v6 = vmax.f32 %v1192_v15, %v1193_v18  ;;  %v1065_v7 = vadd.f32 %v4338_v41, %v4235_v54  ;;  %v1194_v8 = vadd.f32 %v4351_v46, %v4203_v47 }
 0x176   : > { %v1195_v9 = vadd.f32 %v4356_v38, %v4220_v51  ;;  %6365 = vst [vmem:[#allocation22_spill] sm:$0xff] %v4403_v10  ;;  %v1236_v11 = vadd.f32 %v4363_v56, %v4203_v47  ;;  %v1237_v13 = vadd.f32 %v4368_v57, %v4220_v51  ;;  %v4411_v17 = vadd.f32 %v4344_v42, %v4230_v53 }
 0x177   : > { %v4415_v20 = vadd.f32 %v4346_v43, %v4235_v54  ;;  %6367 = vst [vmem:[#allocation24_spill] sm:$0xff] %v4425_v27  ;;  %v4438_v32 = vadd.f32 %v4382_v62, %v4220_v51  ;;  %v4442_v33 = vadd.f32 %v4387_v63, %v4203_v47  ;;  %v4446_v35 = vadd.f32 %v4392_v5, %v4220_v51 }
 0x178   : > { %v4450_v36 = vadd.f32 %v4262_v1, %v4358_v55  ;;  %v4454_v37 = vadd.f32 %v4267_v2, %v4375_v59  ;;  %v1082_v14 = vmax.f32 %v1064_v61, %v1065_v7  ;;  %v1211_v16 = vmax.f32 %v1194_v8, %v1195_v9  ;;  %v4486_v61 = vld [vmem:[%s6209_s7 + $0xf8] sm:$0xff] }
 0x179   : > { %1297 = vmax.xlane.f32.xlu0 %v1296_v22  ;;  %1121 = vmax.xlane.f32.xlu2 %v1120_v28  ;;  %v4420_v22 = vld [vmem:[%s6209_s7 + $0xc8] sm:$0xff]  ;;  %v1094_v0 = vmax.f32 %v4411_v17, %v4415_v20  ;;  %v1299_v2 = vmax.f32 %v4442_v33, %v4446_v35  ;;  %v4490_v7 = vadd.f32 %v4208_v48, %v4344_v42  ;;  %v1744_v20 = vpop.f32.mrf.mxu1 }
 0x17a   : > { %1165 = vmax.xlane.f32.xlu1 %v1164_v29  ;;  %6366 = vst [vmem:[#allocation23_spill] sm:$0xff] %v4420_v22  ;;  %v4430_v28 = vld [vmem:[%s6209_s7 + $0xe8] sm:$0xff]  ;;  %v4434_v29 = vadd.f32 %v4373_v58, %v4203_v47  ;;  %v1711_v15 = vpop.f32.mrf.mxu3  ;;  %v1698_v18 = vpop.f32.mrf.mxu2  ;;  %v4462_v39 = vadd.f32 %v4420_v22, %v4220_v51  ;;  %v4494_v8 = vadd.f32 %v4213_v49, %v4346_v43 }
 0x17b   : > { %6368 = vst [vmem:[#allocation25_spill] sm:$0xff] %v4430_v28  ;;  %v4475_v15 = vld [vmem:[%s6209_s7 + $0xf0] sm:$0xff]  ;;  %v1252_v18 = vmax.f32 %v1236_v11, %v1237_v13  ;;  %v4498_v9 = vadd.f32 %v4363_v56, %v4326_v34  ;;  %v4502_v11 = vadd.f32 %v4368_v57, %v4338_v41  ;;  %v4520_v33 = vadd.f32 %v4358_v55, %v4230_v53  ;;  %v1731_v53 = vpop.f32.mrf.mxu0 }
 0x17c   : > { %v1255_v40 = vmax.f32 %v4434_v29, %v4438_v32  ;;  %v4512_v29 = vadd.f32 %v4475_v15, %v4203_v47  ;;  %v4516_v32 = vadd.f32 %v4486_v61, %v4220_v51  ;;  %v4526_v17 = vadd.f32 %v4351_v46, %v4344_v42 }
 0x17d   : > { %6369 = vst [vmem:[#allocation26_spill] sm:$0xff] %v4498_v9  ;;  %v4538_v13 = vadd.f32 %v4307_v25, %v4344_v42  ;;  %v4542_v35 = vadd.f32 %v4312_v26, %v4346_v43  ;;  %v1732_v9 = vadd.f32 %v1731_v53, %v4336_v19  ;;  %v4568_v53 = vadd.f32 %v4392_v5, %v4338_v41 }
 0x17e   : > { %6370 = vst [vmem:[#allocation27_spill] sm:$0xff] %v4502_v11  ;;  %v4549_v11 = vadd.f32 %v4351_v46, %v4326_v34  ;;  %v4572_v19 = vadd.f32 %v4317_v30, %v4358_v55  ;;  %v4586_v48 = vadd.f32 %v4382_v62, %v4338_v41 }
 0x17f   : > { %6372 = vst [vmem:[#allocation29_spill] sm:$0xff] %v4538_v13  ;;  %v4630_v13 = vadd.f32 %v4257_v45, %v4346_v43 }
 0x180   : > { %6373 = vst [vmem:[#allocation30_spill] sm:$0xff] %v4542_v35 }
 0x181   : > { %1344 = vmax.xlane.f32.xlu0 %v1343_v60  ;;  %1168 = vmax.xlane.f32.xlu2 %v1167_v24  ;;  %v4458_v60 = vadd.f32 %v4403_v10, %v4203_v47  ;;  %v4466_v24 = vadd.f32 %v4425_v27, %v4203_v47  ;;  %v4530_v47 = vadd.f32 %v4375_v59, %v4235_v54 }
 0x182   : > { %1209 = vmax.xlane.f32.xlu1 %v1208_v6  ;;  %v4470_v6 = vadd.f32 %v4430_v28, %v4220_v51  ;;  %v4534_v51 = vadd.f32 %v4356_v38, %v4346_v43  ;;  %v1745_v54 = vadd.f32 %v1744_v20, %v4334_v12  ;;  %6374 = vst [vmem:[#allocation31_spill] sm:$0xff] %v4549_v11  ;;  %v1794_v49 = vpop.f32.mrf.mxu3  ;;  %v1781_v20 = vpop.f32.mrf.mxu2 }
 0x183   : > { %v4564_v12 = vadd.f32 %v4387_v63, %v4326_v34  ;;  %6376 = vst [vmem:[#allocation33_spill] sm:$0xff] %v4568_v53  ;;  %v4588_v35 = vadd.f32 %v1781_v20, %v1732_v9  ;;  %v4606_v9 = vadd.f32 %v4317_v30, %v4344_v42  ;;  %v4610_v20 = vadd.f32 %v4322_v31, %v4346_v43 }
 0x184   : > { %6371 = vst [vmem:[#allocation28_spill] sm:$0xff] %v4534_v51  ;;  %v4616_v53 = vadd.f32 %v4363_v56, %v4358_v55  ;;  %v4620_v11 = vadd.f32 %v4368_v57, %v4375_v59  ;;  %v4624_v51 = vadd.f32 %v4252_v44, %v4344_v42 }
 0x185   : > { %6379 = vst [vmem:[#allocation36_spill] sm:$0xff] %v4586_v48  ;;  %v1746_v48 = vpop.f32.mrf.mxu1 }
 0x186   : > { %6382 = vst [vmem:[#allocation39_spill] sm:$0xff] %v4606_v9  ;;  %v4644_v48 = vadd.f32 %v4363_v56, %v4344_v42  ;;  %v4670_v9 = vadd.f32 %v4257_v45, %v4338_v41  ;;  %v4698_v56 = vadd.f32 %v4382_v62, %v4346_v43 }
 0x187   : > { %6383 = vst [vmem:[#allocation40_spill] sm:$0xff] %v4610_v20 }
 0x188   : > { %6388 = vst [vmem:[#allocation45_spill] sm:$0xff] %v4670_v9  ;;  %v4720_v9 = vadd.f32 %v4302_v23, %v4346_v43 }
 0x189   : > { %1083 = vmax.xlane.f32.xlu0 %v1082_v14  ;;  %1212 = vmax.xlane.f32.xlu2 %v1211_v16  ;;  %v4560_v14 = vadd.f32 %v1794_v49, %v1745_v54  ;;  %v4578_v49 = vadd.f32 %v4322_v31, %v4375_v59  ;;  %v4582_v54 = vadd.f32 %v4373_v58, %v4326_v34 }
 0x18a   : > { %1253 = vmax.xlane.f32.xlu1 %v1252_v18  ;;  %v4558_v18 = vadd.f32 %v4356_v38, %v4338_v41  ;;  %v4594_v16 = vadd.f32 %v4252_v44, %v4358_v55  ;;  %v1796_v20 = vpop.f32.mrf.mxu3  ;;  %6391 = vst [vmem:[#allocation48_spill] sm:$0xff] %v4698_v56  ;;  %v4741_v56 = vadd.f32 %v4392_v5, %v4346_v43 }
 0x18b   : > { %6377 = vst [vmem:[#allocation34_spill] sm:$0xff] %v4578_v49  ;;  %v1733_v49 = vpop.f32.mrf.mxu0  ;;  %v4666_v20 = vadd.f32 %v4252_v44, %v4326_v34  ;;  %v4710_v44 = vadd.f32 %v4420_v22, %v4338_v41 }
 0x18c   : > { %6375 = vst [vmem:[#allocation32_spill] sm:$0xff] %v4558_v18  ;;  %v4598_v18 = vadd.f32 %v4257_v45, %v4375_v59  ;;  %v4660_v49 = vadd.f32 %v4302_v23, %v4375_v59  ;;  %v4688_v45 = vadd.f32 %v4430_v28, %v4338_v41 }
 0x18d   : > { %6378 = vst [vmem:[#allocation35_spill] sm:$0xff] %v4582_v54  ;;  %v4648_v54 = vadd.f32 %v4368_v57, %v4346_v43  ;;  %v1783_v57 = vpop.f32.mrf.mxu2 }
 0x18e   : > { %6380 = vst [vmem:[#allocation37_spill] sm:$0xff] %v4594_v16  ;;  %v4638_v16 = vadd.f32 %v4382_v62, %v4375_v59  ;;  %v4694_v57 = vadd.f32 %v4373_v58, %v4344_v42  ;;  %v4737_v62 = vadd.f32 %v4387_v63, %v4344_v42 }
 0x18f   : > { %6381 = vst [vmem:[#allocation38_spill] sm:$0xff] %v4598_v18  ;;  %v4634_v18 = vadd.f32 %v4373_v58, %v4358_v55  ;;  %v4714_v58 = vadd.f32 %v4297_v21, %v4344_v42 }
 0x190   : > { %6384 = vst [vmem:[#allocation41_spill] sm:$0xff] %v4638_v16  ;;  %v4680_v16 = vadd.f32 %v4392_v5, %v4375_v59  ;;  %v4759_v5 = vadd.f32 %v4420_v22, %v4375_v59 }
 0x191   : > { %1095 = vmax.xlane.f32.xlu0 %v1094_v0  ;;  %1256 = vmax.xlane.f32.xlu2 %v1255_v40  ;;  %6385 = vst [vmem:[#allocation42_spill] sm:$0xff] %v4648_v54  ;;  %v4674_v40 = vadd.f32 %v4387_v63, %v4358_v55  ;;  %v4684_v0 = vadd.f32 %v4425_v27, %v4326_v34 }
 0x192   : > { %1300 = vmax.xlane.f32.xlu1 %v1299_v2  ;;  %v4656_v2 = vadd.f32 %v4297_v21, %v4358_v55  ;;  %6387 = vst [vmem:[#allocation44_spill] sm:$0xff] %v4660_v49  ;;  %v4702_v49 = vadd.f32 %v4403_v10, %v4326_v34  ;;  %v4728_v54 = vadd.f32 %v4302_v23, %v4338_v41 }
 0x193   : > { %6389 = vst [vmem:[#allocation46_spill] sm:$0xff] %v4684_v0  ;;  %v6395_v23 = vmax.f32 %v4458_v60, %v4462_v39  ;;  %v1896_v39 = vpop.f32.mrf.mxu3  ;;  %v4766_v60 = vadd.f32 %v4475_v15, %v4326_v34 }
 0x194   : > { %6386 = vst [vmem:[#allocation43_spill] sm:$0xff] %v4656_v2  ;;  %v4724_v2 = vadd.f32 %v4297_v21, %v4326_v34  ;;  %v4745_v21 = vadd.f32 %v4403_v10, %v4358_v55 }
 0x195   : > { %6390 = vst [vmem:[#allocation47_spill] sm:$0xff] %v4688_v45  ;;  %v6393_v45 = vmax.f32 %v4450_v36, %v4454_v37  ;;  %v1846_v36 = vpop.f32.mrf.mxu1  ;;  %v1883_v0 = vpop.f32.mrf.mxu2  ;;  %v4807_v37 = vadd.f32 %v4425_v27, %v4344_v42 }
 0x196   : > { %6392 = vst [vmem:[#allocation49_spill] sm:$0xff] %v4710_v44  ;;  %v1851_v63 = vadd.f32 %v1846_v36, %v4560_v14  ;;  %v1833_v44 = vpop.f32.mrf.mxu0  ;;  %v4777_v14 = vadd.f32 %v4403_v10, %v4344_v42  ;;  %v4781_v36 = vadd.f32 %v4420_v22, %v4346_v43  ;;  %v4797_v22 = vadd.f32 %v4475_v15, %v4358_v55 }
 0x197   : > { %6394 = vst [vmem:[#allocation50_spill] sm:$0xff] %v4741_v56  ;;  %v4787_v56 = vadd.f32 %v4425_v27, %v4358_v55  ;;  %v1088_v10 = vmax.f32 %v4520_v33, %v4530_v47  ;;  %v4825_v27 = vadd.f32 %v4486_v61, %v4346_v43  ;;  %v1152_v33 = vadd.f32 %v4272_v3, %v4326_v34 }
 0x198   : > { %6397 = vst [vmem:[#allocation51_spill] sm:$0xff] %v4777_v14  ;;  %v1153_v47 = vadd.f32 %v4277_v4, %v4338_v41 }
 0x199   : > { %1133 = vmax.xlane.f32.xlu0 %v6393_v45  ;;  %1341 = vmax.xlane.f32.xlu2 %v6395_v23  ;;  %v6396_v45 = vmax.f32 %v4466_v24, %v4470_v6  ;;  %v4770_v24 = vadd.f32 %v4486_v61, %v4338_v41  ;;  %v1850_v6 = vadd.f32 %v1833_v44, %v4588_v35 }
 0x19a   : > { %6398 = vst [vmem:[#allocation52_spill] sm:$0xff] %v4781_v36  ;;  %v1901_v23 = vadd.f32 %v1896_v39, %v1851_v63  ;;  %v4791_v44 = vadd.f32 %v4430_v28, %v4375_v59  ;;  %v4801_v63 = vadd.f32 %v4486_v61, %v4375_v59  ;;  %v1197_v36 = vadd.f32 %v4322_v31, %v4338_v41 }
 0x19b   : > { %1385 = vmax.xlane.f32.xlu1 %v6396_v45  ;;  %6399 = vst [vmem:[#allocation53_spill] sm:$0xff] %v4787_v56  ;;  %v1900_v35 = vadd.f32 %v1883_v0, %v1850_v6  ;;  %v4811_v0 = vadd.f32 %v4430_v28, %v4346_v43  ;;  %v4815_v6 = vadd.f32 %v4475_v15, %v4344_v42 }
 0x19c   : > { %6400 = vst [vmem:[#allocation54_spill] sm:$0xff] %v4791_v44  ;;  %v1387_v45 = vmax.f32 %v4512_v29, %v4516_v32  ;;  %v6407_v28 = vmax.f32 %v4490_v7, %v4494_v8  ;;  %v1067_v7 = vadd.f32 %v4338_v41, %v4225_v52  ;;  %v1075_v8 = vadd.f32 %v4346_v43, %v4225_v52 }
 0x19d   : > { %6401 = vst [vmem:[#allocation55_spill] sm:$0xff] %v4797_v22  ;;  %v1848_v29 = vpop.f32.mrf.mxu1 }
 0x19e   : > { %6402 = vst [vmem:[#allocation56_spill] sm:$0xff] %v4801_v63  ;;  %v1835_v39 = vpop.f32.mrf.mxu0  ;;  %v1898_v63 = vpop.f32.mrf.mxu3  ;;  %v1170_v29 = vmax.f32 %v1152_v33, %v1153_v47  ;;  %v1071_v33 = vadd.f32 %v4375_v59, %v4225_v52  ;;  %v1108_v47 = vadd.f32 %v4262_v1, %v4326_v34 }
 0x19f   : > { %6403 = vst [vmem:[#allocation57_spill] sm:$0xff] %v4807_v37  ;;  %v1158_v39 = vadd.f32 %v4307_v25, %v4358_v55 }
 0x1a0   : > { %6404 = vst [vmem:[#allocation58_spill] sm:$0xff] %v4811_v0 }
 0x1a1   : > { %6405 = vst [vmem:[#allocation59_spill] sm:$0xff] %v4815_v6  ;;  %1142 = vmax.xlane.f32.xlu0 %v6407_v28  ;;  %1388 = vmax.xlane.f32.xlu2 %v1387_v45  ;;  %v1066_v28 = vadd.f32 %v4326_v34, %v4218_v50  ;;  %v1885_v45 = vpop.f32.mrf.mxu2  ;;  %v1070_v6 = vadd.f32 %v4358_v55, %v4218_v50 }
 0x1a2   : > { %6406 = vst [vmem:[#allocation60_spill] sm:$0xff] %v4825_v27  ;;  %v1159_v27 = vadd.f32 %v4312_v26, %v4375_v59 }
 0x1a3   : > { %1089 = vmax.xlane.f32.xlu1 %v1088_v10  ;;  %v1074_v10 = vadd.f32 %v4344_v42, %v4218_v50  ;;  %v1085_v32 = vmax.f32 %v1066_v28, %v1067_v7  ;;  %v1091_v22 = vmax.f32 %v1070_v6, %v1071_v33 }
 0x1a5   : > { %v1097_v44 = vmax.f32 %v1074_v10, %v1075_v8  ;;  %v1948_v63 = vpop.f32.mrf.mxu1 }
 0x1a6   : > { %v1953_v0 = vadd.f32 %v1948_v63, %v1901_v23  ;;  %v1935_v37 = vpop.f32.mrf.mxu0  ;;  %v2000_v7 = vpop.f32.mrf.mxu3  ;;  %v1196_v63 = vadd.f32 %v4317_v30, %v4326_v34 }
 0x1a7   : > { %v1952_v28 = vadd.f32 %v1935_v37, %v1900_v35  ;;  %v6409_v37 = vld [vmem:[#allocation7_spill] sm:$0xff] }
 0x1a8   : > { %v2005_v8 = vadd.f32 %v2000_v7, %v1953_v0  ;;  %v1110_v35 = vadd.f32 %v6409_v37, %v4326_v34  ;;  %v6410_v0 = vld [vmem:[#allocation8_spill] sm:$0xff] }
 0x1a9   : > { %1171 = vmax.xlane.f32.xlu0 %v1170_v29  ;;  %1086 = vmax.xlane.f32.xlu2 %v1085_v32  ;;  %v1987_v10 = vpop.f32.mrf.mxu2  ;;  %v1179_v29 = vmax.f32 %v1158_v39, %v1159_v27  ;;  %v1114_v27 = vadd.f32 %v6409_v37, %v4358_v55  ;;  %v1214_v39 = vmax.f32 %v1196_v63, %v1197_v36 }
 0x1aa   : > { %v2004_v45 = vadd.f32 %v1987_v10, %v1952_v28  ;;  %v1111_v28 = vadd.f32 %v6410_v0, %v4338_v41 }
 0x1ab   : > { %1098 = vmax.xlane.f32.xlu1 %v1097_v44  ;;  %v6408_v44 = vld [vmem:[#allocation13_spill] sm:$0xff] }
 0x1ac   : > { %v1109_v32 = vadd.f32 %v6408_v44, %v4338_v41  ;;  %v1129_v30 = vmax.f32 %v1110_v35, %v1111_v28  ;;  %v1117_v36 = vadd.f32 %v6408_v44, %v4346_v43 }
 0x1ad   : > { %v1950_v23 = vpop.f32.mrf.mxu1 }
 0x1ae   : > { %v1126_v56 = vmax.f32 %v1108_v47, %v1109_v32  ;;  %v1937_v14 = vpop.f32.mrf.mxu0  ;;  %v1203_v47 = vadd.f32 %v4356_v38, %v4375_v59  ;;  %v1116_v32 = vadd.f32 %v4262_v1, %v4344_v42  ;;  %v1155_v23 = vadd.f32 %v4312_v26, %v4338_v41 }
 0x1af   : > { %v1202_v14 = vadd.f32 %v4351_v46, %v4358_v55 }
 0x1b1   : > { %1180 = vmax.xlane.f32.xlu0 %v1179_v29  ;;  %1092 = vmax.xlane.f32.xlu2 %v1091_v22  ;;  %v2002_v22 = vpop.f32.mrf.mxu3  ;;  %v1989_v6 = vpop.f32.mrf.mxu2  ;;  %v1154_v29 = vadd.f32 %v4307_v25, %v4326_v34 }
 0x1b2   : > { %v1223_v22 = vmax.f32 %v1202_v14, %v1203_v47  ;;  %v1138_v6 = vmax.f32 %v1116_v32, %v1117_v36  ;;  %v1156_v14 = vadd.f32 %v4272_v3, %v4358_v55  ;;  %v1157_v47 = vadd.f32 %v4277_v4, %v4375_v59  ;;  %v6414_v55 = vld [vmem:[#allocation28_spill] sm:$0xff] }
 0x1b3   : > { %1127 = vmax.xlane.f32.xlu1 %v1126_v56  ;;  %v1115_v56 = vadd.f32 %v6410_v0, %v4375_v59  ;;  %v1160_v32 = vadd.f32 %v4272_v3, %v4344_v42  ;;  %v6416_v59 = vld [vmem:[#allocation29_spill] sm:$0xff] }
 0x1b5   : > { %v1135_v33 = vmax.f32 %v1114_v27, %v1115_v56  ;;  %v2052_v31 = vpop.f32.mrf.mxu1 }
 0x1b6   : > { %v2057_v7 = vadd.f32 %v2052_v31, %v2005_v8  ;;  %v2039_v10 = vpop.f32.mrf.mxu0 }
 0x1b7   : > { %v2056_v63 = vadd.f32 %v2039_v10, %v2004_v45 }
 0x1b9   : > { %1215 = vmax.xlane.f32.xlu0 %v1214_v39  ;;  %1130 = vmax.xlane.f32.xlu2 %v1129_v30  ;;  %v2104_v35 = vpop.f32.mrf.mxu3  ;;  %v2091_v28 = vpop.f32.mrf.mxu2  ;;  %v1173_v39 = vmax.f32 %v1154_v29, %v1155_v23  ;;  %v1176_v29 = vmax.f32 %v1156_v14, %v1157_v47  ;;  %v6426_v14 = vld [vmem:[#allocation35_spill] sm:$0xff]  ;;  %v6427_v47 = vld [vmem:[#allocation36_spill] sm:$0xff] }
 0x1ba   : > { %v2109_v27 = vadd.f32 %v2104_v35, %v2057_v7  ;;  %v2108_v56 = vadd.f32 %v2091_v28, %v2056_v63  ;;  %v1161_v7 = vadd.f32 %v4277_v4, %v4346_v43  ;;  %v6411_v63 = vld [vmem:[#allocation26_spill] sm:$0xff]  ;;  %v6412_v35 = vld [vmem:[#allocation27_spill] sm:$0xff]  ;;  %v6420_v43 = vld [vmem:[#allocation32_spill] sm:$0xff] }
 0x1bb   : > { %1136 = vmax.xlane.f32.xlu1 %v1135_v33  ;;  %v6413_v28 = vmax.f32 %v6411_v63, %v6412_v35  ;;  %v6436_v63 = vld [vmem:[#allocation3_spill] sm:$0xff] }
 0x1bc   : > { %v2112_v30 = vrot.slane %v2109_v27, 7  ;;  %v1182_v23 = vmax.f32 %v1160_v32, %v1161_v7  ;;  %v6415_v27 = vmax.f32 %v4526_v17, %v6414_v55  ;;  %v6428_v17 = vmax.f32 %v6426_v14, %v6427_v47  ;;  %v6429_v32 = vld [vmem:[#allocation37_spill] sm:$0xff]  ;;  %v6430_v7 = vld [vmem:[#allocation38_spill] sm:$0xff] }
 0x1bd   : > { %v2054_v45 = vpop.f32.mrf.mxu1  ;;  %v4933_v35 = vadd.s32 4294967288, %v6436_v63  ;;  %v4968_v47 = vadd.s32 4294967256, %v6436_v63 }
 0x1be   : > { %v4883_v8 = vsel %vm1033_vm10, %v2108_v56, %v2112_v30  ;;  %v4886_v34 = vsel %vm1035_vm11, %v2108_v56, %v2112_v30  ;;  %v4889_v41 = vsel %vm1038_vm13, %v2108_v56, %v2112_v30  ;;  %v4892_v33 = vsel %vm1041_vm12, %v2108_v56, %v2112_v30  ;;  %v2041_v31 = vpop.f32.mrf.mxu0  ;;  %v6417_v56 = vld [vmem:[#allocation30_spill] sm:$0xff] }
 0x1bf   : > { %v6418_v42 = vmax.f32 %v6416_v59, %v6417_v56  ;;  %v6424_v45 = vld [vmem:[#allocation34_spill] sm:$0xff]  ;;  %vm1554_vm10 = vcmask 786112  }
 0x1c0   : > { %v6425_v31 = vmax.f32 %v4572_v19, %v6424_v45  ;;  %v6443_v45 = vld [vmem:[#allocation43_spill] sm:$0xff] }
 0x1c1   : > { %1224 = vmax.xlane.f32.xlu0 %v1223_v22  ;;  %1139 = vmax.xlane.f32.xlu2 %v1138_v6  ;;  %v2106_v10 = vpop.f32.mrf.mxu3  ;;  %v2093_v36 = vpop.f32.mrf.mxu2  ;;  %v6419_v22 = vld [vmem:[#allocation31_spill] sm:$0xff] }
 0x1c2   : > { %v6421_v6 = vmax.f32 %v6419_v22, %v6420_v43  ;;  %v6431_v10 = vmax.f32 %v6429_v32, %v6430_v7  ;;  %v6432_v36 = vld [vmem:[#allocation39_spill] sm:$0xff]  ;;  %v6440_v22 = vld [vmem:[#allocation42_spill] sm:$0xff] }
 0x1c3   : > { %1174 = vmax.xlane.f32.xlu1 %v1173_v39  ;;  %v6422_v39 = vld [vmem:[#allocation33_spill] sm:$0xff]  ;;  %v6441_v43 = vmax.f32 %v4644_v48, %v6440_v22  ;;  %v6448_v48 = vmax.f32 %v4674_v40, %v4680_v16  ;;  %v4981_v16 = vadd.s32 4294967248, %v6436_v63  ;;  %v6452_v40 = vld [vmem:[#allocation48_spill] sm:$0xff]  ;;  %v4995_v22 = vperm.slane %v4883_v8, 0 }
 0x1c4   : > { %v6423_v30 = vmax.f32 %v4564_v12, %v6422_v39  ;;  %v6435_v12 = vmax.f32 %v4616_v53, %v4620_v11  ;;  %v6438_v11 = vld [vmem:[#allocation41_spill] sm:$0xff] }
 0x1c5   : > { %v6439_v53 = vmax.f32 %v4634_v18, %v6438_v11 }
 0x1c9   : > { %1259 = vmax.xlane.f32.xlu0 %v6413_v28  ;;  %1177 = vmax.xlane.f32.xlu2 %v1176_v29  ;;  %v6433_v29 = vld [vmem:[#allocation40_spill] sm:$0xff] }
 0x1cb   : > { %1183 = vmax.xlane.f32.xlu1 %v1182_v23  ;;  %v6434_v23 = vmax.f32 %v6432_v36, %v6433_v29 }
 0x1d1   : > { %1230 = vmax.xlane.f32.xlu0 %v6415_v27  ;;  %1186 = vmax.xlane.f32.xlu2 %v6418_v42  ;;  %v6437_v42 = vmax.f32 %v4624_v51, %v4630_v13  ;;  %v4959_v13 = vadd.s32 4294967264, %v6436_v63  ;;  %v6446_v51 = vld [vmem:[#allocation45_spill] sm:$0xff] }
 0x1d2   : > { %v6447_v18 = vmax.f32 %v4666_v20, %v6446_v51  ;;  %v6449_v20 = vld [vmem:[#allocation46_spill] sm:$0xff] }
 0x1d3   : > { %1218 = vmax.xlane.f32.xlu1 %v6421_v6  ;;  %v6459_v51 = vld [vmem:[#allocation50_spill] sm:$0xff] }
 0x1d9   : > { %1306 = vmax.xlane.f32.xlu0 %v6423_v30  ;;  %1221 = vmax.xlane.f32.xlu2 %v6425_v31  ;;  %v6444_v31 = vld [vmem:[#allocation44_spill] sm:$0xff] }
 0x1da   : > { %v6445_v14 = vmax.f32 %v6443_v45, %v6444_v31  ;;  %v6456_v45 = vmax.f32 %v4714_v58, %v4720_v9  ;;  %v5009_v31 = vadd.s32 4294967232, %v6436_v63  ;;  %v6462_v58 = vld [vmem:[#allocation9_spill] sm:$0xff] }
 0x1db   : > { %1262 = vmax.xlane.f32.xlu1 %v6428_v17  ;;  %v2136_v9 = vadd.f32 %v4995_v22, %v6462_v58 }
 0x1dc   : > { %6457 = vst [vmem:[#allocation7_spill] sm:$0xff] %v5009_v31 }
 0x1e1   : > { %1309 = vmax.xlane.f32.xlu0 %v6431_v10  ;;  %1227 = vmax.xlane.f32.xlu2 %v6434_v23  ;;  %v6450_v23 = vld [vmem:[#allocation47_spill] sm:$0xff] }
 0x1e3   : > { %1265 = vmax.xlane.f32.xlu1 %v6435_v12  ;;  %v6451_v12 = vmax.f32 %v6449_v20, %v6450_v23 }
 0x1e4   : > { %v4935_v19 = vpop.xlane.xlu0 %1124  ;;  %v1081_v28 = vpop.xlane.xlu2 %1080 }
 0x1e5   : > { %v1078_v55 = vpop.xlane.xlu1 %1077  ;;  %v1418_v27 = vperm.slane %v1081_v28, %v4933_v35  ;;  %v6453_v28 = vmax.f32 %v4694_v57, %v6452_v40  ;;  %v2115_v40 = vrot.slane %v4886_v34, 1  ;;  %v5056_v34 = vadd.s32 4294967200, %v6436_v63 }
 0x1e6   : > { %v1416_v59 = vperm.slane %v1078_v55, %v6436_v63  ;;  %v6454_v55 = vld [vmem:[#allocation49_spill] sm:$0xff] }
 0x1e7   : > { %6470 = vst [vmem:[#allocation30_spill] sm:$0xff] %v5056_v34 }
 0x1e8   : > { %v4940_v56 = vsel %vm1419_vm14, %v1418_v27, %v1416_v59  ;;  %v6455_v27 = vmax.f32 %v4702_v49, %v6454_v55  ;;  %v4990_v59 = vadd.s32 4294967240, %v6436_v63 }
 0x1e9   : > { %1315 = vmax.xlane.f32.xlu0 %v6437_v42  ;;  %1268 = vmax.xlane.f32.xlu2 %v6439_v53 }
 0x1eb   : > { %1271 = vmax.xlane.f32.xlu1 %v6441_v43 }
 0x1ec   : > { %v4951_v6 = vpop.xlane.xlu0 %1297  ;;  %v4953_v39 = vpop.xlane.xlu2 %1121 }
 0x1ed   : > { %6442 = vst [vmem:[#allocation13_spill] sm:$0xff] %v4951_v6  ;;  %v1166_v30 = vpop.xlane.xlu1 %1165  ;;  %v6488_v6 = vld [vmem:[#allocation20_spill] sm:$0xff] }
 0x1ee   : > { %v1470_v10 = vperm.slane %v1166_v30, %v4959_v13  ;;  %v5000_v30 = vperm.slane %v4883_v8, 1  ;;  %v5018_v8 = vadd.s32 4294967224, %v6436_v63 }
 0x1f0   : > { %6461 = vst [vmem:[#allocation8_spill] sm:$0xff] %v5018_v8 }
 0x1f1   : > { %1356 = vmax.xlane.f32.xlu0 %v6445_v14  ;;  %1303 = vmax.xlane.f32.xlu2 %v6447_v18  ;;  %v6458_v14 = vmax.f32 %v4724_v2, %v4728_v54  ;;  %v6460_v18 = vmax.f32 %v4737_v62, %v6459_v51  ;;  %v5030_v54 = vadd.f32 %v5000_v30, %v4486_v61  ;;  %v5077_v51 = vadd.s32 4294967280, %v6436_v63 }
 0x1f3   : > { %1312 = vmax.xlane.f32.xlu1 %v6448_v48  ;;  %v5022_v48 = vadd.f32 %v4995_v22, %v4475_v15  ;;  %6464 = vst [vmem:[#allocation26_spill] sm:$0xff] %v5030_v54 }
 0x1f4   : > { %v4970_v17 = vpop.xlane.xlu0 %1344  ;;  %v1169_v32 = vpop.xlane.xlu2 %1168 }
 0x1f5   : > { %v1210_v7 = vpop.xlane.xlu1 %1209  ;;  %v1472_v36 = vperm.slane %v1169_v32, %v4968_v47  ;;  %v6463_v32 = vld [vmem:[#allocation10_spill] sm:$0xff] }
 0x1f6   : > { %v1497_v43 = vperm.slane %v1210_v7, %v4981_v16  ;;  %v2137_v7 = vadd.f32 %v5000_v30, %v6463_v32  ;;  %v2139_v32 = vadd.f32 %v5000_v30, %v4225_v52 }
 0x1f7   : > { %v4975_v29 = vsel %vm1473_vm15, %v1472_v36, %v1470_v10  ;;  %v6485_v36 = vld [vmem:[#allocation54_spill] sm:$0xff] }
 0x1f9   : > { %1391 = vmax.xlane.f32.xlu0 %v6451_v12  ;;  %1274 = vmax.xlane.f32.xlu2 %v6453_v28  ;;  %v2152_v12 = vmax.f32 %v2136_v9, %v2137_v7  ;;  %v2117_v28 = vrot.slane %v4889_v41, 2  ;;  %v2216_v41 = vadd.f32 %v4995_v22, %v4272_v3  ;;  %v2138_v9 = vadd.f32 %v4995_v22, %v4218_v50 }
 0x1fb   : > { %1347 = vmax.xlane.f32.xlu1 %v6455_v27  ;;  %v2119_v27 = vrot.slane %v4892_v33, 3  ;;  %v2217_v33 = vadd.f32 %v5000_v30, %v4277_v4 }
 0x1fc   : > { %v4992_v42 = vpop.xlane.xlu0 %1083  ;;  %v1213_v11 = vpop.xlane.xlu2 %1212 }
 0x1fd   : > { %v1254_v53 = vpop.xlane.xlu1 %1253  ;;  %v1499_v57 = vperm.slane %v1213_v11, %v4990_v59  ;;  %v5047_v11 = vadd.s32 4294967192, %v6436_v63  ;;  %v2232_v7 = vmax.f32 %v2216_v41, %v2217_v33  ;;  %v6478_v41 = vld [vmem:[#allocation19_spill] sm:$0xff] }
 0x1fe   : > { %v1524_v20 = vperm.slane %v1254_v53, %v5009_v31  ;;  %v6469_v53 = vmax.f32 %v4766_v60, %v4770_v24  ;;  %v5072_v60 = vperm.slane %v2119_v27, 0  ;;  %v5074_v24 = vperm.slane %v2119_v27, 1 }
 0x1ff   : > { %v5003_v49 = vsel %vm1500_vm0, %v1499_v57, %v1497_v43  ;;  %6467 = vst [vmem:[#allocation29_spill] sm:$0xff] %v5047_v11  ;;  %v6468_v43 = vmax.f32 %v4745_v21, %v4759_v5  ;;  %v5062_v57 = vperm.slane %v2115_v40, 0  ;;  %v5068_v21 = vperm.slane %v2117_v28, 1 }
 0x201   : > { %1362 = vmax.xlane.f32.xlu0 %v6456_v45  ;;  %1350 = vmax.xlane.f32.xlu2 %v6458_v14  ;;  %v5064_v45 = vperm.slane %v2115_v40, 1  ;;  %v5066_v14 = vperm.slane %v2117_v28, 0  ;;  %v5092_v40 = vadd.f32 %v4995_v22, %v6409_v37  ;;  %v5099_v50 = vadd.f32 %v5062_v57, %v4351_v46  ;;  %v6476_v28 = vld [vmem:[#allocation18_spill] sm:$0xff] }
 0x202   : > { %v5107_v27 = vadd.f32 %v5062_v57, %v6476_v28  ;;  %v5111_v37 = vadd.f32 %v5000_v30, %v6410_v0  ;;  %v6481_v0 = vld [vmem:[#allocation51_spill] sm:$0xff] }
 0x203   : > { %1318 = vmax.xlane.f32.xlu1 %v6460_v18  ;;  %v1580_v18 = vperm.slane %v4970_v17, %v5047_v11  ;;  %6474 = vst [vmem:[#allocation32_spill] sm:$0xff] %v5099_v50  ;;  %v5103_v52 = vadd.f32 %v5064_v45, %v4356_v38  ;;  %v5123_v33 = vadd.f32 %v5064_v45, %v6478_v41 }
 0x204   : > { %v5032_v2 = vpop.xlane.xlu0 %1095  ;;  %v1257_v62 = vpop.xlane.xlu2 %1256  ;;  %6477 = vst [vmem:[#allocation34_spill] sm:$0xff] %v5107_v27 }
 0x205   : > { %v5034_v10 = vpop.xlane.xlu1 %1300  ;;  %v1526_v23 = vperm.slane %v1257_v62, %v5018_v8  ;;  %v6471_v62 = vld [vmem:[#allocation16_spill] sm:$0xff]  ;;  %6475 = vst [vmem:[#allocation33_spill] sm:$0xff] %v5103_v52  ;;  %v5179_v52 = vadd.f32 %v4995_v22, %v4307_v25  ;;  %v1427_v50 = vperm.slane %v5032_v2, %v6436_v63 }
 0x206   : > { %6465 = vst [vmem:[#allocation27_spill] sm:$0xff] %v5034_v10  ;;  %v6489_v10 = vld [vmem:[#allocation21_spill] sm:$0xff] }
 0x207   : > { %v5043_v55 = vsel %vm1527_vm3, %v1526_v23, %v1524_v20  ;;  %v2296_v20 = vadd.f32 %v4995_v22, %v6471_v62  ;;  %v6472_v23 = vld [vmem:[#allocation17_spill] sm:$0xff]  ;;  %6479 = vst [vmem:[#allocation35_spill] sm:$0xff] %v5123_v33 }
 0x208   : > { %6466 = vst [vmem:[#allocation28_spill] sm:$0xff] %v5043_v55  ;;  %v5147_v55 = vadd.f32 %v5000_v30, %v6489_v10 }
 0x209   : > { %2153 = vmax.xlane.f32.xlu0 %v2152_v12  ;;  %1353 = vmax.xlane.f32.xlu2 %v6468_v43  ;;  %v2297_v12 = vadd.f32 %v5000_v30, %v6472_v23  ;;  %v5115_v43 = vadd.f32 %v4995_v22, %v4262_v1  ;;  %v6484_v1 = vld [vmem:[#allocation53_spill] sm:$0xff] }
 0x20b   : > { %1394 = vmax.xlane.f32.xlu1 %v6469_v53  ;;  %v5119_v53 = vadd.f32 %v5000_v30, %v6408_v44  ;;  %v5137_v44 = vadd.s32 4294967176, %v6436_v63  ;;  %v2312_v11 = vmax.f32 %v2296_v20, %v2297_v12  ;;  %v5187_v12 = vadd.f32 %v5000_v30, %v4312_v26 }
 0x20c   : > { %v5070_v5 = vpop.xlane.xlu0 %1133  ;;  %v1342_v3 = vpop.xlane.xlu2 %1341  ;;  %v5208_v26 = vadd.f32 %v5068_v21, %v6478_v41 }
 0x20d   : > { %v1578_v58 = vperm.slane %v1342_v3, %v5056_v34  ;;  %6487 = vst [vmem:[#allocation37_spill] sm:$0xff] %v5137_v44  ;;  %v2155_v34 = vmax.f32 %v2138_v9, %v2139_v32  ;;  %v5143_v3 = vadd.f32 %v4995_v22, %v6488_v6  ;;  %v5159_v9 = vadd.f32 %v5000_v30, %v4356_v38 }
 0x20e   : > { %v1386_v4 = vpop.xlane.xlu1 %1385  ;;  %v5163_v32 = vadd.f32 %v5062_v57, %v6471_v62  ;;  %v2192_v38 = vmax.f32 %v5115_v43, %v5119_v53  ;;  %6496 = vst [vmem:[#allocation41_spill] sm:$0xff] %v5208_v26  ;;  %v6500_v53 = vld [vmem:[#allocation55_spill] sm:$0xff]  ;;  %v6515_v26 = vld [vmem:[#allocation14_spill] sm:$0xff] }
 0x20f   : > { %v5095_v17 = vsel %vm1581_vm4, %v1580_v18, %v1578_v58  ;;  %v5128_v18 = vadd.s32 4294967184, %v6436_v63  ;;  %v6482_v58 = vld [vmem:[#allocation52_spill] sm:$0xff]  ;;  %v2355_v20 = vmax.f32 %v5143_v3, %v5147_v55  ;;  %v5204_v55 = vadd.f32 %v5066_v14, %v6476_v28 }
 0x210   : > { %6473 = vst [vmem:[#allocation31_spill] sm:$0xff] %v5095_v17  ;;  %v6486_v17 = vmax.f32 %v6484_v1, %v6485_v36  ;;  %v1421_v3 = vperm.slane %v4992_v42, %v6436_v63 }
 0x211   : > { %2233 = vmax.xlane.f32.xlu0 %v2232_v7  ;;  %6480 = vst [vmem:[#allocation36_spill] sm:$0xff] %v5128_v18  ;;  %v6483_v7 = vmax.f32 %v6481_v0, %v6482_v58  ;;  %v5167_v58 = vadd.f32 %v5064_v45, %v6472_v23  ;;  %v1605_v0 = vperm.slane %v1386_v4, %v5128_v18  ;;  %v6493_v4 = vld [vmem:[#allocation25_spill] sm:$0xff] }
 0x212   : > { %6490 = vst [vmem:[#allocation38_spill] sm:$0xff] %v5163_v32  ;;  %v5195_v43 = vadd.f32 %v5000_v30, %v6493_v4 }
 0x213   : > { %1359 = vmax.xlane.f32.xlu2 %v6483_v7  ;;  %1397 = vmax.xlane.f32.xlu1 %v6486_v17  ;;  %v5155_v17 = vadd.f32 %v4995_v22, %v4351_v46  ;;  %6491 = vst [vmem:[#allocation39_spill] sm:$0xff] %v5167_v58  ;;  %v2195_v46 = vmax.f32 %v5092_v40, %v5111_v37  ;;  %v6492_v40 = vld [vmem:[#allocation24_spill] sm:$0xff] }
 0x214   : > { %v5151_v36 = vpop.xlane.xlu0 %1142  ;;  %v1389_v7 = vpop.xlane.xlu2 %1388  ;;  %v5191_v37 = vadd.f32 %v4995_v22, %v6492_v40  ;;  %6495 = vst [vmem:[#allocation3_spill] sm:$0xff] %v5204_v55  ;;  %v6501_v58 = vld [vmem:[#allocation56_spill] sm:$0xff]  ;;  %v6507_v55 = vld [vmem:[#allocation23_spill] sm:$0xff] }
 0x215   : > { %v1607_v62 = vperm.slane %v1389_v7, %v5137_v44  ;;  %v6497_v7 = vld [vmem:[#allocation11_spill] sm:$0xff]  ;;  %v6502_v32 = vmax.f32 %v6500_v53, %v6501_v58  ;;  %v6506_v58 = vld [vmem:[#allocation22_spill] sm:$0xff]  ;;  %v5257_v44 = vadd.f32 %v5064_v45, %v6507_v55 }
 0x216   : > { %v5169_v1 = vpop.xlane.xlu1 %1089  ;;  %v5214_v23 = vadd.f32 %v4995_v22, %v6497_v7  ;;  %v5241_v18 = vadd.f32 %v5062_v57, %v6497_v7  ;;  %v5249_v53 = vadd.f32 %v5062_v57, %v6506_v58 }
 0x217   : > { %v5198_v25 = vsel %vm1608_vm5, %v1607_v62, %v1605_v0  ;;  %v5218_v0 = vadd.f32 %v5066_v14, %v6488_v6  ;;  %v5222_v62 = vadd.f32 %v5068_v21, %v6489_v10 }
 0x218   : > { %6494 = vst [vmem:[#allocation40_spill] sm:$0xff] %v5198_v25  ;;  %v5235_v25 = vadd.f32 %v5064_v45, %v6489_v10 }
 0x219   : > { %2313 = vmax.xlane.f32.xlu0 %v2312_v11  ;;  %6498 = vst [vmem:[#allocation42_spill] sm:$0xff] %v5218_v0  ;;  %v5231_v11 = vadd.f32 %v5062_v57, %v6488_v6 }
 0x21a   : > { %6499 = vst [vmem:[#allocation43_spill] sm:$0xff] %v5222_v62  ;;  %v5261_v62 = vadd.f32 %v5066_v14, %v6497_v7 }
 0x21b   : > { %1400 = vmax.xlane.f32.xlu2 %v6502_v32  ;;  %2156 = vmax.xlane.f32.xlu1 %v2155_v34  ;;  %6503 = vst [vmem:[#allocation44_spill] sm:$0xff] %v5231_v11  ;;  %v6505_v32 = vld [vmem:[#allocation12_spill] sm:$0xff]  ;;  %v5277_v11 = vadd.f32 %v5074_v24, %v6478_v41  ;;  %v5293_v41 = vadd.f32 %v5074_v24, %v6489_v10 }
 0x21c   : > { %6504 = vst [vmem:[#allocation45_spill] sm:$0xff] %v5235_v25  ;;  %v5245_v34 = vadd.f32 %v5064_v45, %v6505_v32  ;;  %v5251_v42 = vpop.xlane.xlu0 %1171  ;;  %v5265_v0 = vadd.f32 %v5068_v21, %v6505_v32  ;;  %v1087_v33 = vpop.xlane.xlu2 %1086  ;;  %v5273_v25 = vadd.f32 %v5072_v60, %v6476_v28  ;;  %v5289_v28 = vadd.f32 %v5072_v60, %v6488_v6 }
 0x21d   : > { %6508 = vst [vmem:[#allocation46_spill] sm:$0xff] %v5261_v62  ;;  %v1422_v8 = vperm.slane %v1087_v33, %v4933_v35  ;;  %v5303_v54 = vadd.f32 %v5074_v24, %v6505_v32  ;;  %v5307_v6 = vadd.f32 %v5062_v57, %v6515_v26  ;;  %v5354_v32 = vadd.f32 %v5066_v14, %v6492_v40 }
 0x21e   : > { %6509 = vst [vmem:[#allocation47_spill] sm:$0xff] %v5265_v0  ;;  %v1099_v27 = vpop.xlane.xlu1 %1098  ;;  %v1424_v0 = vperm.slane %v5169_v1, %v6436_v63  ;;  %v5391_v1 = vadd.f32 %v5072_v60, %v4475_v15 }
 0x21f   : > { %6510 = vst [vmem:[#allocation48_spill] sm:$0xff] %v5273_v25  ;;  %v1428_v31 = vperm.slane %v1099_v27, %v4933_v35  ;;  %v5297_v27 = vadd.f32 %v5072_v60, %v6497_v7  ;;  %v1423_v33 = vsel %vm1419_vm14, %v1422_v8, %v1421_v3  ;;  %v5332_v3 = vadd.f32 %v5066_v14, %v6515_v26 }
 0x220   : > { %6511 = vst [vmem:[#allocation49_spill] sm:$0xff] %v5277_v11  ;;  %v1430_v10 = vsel %vm1035_vm11, %v1423_v33, %v4940_v56  ;;  %v6517_v11 = vld [vmem:[#allocation15_spill] sm:$0xff]  ;;  %v2235_v25 = vmax.f32 %v5179_v52, %v5187_v12  ;;  %v2432_v7 = vmax.f32 %v5191_v37, %v5195_v43  ;;  %v5379_v52 = vadd.f32 %v5064_v45, %v6493_v4 }
 0x221   : > { %6512 = vst [vmem:[#allocation50_spill] sm:$0xff] %v5293_v41  ;;  %v1429_v2 = vsel %vm1419_vm14, %v1428_v31, %v1427_v50  ;;  %2356 = vmax.xlane.f32.xlu0 %v2355_v20  ;;  %v5315_v8 = vadd.f32 %v5064_v45, %v6517_v11  ;;  %v5319_v31 = vadd.f32 %v5062_v57, %v4475_v15  ;;  %v5322_v50 = vadd.s32 4294967272, %v6436_v63 }
 0x222   : > { %6513 = vst [vmem:[#allocation9_spill] sm:$0xff] %v5297_v27  ;;  %v5328_v20 = vadd.f32 %v5064_v45, %v4486_v61  ;;  %v5338_v33 = vadd.f32 %v5068_v21, %v6517_v11  ;;  %v5383_v12 = vadd.f32 %v5072_v60, %v6506_v58  ;;  %v5387_v37 = vadd.f32 %v5074_v24, %v6507_v55 }
 0x223   : > { %6514 = vst [vmem:[#allocation10_spill] sm:$0xff] %v5303_v54  ;;  %2196 = vmax.xlane.f32.xlu2 %v2195_v46  ;;  %2193 = vmax.xlane.f32.xlu1 %v2192_v38  ;;  %v5342_v46 = vadd.f32 %v5066_v14, %v6506_v58  ;;  %v5346_v38 = vadd.f32 %v5068_v21, %v6507_v55 }
 0x224   : > { %6516 = vst [vmem:[#allocation16_spill] sm:$0xff] %v5307_v6  ;;  %v5348_v56 = vpop.xlane.xlu0 %1180  ;;  %v5362_v6 = vadd.f32 %v5062_v57, %v6492_v40  ;;  %v1093_v54 = vpop.xlane.xlu2 %1092  ;;  %v5402_v58 = vadd.f32 %v5072_v60, %v6515_v26  ;;  %v5406_v55 = vadd.f32 %v5074_v24, %v6517_v11  ;;  %v6531_v11 = vmax.f32 %v5155_v17, %v5159_v9  ;;  %v5439_v17 = vld [vmem:[%s6209_s7 + $0x18] sm:$0xff] }
 0x225   : > { %6518 = vst [vmem:[#allocation17_spill] sm:$0xff] %v5315_v8  ;;  %v5358_v8 = vadd.f32 %v5068_v21, %v6493_v4  ;;  %v1425_v62 = vperm.slane %v1093_v54, %v4933_v35  ;;  %v5395_v54 = vadd.f32 %v5074_v24, %v4486_v61  ;;  %v2143_v9 = vadd.f32 %v5439_v17, %v5064_v45 }
 0x226   : > { %6519 = vst [vmem:[#allocation18_spill] sm:$0xff] %v5319_v31  ;;  %v1128_v27 = vpop.xlane.xlu1 %1127  ;;  %v6535_v31 = vperm.slane %v4953_v39, %v5077_v51  ;;  %v5494_v39 = vld [vmem:[%s6209_s7 + $0x20] sm:$0xff] }
 0x227   : > { %6520 = vst [vmem:[#allocation19_spill] sm:$0xff] %v5328_v20  ;;  %v1426_v43 = vsel %vm1419_vm14, %v1425_v62, %v1424_v0  ;;  %v5415_v62 = vadd.f32 %v5066_v14, %v4475_v15  ;;  %v5432_v15 = vld [vmem:[%s6209_s7 + $0x10] sm:$0xff] }
 0x228   : > { %6521 = vst [vmem:[#allocation51_spill] sm:$0xff] %v5346_v38  ;;  %v1431_v20 = vsel %vm1038_vm13, %v1426_v43, %v1430_v10  ;;  %v3753_v43 = vld [vmem:[%s6209_s7 + $0xa8] sm:$0xff]  ;;  %v5460_v10 = vld [vmem:[%s6209_s7 + $0x60] sm:$0xff] }
 0x229   : > { %6522 = vst [vmem:[#allocation52_spill] sm:$0xff] %v5362_v6  ;;  %2433 = vmax.xlane.f32.xlu0 %v2432_v7  ;;  %v5418_v26 = vsel %vm1041_vm12, %v1429_v2, %v1431_v20  ;;  %v5427_v7 = vadd.f32 %v5068_v21, %v4486_v61  ;;  %v2142_v2 = vadd.f32 %v5432_v15, %v5062_v57 }
 0x22a   : > { %6523 = vst [vmem:[#allocation53_spill] sm:$0xff] %v5379_v52  ;;  %v5445_v61 = vadd.f32 %v5072_v60, %v6492_v40  ;;  %v2256_v40 = vadd.f32 %v5460_v10, %v4995_v22 }
 0x22b   : > { %6524 = vst [vmem:[#allocation54_spill] sm:$0xff] %v5383_v12  ;;  %2276 = vmax.xlane.f32.xlu2 %v6531_v11  ;;  %2236 = vmax.xlane.f32.xlu1 %v2235_v25  ;;  %v5449_v25 = vadd.f32 %v5074_v24, %v6493_v4  ;;  %v2337_v11 = vadd.f32 %v3753_v43, %v5000_v30  ;;  %v5467_v4 = vld [vmem:[%s6209_s7 + $0x68] sm:$0xff] }
 0x22c   : > { %6525 = vst [vmem:[#allocation20_spill] sm:$0xff] %v5387_v37  ;;  %v5451_v20 = vpop.xlane.xlu0 %1215  ;;  %v2257_v41 = vadd.f32 %v5467_v4, %v5000_v30  ;;  %v1445_v43 = vperm.slane %v4935_v19, %v5322_v50  ;;  %v1131_v0 = vpop.xlane.xlu2 %1130  ;;  %v1451_v37 = vperm.slane %v5070_v5, %v5077_v51  ;;  %v1448_v12 = vperm.slane %v1128_v27, %v5077_v51 }
 0x22d   : > { %6526 = vst [vmem:[#allocation21_spill] sm:$0xff] %v5391_v1  ;;  %v1449_v52 = vperm.slane %v1131_v0, %v5322_v50  ;;  %v2161_v19 = vmax.f32 %v2142_v2, %v2143_v9  ;;  %v3761_v0 = vld [vmem:[%s6209_s7 + $0x98] sm:$0xff]  ;;  %v1455_v9 = vperm.slane %v5151_v36, %v5322_v50 }
 0x22e   : > { %6527 = vst [vmem:[#allocation24_spill] sm:$0xff] %v5395_v54  ;;  %v6540_v1 = vld [vmem:[#allocation28_spill] sm:$0xff] }
 0x22f   : > { %6528 = vst [vmem:[#allocation25_spill] sm:$0xff] %v5402_v58  ;;  %v2352_v58 = vmax.f32 %v5214_v23, %v2337_v11  ;;  %v5501_v23 = vld [vmem:[%s6209_s7 + $0x28] sm:$0xff] }
 0x230   : > { %6529 = vst [vmem:[#allocation11_spill] sm:$0xff] %v5406_v55  ;;  %v1137_v55 = vpop.xlane.xlu1 %1136 }
 0x231   : > { %6530 = vst [vmem:[#allocation55_spill] sm:$0xff] %v5415_v62  ;;  %v1452_v6 = vperm.slane %v1137_v55, %v5322_v50  ;;  %v1450_v62 = vsel %vm1446_vm6, %v1449_v52, %v1448_v12  ;;  %2162 = vmax.xlane.f32.xlu0 %v2161_v19  ;;  %v3758_v52 = vld [vmem:[%s6209_s7 + $0xd0] sm:$0xff] }
 0x232   : > { %6532 = vst [vmem:[#allocation56_spill] sm:$0xff] %v5427_v7  ;;  %v1447_v7 = vsel %vm1446_vm6, %v1445_v43, %v6535_v31  ;;  %v2180_v31 = vadd.f32 %v5494_v39, %v5062_v57  ;;  %v2378_v12 = vadd.f32 %v3758_v52, %v4995_v22 }
 0x233   : > { %6533 = vst [vmem:[#allocation12_spill] sm:$0xff] %v5445_v61  ;;  %v1453_v54 = vsel %vm1446_vm6, %v1452_v6, %v1451_v37  ;;  %v1457_v5 = vsel %vm1035_vm11, %v1450_v62, %v1447_v7  ;;  %2353 = vmax.xlane.f32.xlu2 %v2352_v58  ;;  %v3759_v37 = vld [vmem:[%s6209_s7 + $0xd8] sm:$0xff]  ;;  %v3760_v58 = vld [vmem:[%s6209_s7 + $0x90] sm:$0xff]  ;;  %v2299_v62 = vadd.f32 %v3761_v0, %v5000_v30 }
 0x234   : > { %6534 = vst [vmem:[#allocation22_spill] sm:$0xff] %v5449_v25  ;;  %v2272_v25 = vmax.f32 %v2256_v40, %v2257_v41  ;;  %v1458_v27 = vsel %vm1038_vm13, %v1453_v54, %v1457_v5  ;;  %v2181_v41 = vadd.f32 %v5501_v23, %v5064_v45  ;;  %v5505_v6 = vpop.xlane.xlu0 %1224  ;;  %v2379_v54 = vadd.f32 %v3759_v37, %v5000_v30  ;;  %v1140_v7 = vpop.xlane.xlu2 %1139 }
 0x235   : > { %v2298_v55 = vadd.f32 %v3760_v58, %v4995_v22  ;;  %v1454_v11 = vperm.slane %v1140_v7, %v5077_v51 }
 0x236   : > { %2273 = vmax.xlane.f32.xlu1 %v2272_v25  ;;  %v1475_v25 = vperm.slane %v5251_v42, %v4959_v13  ;;  %v2198_v43 = vmax.f32 %v2180_v31, %v2181_v41  ;;  %v2395_v52 = vmax.f32 %v2378_v12, %v2379_v54  ;;  %v2146_v31 = vadd.f32 %v5432_v15, %v5066_v14  ;;  %v3764_v54 = vld [vmem:[%s6209_s7 + $0xc0] sm:$0xff] }
 0x237   : > { %v1456_v19 = vsel %vm1446_vm6, %v1455_v9, %v1454_v11  ;;  %v2315_v37 = vmax.f32 %v2298_v55, %v2299_v62  ;;  %v2147_v41 = vadd.f32 %v5439_v17, %v5068_v21  ;;  %v2376_v55 = vadd.f32 %v3764_v54, %v4995_v22  ;;  %v3765_v62 = vld [vmem:[%s6209_s7 + $0xc8] sm:$0xff] }
 0x238   : > { %v1175_v2 = vpop.xlane.xlu1 %1174  ;;  %v1459_v58 = vsel %vm1041_vm12, %v1456_v19, %v1458_v27  ;;  %v5545_v27 = vld [vmem:[%s6209_s7] sm:$0xff]  ;;  %v2377_v7 = vadd.f32 %v3765_v62, %v5000_v30  ;;  %v5572_v30 = vld [vmem:[%s6209_s7 + $0x50] sm:$0xff] }
 0x239   : > { %v1476_v40 = vperm.slane %v1175_v2, %v4968_v47  ;;  %2199 = vmax.xlane.f32.xlu0 %v2198_v43  ;;  %v1624_v42 = vsel %vm1623_vm7, %v5418_v26, %v1459_v58  ;;  %v5552_v26 = vld [vmem:[%s6209_s7 + $0x8] sm:$0xff] }
 0x23a   : > { %v2141_v12 = vadd.f32 %v5552_v26, %v5064_v45 }
 0x23b   : > { %v1477_v5 = vsel %vm1473_vm15, %v1476_v40, %v1475_v25  ;;  %2396 = vmax.xlane.f32.xlu2 %v2395_v52  ;;  %v1479_v25 = vperm.slane %v5348_v56, %v4968_v47  ;;  %v2167_v40 = vmax.f32 %v2146_v31, %v2147_v41  ;;  %v2222_v56 = vadd.f32 %v5572_v30, %v5062_v57  ;;  %v5579_v52 = vld [vmem:[%s6209_s7 + $0x58] sm:$0xff] }
 0x23c   : > { %v1484_v36 = vsel %vm1035_vm11, %v1477_v5, %v4975_v29  ;;  %v5540_v0 = vpop.xlane.xlu0 %1259  ;;  %v2140_v29 = vadd.f32 %v5545_v27, %v5062_v57  ;;  %v1178_v2 = vpop.xlane.xlu2 %1177  ;;  %v2392_v5 = vmax.f32 %v2376_v55, %v2377_v7  ;;  %v2145_v31 = vadd.f32 %v5552_v26, %v5068_v21 }
 0x23d   : > { %v1478_v11 = vperm.slane %v1178_v2, %v4959_v13 }
 0x23e   : > { %2316 = vmax.xlane.f32.xlu1 %v2315_v37  ;;  %v2158_v19 = vmax.f32 %v2140_v29, %v2141_v12  ;;  %v2223_v37 = vadd.f32 %v5579_v52, %v5064_v45  ;;  %v1502_v12 = vperm.slane %v5451_v20, %v4981_v16 }
 0x23f   : > { %v1480_v43 = vsel %vm1473_vm15, %v1479_v25, %v1478_v11 }
 0x240   : > { %v1184_v9 = vpop.xlane.xlu1 %1183  ;;  %v1485_v22 = vsel %vm1038_vm13, %v1480_v43, %v1484_v36  ;;  %v2144_v36 = vadd.f32 %v5545_v27, %v5066_v14  ;;  %v2241_v7 = vmax.f32 %v2222_v56, %v2223_v37  ;;  %v2189_v56 = vadd.f32 %v5501_v23, %v5074_v24 }
 0x241   : > { %2168 = vmax.xlane.f32.xlu0 %v2167_v40  ;;  %v1481_v54 = vperm.slane %v1184_v9, %v4959_v13  ;;  %v6536_v9 = vld [vmem:[#allocation26_spill] sm:$0xff] }
 0x242   : > { %v2164_v11 = vmax.f32 %v2144_v36, %v2145_v31 }
 0x243   : > { %2159 = vmax.xlane.f32.xlu2 %v2158_v19  ;;  %v6537_v19 = vmax.f32 %v5022_v48, %v6536_v9  ;;  %v5617_v48 = vld [vmem:[%s6209_s7 + $0x38] sm:$0xff] }
 0x244   : > { %v1231_v58 = vpop.xlane.xlu0 %1230  ;;  %v1187_v41 = vpop.xlane.xlu2 %1186  ;;  %v2183_v31 = vadd.f32 %v5617_v48, %v5064_v45 }
 0x245   : > { %v1482_v55 = vperm.slane %v1187_v41, %v4968_v47 }
 0x246   : > { %2393 = vmax.xlane.f32.xlu1 %v2392_v5  ;;  %v2188_v5 = vadd.f32 %v5494_v39, %v5072_v60 }
 0x247   : > { %v1483_v2 = vsel %vm1473_vm15, %v1482_v55, %v1481_v54  ;;  %v6538_v54 = vld [vmem:[#allocation7_spill] sm:$0xff] }
 0x248   : > { %v1219_v29 = vpop.xlane.xlu1 %1218  ;;  %v1486_v40 = vsel %vm1041_vm12, %v1483_v2, %v1485_v22  ;;  %v2187_v22 = vadd.f32 %v5617_v48, %v5068_v21  ;;  %v1529_v55 = vperm.slane %v5540_v0, %v6538_v54  ;;  %v2227_v0 = vadd.f32 %v5579_v52, %v5068_v21 }
 0x249   : > { %v1503_v62 = vperm.slane %v1219_v29, %v4990_v59  ;;  %2242 = vmax.xlane.f32.xlu0 %v2241_v7  ;;  %v1626_v20 = vsel %vm1625_vm8, %v1624_v42, %v1486_v40  ;;  %v6539_v7 = vld [vmem:[#allocation8_spill] sm:$0xff] }
 0x24b   : > { %v1504_v25 = vsel %vm1500_vm0, %v1503_v62, %v1502_v12  ;;  %2165 = vmax.xlane.f32.xlu2 %v2164_v11  ;;  %v1506_v12 = vperm.slane %v5505_v6, %v4990_v59  ;;  %v2226_v6 = vadd.f32 %v5572_v30, %v5066_v14 }
 0x24c   : > { %v1511_v43 = vsel %vm1035_vm11, %v1504_v25, %v5003_v49  ;;  %v5605_v37 = vpop.xlane.xlu0 %1306  ;;  %v5610_v49 = vld [vmem:[%s6209_s7 + $0x30] sm:$0xff]  ;;  %v1222_v41 = vpop.xlane.xlu2 %1221  ;;  %v2210_v25 = vmax.f32 %v2188_v5, %v2189_v56  ;;  %v5645_v56 = vld [vmem:[%s6209_s7 + $0x40] sm:$0xff] }
 0x24d   : > { %v2186_v42 = vadd.f32 %v5610_v49, %v5066_v14  ;;  %v2182_v36 = vadd.f32 %v5610_v49, %v5062_v57  ;;  %v1505_v62 = vperm.slane %v1222_v41, %v4981_v16 }
 0x24e   : > { %2436 = vmax.xlane.f32.xlu1 %v6537_v19 }
 0x24f   : > { %v1507_v11 = vsel %vm1500_vm0, %v1506_v12, %v1505_v62  ;;  %v2207_v9 = vmax.f32 %v2186_v42, %v2187_v22  ;;  %v2201_v19 = vmax.f32 %v2182_v36, %v2183_v31  ;;  %v2184_v22 = vadd.f32 %v5494_v39, %v5066_v14 }
 0x250   : > { %v1263_v29 = vpop.xlane.xlu1 %1262  ;;  %v1512_v61 = vsel %vm1038_vm13, %v1507_v11, %v1511_v43  ;;  %v2220_v43 = vadd.f32 %v5645_v56, %v5062_v57  ;;  %v2185_v36 = vadd.f32 %v5501_v23, %v5068_v21  ;;  %v2260_v23 = vadd.f32 %v5460_v10, %v5062_v57 }
 0x251   : > { %v1530_v2 = vperm.slane %v1263_v29, %v6539_v7  ;;  %2211 = vmax.xlane.f32.xlu0 %v2210_v25  ;;  %v1509_v29 = vperm.slane %v1231_v58, %v4990_v59  ;;  %v2261_v58 = vadd.f32 %v5467_v4, %v5064_v45 }
 0x252   : > { %v2204_v25 = vmax.f32 %v2184_v22, %v2185_v36  ;;  %v5688_v36 = vadd.s32 4294967216, %v6436_v63 }
 0x253   : > { %v1531_v40 = vsel %vm1527_vm3, %v1530_v2, %v1529_v55  ;;  %2208 = vmax.xlane.f32.xlu2 %v2207_v9  ;;  %v2247_v55 = vmax.f32 %v2226_v6, %v2227_v0  ;;  %v2150_v9 = vadd.f32 %v5432_v15, %v5072_v60 }
 0x254   : > { %v1538_v38 = vsel %vm1035_vm11, %v1531_v40, %v6540_v1  ;;  %v5640_v5 = vpop.xlane.xlu0 %1309  ;;  %v5652_v1 = vld [vmem:[%s6209_s7 + $0x48] sm:$0xff]  ;;  %v1228_v31 = vpop.xlane.xlu2 %1227 }
 0x255   : > { %v2221_v42 = vadd.f32 %v5652_v1, %v5064_v45  ;;  %v1508_v12 = vperm.slane %v1228_v31, %v4981_v16 }
 0x256   : > { %2202 = vmax.xlane.f32.xlu1 %v2201_v19  ;;  %v2149_v19 = vadd.f32 %v5552_v26, %v5074_v24  ;;  %v6541_v26 = vld [vmem:[#allocation27_spill] sm:$0xff] }
 0x257   : > { %v1510_v62 = vsel %vm1500_vm0, %v1509_v29, %v1508_v12  ;;  %v2238_v2 = vmax.f32 %v2220_v43, %v2221_v42  ;;  %v5684_v43 = vadd.s32 4294967208, %v6436_v63  ;;  %v2278_v42 = vmax.f32 %v2260_v23, %v2261_v58 }
 0x258   : > { %v1266_v41 = vpop.xlane.xlu1 %1265  ;;  %v1513_v11 = vsel %vm1041_vm12, %v1510_v62, %v1512_v61  ;;  %v2151_v61 = vadd.f32 %v5439_v17, %v5074_v24  ;;  %v2231_v29 = vadd.f32 %v5579_v52, %v5074_v24  ;;  %v2190_v62 = vadd.f32 %v5610_v49, %v5072_v60 }
 0x259   : > { %2248 = vmax.xlane.f32.xlu0 %v2247_v55  ;;  %v5665_v39 = vsel %vm1627_vm9, %v1626_v20, %v1513_v11  ;;  %v2148_v20 = vadd.f32 %v5545_v27, %v5072_v60  ;;  %v1532_v57 = vperm.slane %v1266_v41, %v6538_v54  ;;  %v1553_v31 = vperm.slane %v6541_v26, %v5684_v43 }
 0x25a   : > { %v2173_v22 = vmax.f32 %v2150_v9, %v2151_v61  ;;  %v2230_v41 = vadd.f32 %v5572_v30, %v5072_v60  ;;  %v2224_v55 = vadd.f32 %v5645_v56, %v5066_v14  ;;  %v1557_v52 = vperm.slane %v5605_v37, %v5684_v43 }
 0x25b   : > { %2239 = vmax.xlane.f32.xlu2 %v2238_v2  ;;  %v2170_v17 = vmax.f32 %v2148_v20, %v2149_v19  ;;  %v2191_v2 = vadd.f32 %v5617_v48, %v5074_v24  ;;  %v1559_v58 = vperm.slane %v5640_v5, %v5688_v36 }
 0x25c   : > { %v5671_v40 = vpop.xlane.xlu0 %1315  ;;  %v1269_v6 = vpop.xlane.xlu2 %1268  ;;  %v2253_v20 = vmax.f32 %v2230_v41, %v2231_v29 }
 0x25d   : > { %v1533_v45 = vperm.slane %v1269_v6, %v6539_v7 }
 0x25e   : > { %2205 = vmax.xlane.f32.xlu1 %v2204_v25  ;;  %v6542_v25 = vld [vmem:[#allocation13_spill] sm:$0xff] }
 0x25f   : > { %v1534_v15 = vsel %vm1527_vm3, %v1533_v45, %v1532_v57  ;;  %v1551_v30 = vperm.slane %v6542_v25, %v5688_v36  ;;  %v2213_v57 = vmax.f32 %v2190_v62, %v2191_v2  ;;  %v6544_v62 = vld [vmem:[#allocation35_spill] sm:$0xff]  ;;  %v6547_v25 = vld [vmem:[#allocation33_spill] sm:$0xff] }
 0x260   : > { %v1272_v0 = vpop.xlane.xlu1 %1271  ;;  %v1539_v27 = vsel %vm1038_vm13, %v1534_v15, %v1538_v38  ;;  %v2225_v38 = vadd.f32 %v5652_v1, %v5068_v21  ;;  %v2229_v15 = vadd.f32 %v5652_v1, %v5074_v24  ;;  %v6546_v1 = vld [vmem:[#allocation32_spill] sm:$0xff] }
 0x261   : > { %2279 = vmax.xlane.f32.xlu0 %v2278_v42  ;;  %v1555_v49 = vsel %vm1554_vm10, %v1553_v31, %v1551_v30  ;;  %v2228_v42 = vadd.f32 %v5645_v56, %v5072_v60  ;;  %v1535_v26 = vperm.slane %v1272_v0, %v6538_v54  ;;  %v6548_v0 = vmax.f32 %v6546_v1, %v6547_v25  ;;  %v3772_v30 = vld [vmem:[%s6209_s7 + $0x80] sm:$0xff] }
 0x262   : > { %v2244_v6 = vmax.f32 %v2224_v55, %v2225_v38  ;;  %v6543_v38 = vld [vmem:[#allocation34_spill] sm:$0xff]  ;;  %v2269_v1 = vadd.f32 %v5467_v4, %v5074_v24 }
 0x263   : > { %2174 = vmax.xlane.f32.xlu2 %v2173_v22  ;;  %v2250_v29 = vmax.f32 %v2228_v42, %v2229_v15  ;;  %v6545_v2 = vmax.f32 %v6543_v38, %v6544_v62  ;;  %v6550_v42 = vld [vmem:[#allocation29_spill] sm:$0xff] }
 0x264   : > { %v5697_v12 = vpop.xlane.xlu0 %1356  ;;  %v1304_v11 = vpop.xlane.xlu2 %1303 }
 0x265   : > { %v1556_v9 = vperm.slane %v1304_v11, %v5688_v36  ;;  %v2304_v11 = vadd.f32 %v3772_v30, %v5066_v14 }
 0x266   : > { %2171 = vmax.xlane.f32.xlu1 %v2170_v17 }
 0x267   : > { %v1558_v48 = vsel %vm1554_vm10, %v1557_v52, %v1556_v9  ;;  %v3775_v9 = vld [vmem:[%s6209_s7 + $0x78] sm:$0xff] }
 0x268   : > { %v1313_v23 = vpop.xlane.xlu1 %1312  ;;  %v1565_v45 = vsel %vm1035_vm11, %v1558_v48, %v1555_v49  ;;  %v2264_v49 = vadd.f32 %v5460_v10, %v5066_v14 }
 0x269   : > { %v1560_v61 = vperm.slane %v1313_v23, %v5684_v43  ;;  %2254 = vmax.xlane.f32.xlu0 %v2253_v20  ;;  %v2265_v20 = vadd.f32 %v5467_v4, %v5068_v21  ;;  %v6554_v4 = vld [vmem:[#allocation40_spill] sm:$0xff] }
 0x26b   : > { %v1561_v19 = vsel %vm1554_vm10, %v1560_v61, %v1559_v58  ;;  %2245 = vmax.xlane.f32.xlu2 %v2244_v6  ;;  %v2267_v61 = vadd.f32 %v3775_v9, %v5068_v21  ;;  %v1562_v6 = vperm.slane %v5671_v40, %v5688_v36  ;;  %v2308_v40 = vadd.f32 %v3772_v30, %v5072_v60 }
 0x26c   : > { %v1566_v37 = vsel %vm1038_vm13, %v1561_v19, %v1565_v45  ;;  %v1392_v5 = vpop.xlane.xlu0 %1391  ;;  %v1275_v22 = vpop.xlane.xlu2 %1274 }
 0x26d   : > { %v1536_v31 = vperm.slane %v1275_v22, %v6539_v7 }
 0x26e   : > { %2214 = vmax.xlane.f32.xlu1 %v2213_v57  ;;  %v6549_v57 = vld [vmem:[#allocation30_spill] sm:$0xff] }
 0x26f   : > { %v1537_v41 = vsel %vm1527_vm3, %v1536_v31, %v1535_v26 }
 0x270   : > { %v1348_v17 = vpop.xlane.xlu1 %1347  ;;  %v1540_v55 = vsel %vm1041_vm12, %v1537_v41, %v1539_v27  ;;  %v3773_v27 = vld [vmem:[%s6209_s7 + $0x88] sm:$0xff] }
 0x271   : > { %2322 = vmax.xlane.f32.xlu0 %v6545_v2  ;;  %v5733_v56 = vsel %vm1629_vm2, %v5665_v39, %v1540_v55  ;;  %v2305_v23 = vadd.f32 %v3773_v27, %v5068_v21  ;;  %v3774_v39 = vld [vmem:[%s6209_s7 + $0x70] sm:$0xff]  ;;  %v1583_v45 = vperm.slane %v1348_v17, %v6549_v57  ;;  %v2309_v17 = vadd.f32 %v3773_v27, %v5074_v24 }
 0x272   : > { %v2266_v58 = vadd.f32 %v3774_v39, %v5066_v14  ;;  %v6551_v55 = vld [vmem:[#allocation31_spill] sm:$0xff]  ;;  %v2268_v2 = vadd.f32 %v5460_v10, %v5072_v60 }
 0x273   : > { %2251 = vmax.xlane.f32.xlu2 %v2250_v29  ;;  %v2324_v26 = vmax.f32 %v2304_v11, %v2305_v23  ;;  %v2284_v29 = vmax.f32 %v2264_v49, %v2265_v20  ;;  %v6552_v11 = vld [vmem:[#allocation36_spill] sm:$0xff]  ;;  %v2330_v49 = vmax.f32 %v2308_v40, %v2309_v17  ;;  %v6558_v40 = vld [vmem:[#allocation42_spill] sm:$0xff]  ;;  %v6559_v17 = vld [vmem:[#allocation43_spill] sm:$0xff] }
 0x274   : > { %v1363_v52 = vpop.xlane.xlu0 %1362  ;;  %v1351_v48 = vpop.xlane.xlu2 %1350  ;;  %v2287_v14 = vmax.f32 %v2266_v58, %v2267_v61  ;;  %v1610_v23 = vperm.slane %v1392_v5, %v6552_v11  ;;  %v6553_v61 = vld [vmem:[#allocation37_spill] sm:$0xff]  ;;  %v2290_v10 = vmax.f32 %v2268_v2, %v2269_v1  ;;  %v6560_v2 = vmax.f32 %v6558_v40, %v6559_v17  ;;  %v6561_v1 = vld [vmem:[#allocation3_spill] sm:$0xff] }
 0x275   : > { %v1584_v15 = vperm.slane %v1351_v48, %v6550_v42 }
 0x276   : > { %2282 = vmax.xlane.f32.xlu1 %v6548_v0 }
 0x277   : > { %v1585_v31 = vsel %vm1581_vm4, %v1584_v15, %v1583_v45  ;;  %v2270_v15 = vadd.f32 %v3774_v39, %v5072_v60  ;;  %v6562_v60 = vld [vmem:[#allocation41_spill] sm:$0xff] }
 0x278   : > { %v1319_v19 = vpop.xlane.xlu1 %1318  ;;  %v1592_v21 = vsel %vm1035_vm11, %v1585_v31, %v6551_v55  ;;  %v6563_v39 = vmax.f32 %v6561_v1, %v6562_v60  ;;  %v6577_v1 = vld [vmem:[#allocation18_spill] sm:$0xff]  ;;  %v6578_v60 = vld [vmem:[#allocation19_spill] sm:$0xff] }
 0x279   : > { %v1563_v22 = vperm.slane %v1319_v19, %v5684_v43  ;;  %2325 = vmax.xlane.f32.xlu0 %v2324_v26 }
 0x27b   : > { %v1564_v41 = vsel %vm1554_vm10, %v1563_v22, %v1562_v6  ;;  %2288 = vmax.xlane.f32.xlu2 %v2287_v14  ;;  %v6555_v6 = vld [vmem:[#allocation38_spill] sm:$0xff]  ;;  %v2271_v22 = vadd.f32 %v3775_v9, %v5074_v24 }
 0x27c   : > { %v5768_v38 = vsel %vm1041_vm12, %v1564_v41, %v1566_v37  ;;  %v2154_v62 = vpop.xlane.xlu0 %2153  ;;  %v1354_v25 = vpop.xlane.xlu2 %1353  ;;  %v1587_v37 = vperm.slane %v5697_v12, %v6550_v42  ;;  %v6556_v12 = vld [vmem:[#allocation39_spill] sm:$0xff]  ;;  %v1590_v41 = vperm.slane %v1363_v52, %v6550_v42 }
 0x27d   : > { %v1586_v58 = vperm.slane %v1354_v25, %v6549_v57  ;;  %v6557_v45 = vmax.f32 %v6555_v6, %v6556_v12  ;;  %v2293_v55 = vmax.f32 %v2270_v15, %v2271_v22  ;;  %v2464_v52 = vperm.slane %v2154_v62, %v6436_v63  ;;  %v6571_v22 = vld [vmem:[#allocation46_spill] sm:$0xff] }
 0x27e   : > { %2285 = vmax.xlane.f32.xlu1 %v2284_v29 }
 0x27f   : > { %v1588_v27 = vsel %vm1581_vm4, %v1587_v37, %v1586_v58 }
 0x280   : > { %v1395_v0 = vpop.xlane.xlu1 %1394  ;;  %v1593_v48 = vsel %vm1038_vm13, %v1588_v27, %v1592_v21  ;;  %v6564_v27 = vmax.f32 %v5249_v53, %v5257_v44  ;;  %v6569_v44 = vld [vmem:[#allocation50_spill] sm:$0xff] }
 0x281   : > { %v1611_v30 = vperm.slane %v1395_v0, %v6553_v61  ;;  %2331 = vmax.xlane.f32.xlu0 %v2330_v49  ;;  %v6570_v53 = vmax.f32 %v5289_v28, %v6569_v44  ;;  %v1632_v28 = vsel %vm6343_vm1, %v5733_v56, %v5768_v38  ;;  %vm1633_vm1 = vcmask 785408  }
 0x283   : > { %v1612_v20 = vsel %vm1608_vm5, %v1611_v30, %v1610_v23  ;;  %2319 = vmax.xlane.f32.xlu2 %v6557_v45 }
 0x284   : > { %v1619_v19 = vsel %vm1035_vm11, %v1612_v20, %v6554_v4  ;;  %v2234_v5 = vpop.xlane.xlu0 %2233  ;;  %v6565_v20 = vld [vmem:[#allocation44_spill] sm:$0xff] }
 0x285   : > { %v2512_v40 = vperm.slane %v2234_v5, %v4959_v13  ;;  %v6584_v5 = vld [vmem:[#allocation17_spill] sm:$0xff] }
 0x286   : > { %2291 = vmax.xlane.f32.xlu1 %v2290_v10  ;;  %v1360_v26 = vpop.xlane.xlu2 %1359  ;;  %v6566_v10 = vld [vmem:[#allocation45_spill] sm:$0xff] }
 0x287   : > { %v1589_v14 = vperm.slane %v1360_v26, %v6549_v57  ;;  %v6567_v62 = vmax.f32 %v6565_v20, %v6566_v10  ;;  %v6572_v26 = vld [vmem:[#allocation47_spill] sm:$0xff] }
 0x288   : > { %v1398_v31 = vpop.xlane.xlu1 %1397 }
 0x289   : > { %v1591_v29 = vsel %vm1581_vm4, %v1590_v41, %v1589_v14  ;;  %2368 = vmax.xlane.f32.xlu0 %v6560_v2  ;;  %v1613_v0 = vperm.slane %v1398_v31, %v6552_v11  ;;  %v6573_v31 = vmax.f32 %v6571_v22, %v6572_v26 }
 0x28a   : > { %v1594_v21 = vsel %vm1041_vm12, %v1591_v29, %v1593_v48  ;;  %v6568_v48 = vmax.f32 %v5241_v18, %v5245_v34  ;;  %v6574_v18 = vld [vmem:[#allocation48_spill] sm:$0xff]  ;;  %v6575_v34 = vld [vmem:[#allocation49_spill] sm:$0xff] }
 0x28b   : > { %2294 = vmax.xlane.f32.xlu2 %v2293_v55  ;;  %v6576_v41 = vmax.f32 %v6574_v18, %v6575_v34  ;;  %v6593_v18 = vld [vmem:[#allocation52_spill] sm:$0xff]  ;;  %v6594_v34 = vld [vmem:[#allocation53_spill] sm:$0xff] }
 0x28c   : > { %v2314_v24 = vpop.xlane.xlu0 %2313 }
 0x28d   : > { %v2560_v26 = vperm.slane %v2314_v24, %v6538_v54 }
 0x28e   : > { %2328 = vmax.xlane.f32.xlu1 %v6563_v39  ;;  %v1401_v9 = vpop.xlane.xlu2 %1400  ;;  %v6579_v39 = vmax.f32 %v6577_v1, %v6578_v60 }
 0x28f   : > { %v1614_v37 = vperm.slane %v1401_v9, %v6553_v61  ;;  %v6580_v9 = vld [vmem:[#allocation9_spill] sm:$0xff] }
 0x290   : > { %v2157_v25 = vpop.xlane.xlu1 %2156 }
 0x291   : > { %v2465_v23 = vperm.slane %v2157_v25, %v4933_v35  ;;  %v1615_v58 = vsel %vm1608_vm5, %v1614_v37, %v1613_v0  ;;  %2399 = vmax.xlane.f32.xlu0 %v6564_v27  ;;  %v6581_v25 = vld [vmem:[#allocation10_spill] sm:$0xff]  ;;  %v6583_v0 = vld [vmem:[#allocation16_spill] sm:$0xff] }
 0x292   : > { %v5808_v49 = vsel %vm1038_vm13, %v1615_v58, %v1619_v19  ;;  %v6585_v37 = vmax.f32 %v6583_v0, %v6584_v5  ;;  %v2721_v0 = vld.sshfl [vmem:[#allocation1] sm:$0xff pattern:$0x75316420]  ;;  %v2722_v5 = vld.sshfl [vmem:[#allocation1 + $0x8] sm:$0xff pattern:$0x75316420] }
 0x293   : > { %v2466_v30 = vsel %vm1419_vm14, %v2465_v23, %v2464_v52  ;;  %2362 = vmax.xlane.f32.xlu2 %v6567_v62  ;;  %v6582_v52 = vmax.f32 %v6580_v9, %v6581_v25 }
 0x294   : > { %v2357_v4 = vpop.xlane.xlu0 %2356 }
 0x295   : > { %v2585_v56 = vperm.slane %v2357_v4, %v5684_v43  ;;  %v6588_v4 = vld [vmem:[#allocation51_spill] sm:$0xff] }
 0x296   : > { %2359 = vmax.xlane.f32.xlu1 %v6568_v48  ;;  %v2197_v6 = vpop.xlane.xlu2 %2196 }
 0x297   : > { %v2489_v45 = vperm.slane %v2197_v6, %v5322_v50  ;;  %v6586_v6 = vmax.f32 %v5354_v32, %v5358_v8  ;;  %v5872_v8 = vsel %vm1633_vm1, %v1632_v28, %v1594_v21  ;;  %v6590_v32 = vld [vmem:[#allocation21_spill] sm:$0xff] }
 0x298   : > { %v2194_v12 = vpop.xlane.xlu1 %2193 }
 0x299   : > { %v2488_v19 = vperm.slane %v2194_v12, %v5077_v51  ;;  %2374 = vmax.xlane.f32.xlu0 %v6570_v53  ;;  %v6587_v12 = vmax.f32 %v5332_v3, %v5338_v33  ;;  %v6591_v33 = vld [vmem:[#allocation24_spill] sm:$0xff] }
 0x29b   : > { %v5822_v15 = vsel %vm1446_vm6, %v2489_v45, %v2488_v19  ;;  %2365 = vmax.xlane.f32.xlu2 %v6573_v31  ;;  %v6589_v45 = vmax.f32 %v5342_v46, %v6588_v4  ;;  %v3824_v19 = vmov 0   ;;  %v6592_v46 = vmax.f32 %v6590_v32, %v6591_v33  ;;  %v6607_v32 = vld [vmem:[#allocation22_spill] sm:$0xff]  ;;  %v2655_v33 = vld [vmem:[%s530_s15] sm:$0xf]  ;;  %s3830_s15 = smov 98  }
 0x29c   : > { %v2434_v14 = vpop.xlane.xlu0 %2433  ;;  %3745 = vset.pattern.permute.xlu0 %v3824_v19 }
 0x29d   : > { %v2632_v4 = vperm.slane %v2434_v14, %v6552_v11 }
 0x29e   : > { %2334 = vmax.xlane.f32.xlu1 %v6576_v41  ;;  %v2277_v29 = vpop.xlane.xlu2 %2276  ;;  %v6595_v41 = vmax.f32 %v6593_v18, %v6594_v34 }
 0x29f   : > { %v2537_v38 = vperm.slane %v2277_v29, %v4990_v59  ;;  %v6596_v29 = vld [vmem:[#allocation54_spill] sm:$0xff] }
 0x2a0   : > { %v2237_v55 = vpop.xlane.xlu1 %2236 }
 0x2a1   : > { %v2513_v17 = vperm.slane %v2237_v55, %v4968_v47  ;;  %2442 = vmax.xlane.f32.xlu0 %v6579_v39  ;;  %v6597_v55 = vld [vmem:[#allocation20_spill] sm:$0xff] }
 0x2a2   : > { %v6598_v24 = vmax.f32 %v6596_v29, %v6597_v55 }
 0x2a3   : > { %v5839_v2 = vsel %vm1473_vm15, %v2513_v17, %v2512_v40  ;;  %2371 = vmax.xlane.f32.xlu2 %v6582_v52 }
 0x2a4   : > { %v2163_v23 = vpop.xlane.xlu0 %2162 }
 0x2a5   : > { %v2468_v21 = vperm.slane %v2163_v23, %v4933_v35  ;;  %v6602_v23 = vld [vmem:[#allocation55_spill] sm:$0xff] }
 0x2a6   : > { %2402 = vmax.xlane.f32.xlu1 %v6585_v37  ;;  %v2354_v58 = vpop.xlane.xlu2 %2353  ;;  %v6599_v37 = vld [vmem:[#allocation25_spill] sm:$0xff] }
 0x2a7   : > { %v2584_v20 = vperm.slane %v2354_v58, %v5688_v36  ;;  %v6600_v58 = vld [vmem:[#allocation11_spill] sm:$0xff] }
 0x2a9   : > { %v2274_v27 = vpop.xlane.xlu1 %2273  ;;  %v5855_v62 = vsel %vm1554_vm10, %v2585_v56, %v2584_v20  ;;  %2445 = vmax.xlane.f32.xlu0 %v6586_v6  ;;  %v6603_v56 = vld [vmem:[#allocation56_spill] sm:$0xff]  ;;  %v6605_v20 = vld [vmem:[#allocation2_spill] sm:$0xff] }
 0x2aa   : > { %v2536_v10 = vperm.slane %v2274_v27, %v4981_v16  ;;  %v6601_v27 = vmax.f32 %v6599_v37, %v6600_v58  ;;  %2815 = vst [vmem:[#allocation1] ss:$2 sm:$0xff] %v6605_v20  ;;  %v1637_v37 = vld [vmem:[%s521_s27] sm:$0xf] }
 0x2ab   : > { %2408 = vmax.xlane.f32.xlu2 %v6587_v12 }
 0x2ac   : > { %v5858_v48 = vsel %vm1500_vm0, %v2537_v38, %v2536_v10  ;;  %v2200_v44 = vpop.xlane.xlu0 %2199  ;;  %v6604_v38 = vmax.f32 %v6602_v23, %v6603_v56 }
 0x2ae   : > { %2405 = vmax.xlane.f32.xlu1 %v6589_v45  ;;  %v2397_v53 = vpop.xlane.xlu2 %2396 }
 0x2af   : > { %v2609_v28 = vperm.slane %v2397_v53, %v6550_v42 }
 0x2b1   : > { %v2317_v22 = vpop.xlane.xlu1 %2316  ;;  %2454 = vmax.xlane.f32.xlu0 %v6592_v46 }
 0x2b2   : > { %v2561_v31 = vperm.slane %v2317_v22, %v6539_v7 }
 0x2b3   : > { %2439 = vmax.xlane.f32.xlu2 %v6595_v41  ;;  %v2491_v41 = vperm.slane %v2200_v44, %v5077_v51 }
 0x2b4   : > { %v5875_v3 = vsel %vm1527_vm3, %v2561_v31, %v2560_v26  ;;  %v2169_v40 = vpop.xlane.xlu0 %2168  ;;  %v6606_v31 = vld [vmem:[#allocation12_spill] sm:$0xff] }
 0x2b5   : > { %v2471_v45 = vperm.slane %v2169_v40, %v4933_v35  ;;  %v6608_v14 = vmax.f32 %v6606_v31, %v6607_v32 }
 0x2b6   : > { %2411 = vmax.xlane.f32.xlu1 %v6598_v24  ;;  %v2160_v17 = vpop.xlane.xlu2 %2159 }
 0x2b7   : > { %v2467_v60 = vperm.slane %v2160_v17, %v6436_v63 }
 0x2b9   : > { %v2394_v1 = vpop.xlane.xlu1 %2393  ;;  %v2469_v9 = vsel %vm1419_vm14, %v2468_v21, %v2467_v60 }
 0x2ba   : > { %v2608_v39 = vperm.slane %v2394_v1, %v6549_v57  ;;  %v2476_v52 = vsel %vm1035_vm11, %v2469_v9, %v2466_v30 }
 0x2bb   : > { %2414 = vmax.xlane.f32.xlu2 %v6601_v27 }
 0x2bc   : > { %v5892_v25 = vsel %vm1581_vm4, %v2609_v28, %v2608_v39  ;;  %v2243_v10 = vpop.xlane.xlu0 %2242 }
 0x2bd   : > { %v2516_v21 = vperm.slane %v2243_v10, %v4968_v47 }
 0x2be   : > { %2448 = vmax.xlane.f32.xlu1 %v6604_v38  ;;  %v2166_v6 = vpop.xlane.xlu2 %2165 }
 0x2bf   : > { %v2470_v30 = vperm.slane %v2166_v6, %v6436_v63 }
 0x2c1   : > { %v2437_v12 = vpop.xlane.xlu1 %2436  ;;  %v2472_v53 = vsel %vm1419_vm14, %v2471_v45, %v2470_v30 }
 0x2c2   : > { %v2633_v19 = vperm.slane %v2437_v12, %v6553_v61  ;;  %v2477_v26 = vsel %vm1038_vm13, %v2472_v53, %v2476_v52  ;;  %v3582_v53 = vld [vmem:[%s6211_s9 + $0x8] sm:$0x3] }
 0x2c3   : > { %2451 = vmax.xlane.f32.xlu2 %v6608_v14  ;;  %v6610_v14 = vld [vmem:[#allocation5_spill] sm:$0xff] }
 0x2c4   : > { %v5912_v22 = vsel %vm1608_vm5, %v2633_v19, %v2632_v4  ;;  %v2212_v46 = vpop.xlane.xlu0 %2211 }
 0x2c5   : > { %2658 = vperm.xlu0 %3745, %v2655_v33   ;;  %v2943_v33 = vperm.slane %v3582_v53, 1 }
 0x2c6   : > { %v2209_v18 = vpop.xlane.xlu2 %2208 }
 0x2c7   : > { %v2495_v28 = vperm.slane %v2209_v18, %v5322_v50 }
 0x2c9   : > { %v2203_v34 = vpop.xlane.xlu1 %2202 }
 0x2ca   : > { %v2492_v29 = vperm.slane %v2203_v34, %v5322_v50 }
 0x2cc   : > { %v2493_v55 = vsel %vm1446_vm6, %v2492_v29, %v2491_v41  ;;  %v2249_v40 = vpop.xlane.xlu0 %2248 }
 0x2cd   : > { %v2500_v24 = vsel %vm1035_vm11, %v2493_v55, %v5822_v15  ;;  %1640 = vperm.xlu0 %3745, %v1637_v37   ;;  %v2519_v30 = vperm.slane %v2249_v40, %v4968_v47  ;;  %v2944_v40 = vrot.slane %v2943_v33, 4  ;;  %v6614_v33 = vld [vmem:[#allocation59_spill] sm:$0xff] }
 0x2ce   : > { %v2240_v17 = vpop.xlane.xlu2 %2239 }
 0x2cf   : > { %v2515_v60 = vperm.slane %v2240_v17, %v4959_v13 }
 0x2d1   : > { %v2206_v1 = vpop.xlane.xlu1 %2205  ;;  %v2517_v44 = vsel %vm1473_vm15, %v2516_v21, %v2515_v60  ;;  %v2816_v60 = vld.sshfl [vmem:[#allocation1] sm:$0xff pattern:$0x75316420] }
 0x2d2   : > { %v2494_v39 = vperm.slane %v2206_v1, %v5077_v51  ;;  %v2524_v15 = vsel %vm1035_vm11, %v2517_v44, %v5839_v2  ;;  %v6609_v2 = vld [vmem:[#allocation4_spill] sm:$0xff] }
 0x2d4   : > { %v2496_v9 = vsel %vm1446_vm6, %v2495_v28, %v2494_v39  ;;  %v2280_v58 = vpop.xlane.xlu0 %2279  ;;  %v5965_v39 = vld.sshfl [vmem:[#allocation1 + $0x8] sm:$0xff pattern:$0x75316420] }
 0x2d5   : > { %v2501_v52 = vsel %vm1038_vm13, %v2496_v9, %v2500_v24  ;;  %2702 = vrot.lane.b32.xlu0 %v6609_v2, %s3826_s29  ;;  %v2539_v34 = vperm.slane %v2280_v58, %v4981_v16  ;;  %v2942_v24 = vperm.slane %v3582_v53, 0  ;;  %2877 = vst [vmem:[#allocation1] ss:$2 sm:$0xff] %v6605_v20 }
 0x2d6   : > { %v2175_v27 = vpop.xlane.xlu2 %2174 }
 0x2d7   : > { %2725 = vrot.lane.b32.xlu1 %v2721_v0, %s3825_s28  ;;  %v2474_v56 = vperm.slane %v2175_v27, %v4933_v35  ;;  %v2497_v0 = vperm.slane %v2212_v46, %v5077_v51 }
 0x2d9   : > { %v2172_v23 = vpop.xlane.xlu1 %2171 }
 0x2da   : > { %v2473_v38 = vperm.slane %v2172_v23, %v6436_v63 }
 0x2db   : > { %2727 = vrot.lane.b32.xlu2 %v2722_v5, %s3825_s28 }
 0x2dc   : > { %v2475_v10 = vsel %vm1419_vm14, %v2474_v56, %v2473_v38  ;;  %v2255_v12 = vpop.xlane.xlu0 %2254  ;;  %vm2945_vm14 = vcmask 1043456   ;;  %v2878_v23 = vld.sshfl [vmem:[#allocation1] sm:$0xff pattern:$0x75316420] }
 0x2dd   : > { %v2478_v6 = vsel %vm1041_vm12, %v2475_v10, %v2477_v26  ;;  %2704 = vrot.lane.b32.xlu0 %v6610_v14, %s3826_s29  ;;  %v2522_v41 = vperm.slane %v2255_v12, %v4968_v47  ;;  %v5975_v56 = vld.sshfl [vmem:[#allocation1 + $0x8] sm:$0xff pattern:$0x75316420] }
 0x2de   : > { %v2246_v4 = vpop.xlane.xlu2 %2245 }
 0x2df   : > { %v2518_v19 = vperm.slane %v2246_v4, %v4959_v13 }
 0x2e1   : > { %v2215_v45 = vpop.xlane.xlu1 %2214  ;;  %v2520_v5 = vsel %vm1473_vm15, %v2519_v30, %v2518_v19 }
 0x2e2   : > { %v2498_v35 = vperm.slane %v2215_v45, %v5322_v50  ;;  %v2525_v31 = vsel %vm1038_vm13, %v2520_v5, %v2524_v15  ;;  %v6611_v45 = vld [vmem:[#allocation57_spill] sm:$0xff] }
 0x2e4   : > { %v2499_v26 = vsel %vm1446_vm6, %v2498_v35, %v2497_v0  ;;  %v5954_v46 = vpop.xlane.xlu0 %2322  ;;  %v6612_v0 = vld [vmem:[#allocation58_spill] sm:$0xff]  ;;  %vm6622_vm6 = vcmask 31744  }
 0x2e5   : > { %v2502_v32 = vsel %vm1041_vm12, %v2499_v26, %v2501_v52  ;;  %2820 = vrot.lane.b32.xlu0 %v2816_v60, %s3827_s24  ;;  %v6613_v30 = vmax.f32 %v6611_v45, %v6612_v0 }
 0x2e6   : > { %v2648_v51 = vsel %vm1623_vm7, %v2478_v6, %v2502_v32  ;;  %v2252_v50 = vpop.xlane.xlu2 %2251  ;;  %vm6623_vm7 = vmmov %vm6622_vm6 }
 0x2e7   : > { %v2521_v29 = vperm.slane %v2252_v50, %v4959_v13  ;;  %v2946_v13 = vsel %vm2945_vm14, %v2942_v24, %v2944_v40  ;;  %v6615_v50 = vld [vmem:[#allocation60_spill] sm:$0xff] }
 0x2e8   : > { %v2948_v52 = vmul.f32 %v2946_v13, %v6605_v20 }
 0x2e9   : > { %v2283_v18 = vpop.xlane.xlu1 %2282  ;;  %v2523_v17 = vsel %vm1473_vm15, %v2522_v41, %v2521_v29  ;;  %vm6617_vm15 = vcmask 654336  }
 0x2ea   : > { %v2540_v55 = vperm.slane %v2283_v18, %v4990_v59  ;;  %v2526_v21 = vsel %vm1041_vm12, %v2523_v17, %v2525_v31  ;;  %2952 = vst [vmem:[#allocation1] ss:$2 sm:$0xff] %v2948_v52  ;;  %v6616_v18 = vmax.f32 %v6614_v33, %v6615_v50 }
 0x2eb   : > { %v2649_v47 = vsel %vm1625_vm8, %v2648_v51, %v2526_v21  ;;  %vm6624_vm8 = vmmov %vm6622_vm6 }
 0x2ec   : > { %v2541_v1 = vsel %vm1500_vm0, %v2540_v55, %v2539_v34  ;;  %v2326_v44 = vpop.xlane.xlu0 %2325 }
 0x2ed   : > { %v2548_v28 = vsel %vm1035_vm11, %v2541_v1, %v5858_v48  ;;  %2882 = vrot.lane.b32.xlu0 %v2878_v23, %s3828_s18  ;;  %v2564_v1 = vperm.slane %v5954_v46, %v6539_v7 }
 0x2ee   : > { %v2289_v9 = vpop.xlane.xlu2 %2288 }
 0x2ef   : > { %v2543_v37 = vperm.slane %v2289_v9, %v4990_v59 }
 0x2f1   : > { %v2286_v15 = vpop.xlane.xlu1 %2285  ;;  %v5978_v2 = vld.sshfl [vmem:[#allocation1] sm:$0xff pattern:$0x75316420]  ;;  %v5980_v12 = vld.sshfl [vmem:[#allocation1 + $0x8] sm:$0xff pattern:$0x75316420] }
 0x2f2   : > { %v2542_v48 = vperm.slane %v2286_v15, %v4981_v16  ;;  %2996 = vst [vmem:[#allocation1] ss:$2 sm:$0xff] %v6605_v20 }
 0x2f4   : > { %v2544_v58 = vsel %vm1500_vm0, %v2543_v37, %v2542_v48  ;;  %v2332_v38 = vpop.xlane.xlu0 %2331 }
 0x2f5   : > { %v2549_v27 = vsel %vm1038_vm13, %v2544_v58, %v2548_v28  ;;  %v2566_v28 = vperm.slane %v2326_v44, %v6538_v54  ;;  %v2569_v9 = vperm.slane %v2332_v38, %v6538_v54 }
 0x2f6   : > { %v2320_v10 = vpop.xlane.xlu2 %2319 }
 0x2f7   : > { %v2563_v55 = vperm.slane %v2320_v10, %v6538_v54 }
 0x2f9   : > { %v2292_v6 = vpop.xlane.xlu1 %2291  ;;  %v2997_v32 = vld.sshfl [vmem:[#allocation1] sm:$0xff pattern:$0x75316420]  ;;  %v2998_v51 = vld.sshfl [vmem:[#allocation1 + $0x8] sm:$0xff pattern:$0x75316420]  ;;  %v2565_v13 = vsel %vm1527_vm3, %v2564_v1, %v2563_v55 }
 0x2fa   : > { %v2545_v35 = vperm.slane %v2292_v6, %v4981_v16  ;;  %3001 = vrot.lane.b32.xlu0 %v2997_v32, %s3829_s14  ;;  %3058 = vst [vmem:[#allocation1] ss:$2 sm:$0xff] %v6605_v20  ;;  %v2572_v44 = vsel %vm1035_vm11, %v2565_v13, %v5875_v3 }
 0x2fc   : > { %v2369_v5 = vpop.xlane.xlu0 %2368 }
 0x2fe   : > { %v2295_v4 = vpop.xlane.xlu2 %2294 }
 0x2ff   : > { %v2546_v53 = vperm.slane %v2295_v4, %v4990_v59 }
 0x301   : > { %1403 = vmax.xlane.f32.xlu1 %v6613_v30  ;;  %v2329_v19 = vpop.xlane.xlu1 %2328  ;;  %v2547_v26 = vsel %vm1500_vm0, %v2546_v53, %v2545_v35  ;;  %v3059_v41 = vld.sshfl [vmem:[#allocation1] sm:$0xff pattern:$0x75316420]  ;;  %v3060_v29 = vld.sshfl [vmem:[#allocation1 + $0x8] sm:$0xff pattern:$0x75316420] }
 0x302   : > { %v2550_v31 = vsel %vm1041_vm12, %v2547_v26, %v2549_v27  ;;  %3003 = vrot.lane.b32.xlu0 %v2998_v51, %s3829_s14  ;;  %3120 = vst [vmem:[#allocation1] ss:$2 sm:$0xff] %v6605_v20  ;;  %v2567_v17 = vperm.slane %v2329_v19, %v6539_v7  ;;  %vm2706_vm0 = vcmp.lt.s32.totalorder %v6436_v63, 34 }
 0x303   : > { %v2650_v14 = vsel %vm1627_vm9, %v2649_v47, %v2550_v31  ;;  %vm3005_vm9 = vcmp.lt.s32.totalorder %v6436_v63, 126 }
 0x304   : > { %1406 = vmax.xlane.f32.xlu2 %v6616_v18  ;;  %v2400_v59 = vpop.xlane.xlu0 %2399  ;;  %v2568_v48 = vsel %vm1527_vm3, %v2567_v17, %v2566_v28 }
 0x305   : > { %v2573_v27 = vsel %vm1038_vm13, %v2568_v48, %v2572_v44  ;;  %v6059_v48 = vld [vmem:[%s6210_s8] ss:$0 sm:$0xff] }
 0x306   : > { %v2363_v16 = vpop.xlane.xlu2 %2362 }
 0x307   : > { %v2588_v60 = vperm.slane %v2363_v16, %v5684_v43 }
 0x309   : > { %v2360_v34 = vpop.xlane.xlu1 %2359  ;;  %v3121_v52 = vld.sshfl [vmem:[#allocation1] sm:$0xff pattern:$0x75316420]  ;;  %v3122_v37 = vld.sshfl [vmem:[#allocation1 + $0x8] sm:$0xff pattern:$0x75316420] }
 0x30a   : > { %v2587_v47 = vperm.slane %v2360_v34, %v5688_v36  ;;  %3182 = vst [vmem:[#allocation1] ss:$2 sm:$0xff] %v6605_v20  ;;  %3065 = vrot.lane.b32.xlu0 %v3060_v29, %s3830_s15 }
 0x30c   : > { %v2375_v58 = vpop.xlane.xlu0 %2374  ;;  %v2589_v54 = vsel %vm1554_vm10, %v2588_v60, %v2587_v47 }
 0x30d   : > { %v2594_v20 = vperm.slane %v2375_v58, %v5684_v43  ;;  %v2596_v3 = vsel %vm1035_vm11, %v2589_v54, %v5855_v62 }
 0x30e   : > { %v2366_v24 = vpop.xlane.xlu2 %2365 }
 0x30f   : > { %v2590_v15 = vperm.slane %v2366_v24, %v5688_v36 }
 0x311   : > { %v2335_v40 = vpop.xlane.xlu1 %2334  ;;  %v3183_v51 = vld.sshfl [vmem:[#allocation1] sm:$0xff pattern:$0x75316420]  ;;  %v3184_v33 = vld.sshfl [vmem:[#allocation1 + $0x8] sm:$0xff pattern:$0x75316420] }
 0x312   : > { %v2570_v21 = vperm.slane %v2335_v40, %v6539_v7  ;;  %v2591_v7 = vperm.slane %v2369_v5, %v5684_v43  ;;  %3187 = vrot.lane.b32.xlu0 %v3183_v51, %s3832_s26 }
 0x314   : > { %v2571_v46 = vsel %vm1527_vm3, %v2570_v21, %v2569_v9  ;;  %v2592_v23 = vsel %vm1554_vm10, %v2591_v7, %v2590_v15  ;;  %v2443_v43 = vpop.xlane.xlu0 %2442 }
 0x315   : > { %v2574_v6 = vsel %vm1041_vm12, %v2571_v46, %v2573_v27  ;;  %v2597_v45 = vsel %vm1038_vm13, %v2592_v23, %v2596_v3  ;;  %v2636_v21 = vperm.slane %v2443_v43, %v6553_v61 }
 0x316   : > { %v2372_v38 = vpop.xlane.xlu2 %2371  ;;  %v2651_v19 = vsel %vm1629_vm2, %v2650_v14, %v2574_v6  ;;  %v2611_v14 = vperm.slane %v2400_v59, %v6549_v57  ;;  %vm1635_vm2 = vcmask 916480  }
 0x317   : > { %v2593_v4 = vperm.slane %v2372_v38, %v5688_v36 }
 0x319   : > { %v2403_v10 = vpop.xlane.xlu1 %2402  ;;  %v2595_v0 = vsel %vm1554_vm10, %v2594_v20, %v2593_v4  ;;  %vm2886_vm10 = vcmp.lt.s32.totalorder %v6436_v63, 2 }
 0x31a   : > { %2822 = vrot.lane.b32.xlu1 %v5965_v39, %s3827_s24  ;;  %v2598_v30 = vsel %vm1041_vm12, %v2595_v0, %v2597_v45  ;;  %v2612_v26 = vperm.slane %v2403_v10, %v6550_v42 }
 0x31b   : > { %v2652_v35 = vsel %vm6617_vm15, %v2651_v19, %v2598_v30  ;;  %vm2824_vm15 = vcmp.lt.s32.totalorder %v6436_v63, 30 }
 0x31c   : > { %2884 = vrot.lane.b32.xlu2 %v5975_v56, %s3828_s18  ;;  %v2446_v5 = vpop.xlane.xlu0 %2445  ;;  %v2613_v56 = vsel %vm1581_vm4, %v2612_v26, %v2611_v14 }
 0x31d   : > { %v2620_v29 = vsel %vm1035_vm11, %v2613_v56, %v5892_v25 }
 0x31e   : > { %v2409_v36 = vpop.xlane.xlu2 %2408 }
 0x31f   : > { %v2615_v31 = vperm.slane %v2409_v36, %v6550_v42  ;;  %v2709_v36 = vld [vmem:[%s6211_s9] sm:$0x3] }
 0x321   : > { %v2406_v53 = vpop.xlane.xlu1 %2405 }
 0x322   : > { %3063 = vrot.lane.b32.xlu1 %v3059_v41, %s3830_s15  ;;  %v2614_v32 = vperm.slane %v2406_v53, %v6549_v57  ;;  %v2711_v53 = vperm.slane %v2709_v36, 0  ;;  %s6078_s15 = scalar_lea.vmem %s6208_s6, %s3984_s13 }
 0x324   : > { %3125 = vrot.lane.b32.xlu2 %v3121_v52, %s3831_s16  ;;  %v2616_v50 = vsel %vm1581_vm4, %v2615_v31, %v2614_v32  ;;  %v2455_v24 = vpop.xlane.xlu0 %2454 }
 0x325   : > { %v2621_v55 = vsel %vm1038_vm13, %v2616_v50, %v2620_v29  ;;  %v2642_v47 = vperm.slane %v2455_v24, %v6553_v61 }
 0x326   : > { %v2440_v62 = vpop.xlane.xlu2 %2439 }
 0x327   : > { %v2635_v59 = vperm.slane %v2440_v62, %v6552_v11  ;;  %v2712_v62 = vperm.slane %v2709_v36, 1 }
 0x329   : > { %v2412_v39 = vpop.xlane.xlu1 %2411  ;;  %v2637_v28 = vsel %vm1608_vm5, %v2636_v21, %v2635_v59 }
 0x32a   : > { %3127 = vrot.lane.b32.xlu1 %v3122_v37, %s3831_s16  ;;  %v2617_v16 = vperm.slane %v2412_v39, %v6549_v57  ;;  %v2644_v9 = vsel %vm1035_vm11, %v2637_v28, %v5912_v22  ;;  %v3568_v22 = vld [vmem:[%s6211_s9 + $0x2] sm:$0x3]  ;;  %vm6618_vm11 = vcmask 1041408  }
 0x32b   : > { %v2735_v27 = vperm.slane %v3568_v22, 0  ;;  %v2736_v23 = vperm.slane %v3568_v22, 1  ;;  %vm6620_vm3 = vmmov %vm6618_vm11 }
 0x32c   : > { %3189 = vrot.lane.b32.xlu2 %v3184_v33, %s3832_s26  ;;  %v3569_v33 = vld [vmem:[%s6078_s15 + $0x2] sm:$0x3]  ;;  %vm6627_vm14 = vmmov %vm6620_vm3 }
 0x32e   : > { %v2415_v18 = vpop.xlane.xlu2 %2414 }
 0x32f   : > { %v2618_v34 = vperm.slane %v2415_v18, %v6550_v42  ;;  %v2638_v42 = vperm.slane %v2446_v5, %v6552_v11  ;;  %v6085_v18 = vld [vmem:[%s6078_s15] sm:$0x3] }
 0x331   : > { %v2449_v41 = vpop.xlane.xlu1 %2448  ;;  %v2619_v40 = vsel %vm1581_vm4, %v2618_v34, %v2617_v16  ;;  %vm6621_vm4 = vmmov %vm6620_vm3 }
 0x332   : > { %v2639_v17 = vperm.slane %v2449_v41, %v6553_v61  ;;  %v2622_v1 = vsel %vm1041_vm12, %v2619_v40, %v2621_v55  ;;  %v3586_v40 = vld [vmem:[%s6211_s9 + $0xa] sm:$0x3] }
 0x333   : > { %v2653_v57 = vsel %vm1633_vm1, %v2652_v35, %v2622_v1  ;;  %vm2729_vm1 = vcmp.lt.s32.totalorder %v6436_v63, 32  ;;  %v3578_v1 = vld [vmem:[%s6211_s9 + $0x6] sm:$0x3]  ;;  %v3012_v22 = vperm.slane %v3586_v40, 1 }
 0x334   : > { %v2640_v25 = vsel %vm1608_vm5, %v2639_v17, %v2638_v42  ;;  %v2892_v42 = vperm.slane %v3578_v1, 0  ;;  %v2893_v28 = vperm.slane %v3578_v1, 1 }
 0x335   : > { %v2645_v52 = vsel %vm1038_vm13, %v2640_v25, %v2644_v9  ;;  %vm6619_vm13 = vmmov %vm6618_vm11 }
 0x336   : > { %v2452_v60 = vpop.xlane.xlu2 %2451 }
 0x337   : > { %v2641_v13 = vperm.slane %v2452_v60, %v6552_v11  ;;  %v2659_v37 = vpop.permute.xlu0 %2658 }
 0x339   : > { %v2643_v15 = vsel %vm1608_vm5, %v2642_v47, %v2641_v13 }
 0x33a   : > { %v2646_v58 = vsel %vm1041_vm12, %v2643_v15, %v2645_v52 }
 0x33b   : > { %v2654_v7 = vsel %vm1635_vm2, %v2653_v57, %v2646_v58  ;;  %v3011_v57 = vperm.slane %v3586_v40, 0 }
 0x33c   : > { %v2661_v46 = vadd.f32 %v2659_v37, %v2654_v7 }
 0x33e   : > { %v2662_v44 = vmul.f32 %v6059_v48, %v2661_v46  ;;  %v2728_v10 = vpop.permute.xlu2 %2727 }
 0x33f   : > { %v1641_v38 = vpop.permute.xlu0 %1640 }
 0x340   : > { %v2664_v54 = vpack.c.bf16 %v2662_v44, %v2662_v44  ;;  %v3574_v44 = vld [vmem:[%s6211_s9 + $0x4] sm:$0x3] }
 0x342   : > { %2672 = vmatpush.bf16.xpose.msrb.mxu0 %v2664_v54 }
 0x347   : > { %v2703_v43 = vpop.permute.xlu0 %2702 }
 0x349   : > { %v2726_v6 = vpop.permute.xlu1 %2725 }
 0x34a   : > { %v2730_v20 = vsel %vm2729_vm1, %v2726_v6, %v2728_v10  ;;  %v2731_v4 = vsel %vm2729_vm1, %v2728_v10, %v2726_v6  ;;  %v2830_v10 = vperm.slane %v3574_v44, 0  ;;  %v2831_v6 = vperm.slane %v3574_v44, 1  ;;  %vm6629_vm1 = vmmov %vm6620_vm3 }
 0x34b   : > { %v2739_v3 = vmul.f32 %v2735_v27, %v2731_v4  ;;  %v2740_v45 = vmul.f32 %v2736_v23, %v2730_v20  ;;  %v6115_v23 = vld [vmem:[%s6078_s15 + $0x6] sm:$0x3] }
 0x34d   : > { %v2743_v0 = vpack.c.bf16 %v2739_v3, %v2739_v3  ;;  %v2744_v30 = vpack.c.bf16 %v2740_v45, %v2740_v45 }
 0x34f   : > { %v2749_v19 = vsel %vm6618_vm11, %v2743_v0, 0  ;;  %v2752_v35 = vsel %vm6619_vm13, %v2744_v30, 0  ;;  %v2705_v39 = vpop.permute.xlu0 %2704  ;;  %v2957_v0 = vpack.c.bf16 %v5978_v2, %v5978_v2  ;;  %v2958_v30 = vpack.c.bf16 %v5980_v12, %v5980_v12  ;;  %vm6630_vm11 = vmmov %vm6629_vm1 }
 0x350   : > { %2761 = vmatpush.bf16.msrb.mxu1 %v2749_v19  ;;  %2774 = vmatpush.bf16.msrb.mxu2 %v2752_v35  ;;  %v2707_v5 = vsel %vm2706_vm0, %v2703_v43, %v2705_v39  ;;  %v2708_v26 = vsel %vm2706_vm0, %v2705_v39, %v2703_v43  ;;  %v3590_v43 = vld [vmem:[%s6211_s9 + $0xc] sm:$0x3]  ;;  %vm3067_vm13 = vcmp.lt.s32.totalorder %v6436_v63, 98  ;;  %vm6631_vm0 = vmmov %vm6629_vm1 }
 0x351   : > { %v2715_v31 = vmul.f32 %v2711_v53, %v2708_v26  ;;  %v2716_v32 = vmul.f32 %v2712_v62, %v2707_v5  ;;  %v2963_v39 = vsel %vm6629_vm1, %v2957_v0, 0  ;;  %v2966_v5 = vsel %vm6630_vm11, %v2958_v30, 0 }
 0x352   : > { %v3073_v26 = vperm.slane %v3590_v43, 0 }
 0x353   : > { %v2718_v51 = vpack.c.bf16 %v2715_v31, %v2715_v31  ;;  %v2719_v14 = vpack.c.bf16 %v2716_v32, %v2716_v32  ;;  %3570 = vmatmul.msk.bf16.vlgmr.msrb.gmra.mxu1 %vm6622_vm6, %v3569_v33  ;;  %3571 = vmatmul.msk.bf16.vlgmr.msrb.gmra.mxu2 %vm6623_vm7, %v3569_v33  ;;  %v3074_v31 = vperm.slane %v3590_v43, 1 }
 0x355   : > { %v2784_v56 = vsel %vm6620_vm3, %v2718_v51, 0  ;;  %v2787_v50 = vsel %vm6621_vm4, %v2719_v14, 0  ;;  %v3575_v51 = vld [vmem:[%s6078_s15 + $0x4] sm:$0x3]  ;;  %vm6633_vm4 = vmmov %vm6631_vm0 }
 0x356   : > { %2796 = vmatpush.bf16.msrb.mxu3 %v2784_v56  ;;  %2809 = vmatpush.bf16.msra.mxu0 %v2787_v50 }
 0x357   : > { %v2821_v16 = vpop.permute.xlu0 %2820 }
 0x359   : > { %3572 = vmatmul.msk.bf16.vlgmr.msrb.gmra.mxu3 %vm6624_vm8, %v6085_v18 }
 0x35f   : > { %v2883_v34 = vpop.permute.xlu0 %2882 }
 0x36c   : > { %v3002_v29 = vpop.permute.xlu0 %3001 }
 0x374   : > { %v1404_v41 = vpop.xlane.xlu1 %1403  ;;  %v3004_v25 = vpop.permute.xlu0 %3003 }
 0x375   : > { %v1616_v59 = vperm.slane %v1404_v41, %v6552_v11  ;;  %v3006_v60 = vsel %vm3005_vm9, %v3002_v29, %v3004_v25 }
 0x376   : > { %v3015_v9 = vmul.f32 %v3011_v57, %v3006_v60 }
 0x377   : > { %v1407_v55 = vpop.xlane.xlu2 %1406 }
 0x378   : > { %v1617_v24 = vperm.slane %v1407_v55, %v6553_v61 }
 0x37a   : > { %v1618_v17 = vsel %vm1608_vm5, %v1617_v24, %v1616_v59  ;;  %vm6626_vm5 = vmmov %vm6620_vm3  ;;  %v3587_v24 = vld [vmem:[%s6078_s15 + $0xa] sm:$0x3] }
 0x37b   : > { %v1621_v21 = vsel %vm1041_vm12, %v1618_v17, %v5808_v49  ;;  %vm6625_vm12 = vmmov %vm6620_vm3 }
 0x37c   : > { %v1636_v11 = vsel %vm1635_vm2, %v5872_v8, %v1621_v21  ;;  %v3019_v8 = vpack.c.bf16 %v3015_v9, %v3015_v9  ;;  %vm6628_vm2 = vmmov %vm6622_vm6  ;;  %v3066_v32 = vpop.permute.xlu0 %3065  ;;  %v3598_v21 = vld [vmem:[%s6211_s9 + $0x10] sm:$0x3] }
 0x37d   : > { %v1643_v61 = vadd.f32 %v1641_v38, %v1636_v11  ;;  %v3007_v38 = vsel %vm3005_vm9, %v3004_v25, %v3002_v29  ;;  %vm6632_vm3 = vmmov %vm6631_vm0  ;;  %v3594_v29 = vld [vmem:[%s6211_s9 + $0xe] sm:$0x3]  ;;  %vm3129_vm9 = vcmp.lt.s32.totalorder %v6436_v63, 96  ;;  %v3197_v60 = vperm.slane %v3598_v21, 0 }
 0x37e   : > { %v3025_v54 = vsel %vm6625_vm12, %v3019_v8, 0  ;;  %v3016_v4 = vmul.f32 %v3012_v22, %v3007_v38  ;;  %vm6634_vm6 = vmmov %vm6628_vm2  ;;  %v3135_v40 = vperm.slane %v3594_v29, 0  ;;  %v3136_v17 = vperm.slane %v3594_v29, 1  ;;  %v3595_v22 = vld [vmem:[%s6078_s15 + $0xe] sm:$0x3] }
 0x37f   : > { %v1647_v47 = vmul.f32 %v6059_v48, %v1643_v61  ;;  %v2885_v13 = vpop.permute.xlu2 %2884  ;;  %vm6635_vm7 = vmmov %vm6628_vm2 }
 0x380   : > { %v2887_v49 = vsel %vm2886_vm10, %v2883_v34, %v2885_v13  ;;  %v2888_v15 = vsel %vm2886_vm10, %v2885_v13, %v2883_v34  ;;  %v3020_v62 = vpack.c.bf16 %v3016_v4, %v3016_v4  ;;  %vm6636_vm8 = vmmov %vm6628_vm2 }
 0x381   : > { %v2663_v52 = vpack.c.bf16 %v1647_v47, %v1647_v47  ;;  %v2896_v37 = vmul.f32 %v2892_v42, %v2888_v15  ;;  %v2897_v58 = vmul.f32 %v2893_v28, %v2887_v49  ;;  %vm6637_vm10 = vmmov %vm6631_vm0  ;;  %v3198_v47 = vperm.slane %v3598_v21, 1 }
 0x382   : > { %v3028_v56 = vsel %vm6633_vm4, %v3020_v62, 0  ;;  %vm6638_vm12 = vmmov %vm6631_vm0 }
 0x383   : > { %2673 = vmatmul.bf16.vlgmr.msrb.gmra.mxu0 %v2663_v52  ;;  %v2900_v7 = vpack.c.bf16 %v2896_v37, %v2896_v37  ;;  %v2901_v46 = vpack.c.bf16 %v2897_v58, %v2897_v58 }
 0x384   : > { %v3188_v49 = vpop.permute.xlu0 %3187 }
 0x385   : > { %v2906_v48 = vsel %vm6626_vm5, %v2900_v7, 0  ;;  %v2909_v27 = vsel %vm6627_vm14, %v2901_v46, 0  ;;  %vm6639_vm5 = vmmov %vm6628_vm2  ;;  %vm3191_vm14 = vcmp.lt.s32.totalorder %v6436_v63, 94  ;;  %v3583_v7 = vld [vmem:[%s6078_s15 + $0x8] sm:$0x3] }
 0x386   : > { %2918 = vmatpush.bf16.msra.mxu3 %v2906_v48  ;;  %2931 = vmatpush.bf16.msrb.mxu0 %v2909_v27  ;;  %vm6642_vm1 = vmmov %vm6639_vm5  ;;  %v3591_v27 = vld [vmem:[%s6078_s15 + $0xc] sm:$0x3] }
 0x387   : > { %vm6643_vm11 = vmmov %vm6642_vm1 }
 0x388   : > { %vm6646_vm4 = vmmov %vm6642_vm1 }
 0x389   : > { %3580 = vmatmul.msk.bf16.vlgmr.msra.gmra.mxu3 %vm6628_vm2, %v6115_v23  ;;  %vm6641_vm2 = vmmov %vm6631_vm0 }
 0x38a   : > { %3037 = vmatpush.bf16.msrb.mxu3 %v3025_v54 }
 0x38c   : > { %v2823_v20 = vpop.permute.xlu1 %2822 }
 0x38d   : > { %v2825_v3 = vsel %vm2824_vm15, %v2821_v16, %v2823_v20  ;;  %v2826_v45 = vsel %vm2824_vm15, %v2823_v20, %v2821_v16  ;;  %v3126_v16 = vpop.permute.xlu2 %3125  ;;  %vm6640_vm15 = vmmov %vm6631_vm0 }
 0x38e   : > { %v2834_v19 = vmul.f32 %v2830_v10, %v2826_v45  ;;  %v2835_v35 = vmul.f32 %v2831_v6, %v2825_v3 }
 0x390   : > { %v2838_v36 = vpack.c.bf16 %v2834_v19, %v2834_v19  ;;  %v2839_v53 = vpack.c.bf16 %v2835_v35, %v2835_v35 }
 0x392   : > { %v2844_v2 = vsel %vm6631_vm0, %v2838_v36, 0  ;;  %v2847_v12 = vsel %vm6632_vm3, %v2839_v53, 0  ;;  %vm6645_vm3 = vmmov %vm6642_vm1 }
 0x393   : > { %2856 = vmatpush.bf16.msra.mxu1 %v2844_v2  ;;  %2869 = vmatpush.bf16.msra.mxu2 %v2847_v12 }
 0x394   : > { %v3064_v14 = vpop.permute.xlu1 %3063  ;;  %3573 = vmatmul.msk.bf16.vlgmr.msra.gmra.mxu0 %vm6634_vm6, %v6085_v18  ;;  %vm6647_vm6 = vmmov %vm6642_vm1 }
 0x395   : > { %v3068_v33 = vsel %vm3067_vm13, %v3064_v14, %v3066_v32  ;;  %v3069_v50 = vsel %vm3067_vm13, %v3066_v32, %v3064_v14  ;;  %3050 = vmatpush.bf16.msra.mxu0 %v3028_v56  ;;  %v3190_v25 = vpop.permute.xlu2 %3189  ;;  %vm6644_vm13 = vmmov %vm6631_vm0 }
 0x396   : > { %3576 = vmatmul.msk.bf16.vlgmr.msra.gmra.mxu1 %vm6635_vm7, %v3575_v51  ;;  %v3077_v34 = vmul.f32 %v3073_v26, %v3068_v33  ;;  %v3078_v41 = vmul.f32 %v3074_v31, %v3069_v50  ;;  %3577 = vmatmul.msk.bf16.vlgmr.msra.gmra.mxu2 %vm6636_vm8, %v3575_v51  ;;  %v3192_v15 = vsel %vm3191_vm14, %v3188_v49, %v3190_v25  ;;  %vm6648_vm7 = vmmov %vm6642_vm1 }
 0x397   : > { %2975 = vmatpush.bf16.msrb.mxu1 %v2963_v39  ;;  %2988 = vmatpush.bf16.msrb.mxu2 %v2966_v5  ;;  %v3193_v52 = vsel %vm3191_vm14, %v3190_v25, %v3188_v49  ;;  %v3201_v58 = vmul.f32 %v3197_v60, %v3192_v15  ;;  %vm6649_vm8 = vmmov %vm6642_vm1 }
 0x398   : > { %v3081_v55 = vpack.c.bf16 %v3077_v34, %v3077_v34  ;;  %v3082_v59 = vpack.c.bf16 %v3078_v41, %v3078_v41  ;;  %v3202_v8 = vmul.f32 %v3198_v47, %v3193_v52 }
 0x399   : > { %3588 = vmatmul.msk.bf16.vlgmr.msrb.gmra.mxu3 %vm6639_vm5, %v3587_v24  ;;  %v3205_v46 = vpack.c.bf16 %v3201_v58, %v3201_v58 }
 0x39a   : > { %v3087_v18 = vsel %vm6637_vm10, %v3081_v55, 0  ;;  %v3090_v1 = vsel %vm6638_vm12, %v3082_v59, 0  ;;  %v3206_v44 = vpack.c.bf16 %v3202_v8, %v3202_v8  ;;  %vm6651_vm10 = vmmov %vm6642_vm1 }
 0x39b   : > { %3099 = vmatpush.bf16.msra.mxu1 %v3087_v18  ;;  %3112 = vmatpush.bf16.msra.mxu2 %v3090_v1  ;;  %v3211_v54 = vsel %vm6644_vm13, %v3205_v46, 0  ;;  %vm6652_vm12 = vmmov %vm6642_vm1 }
 0x39c   : > { %v3128_v57 = vpop.permute.xlu1 %3127  ;;  %v3214_v48 = vsel %vm6631_vm0, %v3206_v44, 0  ;;  %vm6655_vm13 = vmmov %vm6631_vm0 }
 0x39d   : > { %v3130_v11 = vsel %vm3129_vm9, %v3126_v16, %v3128_v57  ;;  %v3131_v61 = vsel %vm3129_vm9, %v3128_v57, %v3126_v16  ;;  %vm6650_vm9 = vmmov %vm6642_vm1 }
 0x39e   : > { %v3139_v42 = vmul.f32 %v3135_v40, %v3130_v11  ;;  %v3140_v28 = vmul.f32 %v3136_v17, %v3131_v61 }
 0x3a0   : > { %v3143_v13 = vpack.c.bf16 %v3139_v42, %v3139_v42  ;;  %v3144_v9 = vpack.c.bf16 %v3140_v28, %v3140_v28 }
 0x3a2   : > { %v3149_v37 = vsel %vm6640_vm15, %v3143_v13, 0  ;;  %v3152_v63 = vsel %vm6641_vm2, %v3144_v9, 0 }
 0x3a3   : > { %3161 = vmatpush.bf16.msra.mxu3 %v3149_v37 }
 0x3a4   : > { %3581 = vmatmul.msk.bf16.vlgmr.msrb.gmra.mxu0 %vm6642_vm1, %v6115_v23  ;;  %v3599_v23 = vld [vmem:[%s6078_s15 + $0x10] sm:$0x3]  ;;  %vm6653_vm1 = vmmov %vm6631_vm0  ;;  %s3510_s15 = sshll.u32 %s3798_s17, 1 }
 0x3a5   : > { %3174 = vmatpush.bf16.msrb.mxu0 %v3152_v63  ;;  %vm6656_vm0 = vmmov %vm6645_vm3  ;;  %p539_p7 = scmp.lt.s32.totalorder %s3510_s15, 3 }
 0x3a6   : > { %3584 = vmatmul.msk.bf16.vlgmr.msrb.gmra.mxu1 %vm6643_vm11, %v3583_v7  ;;  %3585 = vmatmul.msk.bf16.vlgmr.msrb.gmra.mxu2 %vm6645_vm3, %v3583_v7  ;;  %vm6654_vm11 = vmmov %vm6645_vm3 }
 0x3a7   : > { %3223 = vmatpush.bf16.msrb.mxu1 %v3211_v54  ;;  %3236 = vmatpush.bf16.msrb.mxu2 %v3214_v48  ;;  %s6673_s15 = smov (!%p539_p7, %s3510_s15), 3  ;;  %vm6658_vm3 = vmmov %vm6653_vm1 }
 0x3a8   : > { %s3514_s16 = sshll.u32 %s6673_s15, 1  ;;  %s542_s29 = sadd.s32 %s3932_s25, %s6673_s15 }
 0x3a9   : > { %3596 = vmatmul.msk.bf16.vlgmr.msra.gmra.mxu3 %vm6646_vm4, %v3595_v22  ;;  %s550_s28 = scalar_lea.vmem %s6213_s11, %s3514_s16  ;;  %s3512_s30 = sshll.u32 %s542_s29, 1  ;;  %vm6659_vm4 = vmmov %vm6653_vm1 }
 0x3aa   : > { %s544_s24 = scalar_lea.vmem %s6212_s10, %s3512_s30 }
 0x3b4   : > { %3589 = vmatmul.msk.bf16.vlgmr.msra.gmra.mxu0 %vm6647_vm6, %v3587_v24 }
 0x3b6   : > { %3592 = vmatmul.msk.bf16.vlgmr.msra.gmra.mxu1 %vm6648_vm7, %v3591_v27  ;;  %3593 = vmatmul.msk.bf16.vlgmr.msra.gmra.mxu2 %vm6649_vm8, %v3591_v27 }
 0x3c4   : > { %3597 = vmatmul.msk.bf16.vlgmr.msrb.gmra.mxu0 %vm6650_vm9, %v3595_v22 }
 0x3c6   : > { %3600 = vmatmul.msk.bf16.vlgmr.msrb.gmra.mxu1 %vm6651_vm10, %v3599_v23  ;;  %3601 = vmatmul.msk.bf16.vlgmr.msrb.gmra.mxu2 %vm6652_vm12, %v3599_v23 }
 0x3d0   : > { %v2763_v38 = vpop.f32.mrf.mxu1 }
 0x3d6   : > { %v2776_v10 = vpop.f32.mrf.mxu2 }
 0x3d8   : > { %v2765_v6 = vpop.f32.mrf.mxu1 }
 0x3dc   : > { %v2798_v4 = vpop.f32.mrf.mxu3 }
 0x3dd   : > { %v2799_v16 = vadd.f32 %v2798_v4, %v2763_v38 }
 0x3de   : > { %v2778_v20 = vpop.f32.mrf.mxu2 }
 0x3e4   : > { %v2800_v45 = vpop.f32.mrf.mxu3 }
 0x400   : > { %v2674_v3 = vpop.f32.mrf.mxu0 }
 0x401   : > { %v3567_v36 = vmul.f32 -1.442695, %v2674_v3 }
 0x403   : > { %3747 = vpow2.f32 %v3567_v36 }
 0x408   : > { %v2676_v0 = vpop.f32.mrf.mxu0 }
 0x409   : > { %v3748_v31 = vpop.eup %3747 }
 0x40a   : > { %v2681_v32 = vadd.f32 1.0, %v3748_v31 }
 0x40c   : > { %v2920_v30 = vpop.f32.mrf.mxu3  ;;  %3749 = vrcp.f32 %v2681_v32  ;;  %v2693_v13 = vand.u32 2147483648, %v2681_v32  ;;  %vm2687_vm14 = vweird.f32 %v2681_v32  ;;  %v2691_v49 = vand.u32 2147483647, %v2681_v32 }
 0x40e   : > { %v2694_v46 = vor.u32 1.1754944e-38, %v2693_v13  ;;  %vm2692_vm2 = vcmp.eq.f32.partialorder %v2691_v49, 8.507059e+37 }
 0x411   : > { %v2811_v19 = vpop.f32.mrf.mxu0 }
 0x412   : > { %v3750_v34 = vpop.eup %3749  ;;  %v2812_v28 = vadd.f32 %v2811_v19, %v2776_v10 }
 0x413   : > { %v2858_v35 = vpop.f32.mrf.mxu1  ;;  %v2683_v24 = vmul.f32 %v3750_v34, %v2681_v32  ;;  %vm2688_vm5 = vweird.f32 %v3750_v34 }
 0x414   : > { %v2922_v43 = vpop.f32.mrf.mxu3  ;;  %v2875_v41 = vadd.f32 %v2858_v35, %v2799_v16  ;;  %vm2689_vm15 = vmor %vm2687_vm14, %vm2688_vm5 }
 0x415   : > { %v2684_v18 = vsub.f32 1.0, %v2683_v24 }
 0x416   : > { %v2937_v40 = vadd.f32 %v2920_v30, %v2875_v41  ;;  %v6657_v30 = vld [vmem:[#allocation6_spill] sm:$0xff] }
 0x417   : > { %v2685_v61 = vmul.f32 %v3750_v34, %v2684_v18  ;;  %v3290_v19 = vrot.slane %v6657_v30, 2 }
 0x419   : > { %v2871_v53 = vpop.f32.mrf.mxu2  ;;  %v2813_v62 = vpop.f32.mrf.mxu0  ;;  %v2686_v47 = vadd.f32 %v3750_v34, %v2685_v61  ;;  %v3293_v35 = vsel %vm6658_vm3, %v6657_v30, %v3290_v19 }
 0x41a   : > { %v2876_v60 = vadd.f32 %v2871_v53, %v2812_v28  ;;  %3295 = vst [vmem:[%s550_s28] sm:$0xf] %v3293_v35 }
 0x41b   : > { %v2860_v39 = vpop.f32.mrf.mxu1  ;;  %v2690_v7 = vsel %vm2689_vm15, %v3750_v34, %v2686_v47 }
 0x41c   : > { %v3039_v5 = vpop.f32.mrf.mxu3  ;;  %v2695_v22 = vsel %vm2692_vm2, %v2694_v46, %v2690_v7 }
 0x41d   : > { %v3244_v10 = vpack.c.bf16 %v2695_v22, %v2695_v22 }
 0x421   : > { %v2873_v2 = vpop.f32.mrf.mxu2  ;;  %v2933_v12 = vpop.f32.mrf.mxu0 }
 0x422   : > { %v2938_v9 = vadd.f32 %v2933_v12, %v2876_v60 }
 0x423   : > { %v2977_v26 = vpop.f32.mrf.mxu1 }
 0x424   : > { %v3041_v51 = vpop.f32.mrf.mxu3  ;;  %v2994_v1 = vadd.f32 %v2977_v26, %v2937_v40 }
 0x426   : > { %v3056_v42 = vadd.f32 %v3039_v5, %v2994_v1 }
 0x429   : > { %v2990_v14 = vpop.f32.mrf.mxu2  ;;  %v2935_v56 = vpop.f32.mrf.mxu0 }
 0x42a   : > { %v2995_v37 = vadd.f32 %v2990_v14, %v2938_v9 }
 0x42b   : > { %v2979_v33 = vpop.f32.mrf.mxu1 }
 0x42c   : > { %v3163_v50 = vpop.f32.mrf.mxu3 }
 0x431   : > { %v2992_v29 = vpop.f32.mrf.mxu2  ;;  %v3052_v55 = vpop.f32.mrf.mxu0 }
 0x432   : > { %v3057_v44 = vadd.f32 %v3052_v55, %v2995_v37 }
 0x433   : > { %v3101_v59 = vpop.f32.mrf.mxu1 }
 0x434   : > { %v3165_v17 = vpop.f32.mrf.mxu3  ;;  %v3118_v25 = vadd.f32 %v3101_v59, %v3056_v42 }
 0x436   : > { %v3180_v15 = vadd.f32 %v3163_v50, %v3118_v25 }
 0x439   : > { %v3114_v21 = vpop.f32.mrf.mxu2  ;;  %v3054_v57 = vpop.f32.mrf.mxu0 }
 0x43a   : > { %v3119_v48 = vadd.f32 %v3114_v21, %v3057_v44 }
 0x43b   : > { %v3103_v11 = vpop.f32.mrf.mxu1 }
 0x441   : > { %v3116_v52 = vpop.f32.mrf.mxu2  ;;  %v3176_v58 = vpop.f32.mrf.mxu0 }
 0x442   : > { %v3181_v23 = vadd.f32 %v3176_v58, %v3119_v48 }
 0x443   : > { %v3225_v8 = vpop.f32.mrf.mxu1 }
 0x444   : > { %v3242_v63 = vadd.f32 %v3225_v8, %v3180_v15 }
 0x446   : > { %v3245_v54 = vpack.c.bf16 %v3242_v63, %v3242_v63 }
 0x448   : > { %v3251_v27 = vsel %vm6653_vm1, %v3245_v54, 0 }
 0x449   : > { %3263 = vmatpush.bf16.msrb.mxu3 %v3251_v27  ;;  %v3238_v38 = vpop.f32.mrf.mxu2  ;;  %v3178_v20 = vpop.f32.mrf.mxu0 }
 0x44a   : > { %v3243_v6 = vadd.f32 %v3238_v38, %v3181_v23 }
 0x44b   : > { %v3227_v4 = vpop.f32.mrf.mxu1 }
 0x44c   : > { %3602 = vmatmul.msk.bf16.vlgmr.msrb.gmra.mxu3 %vm6654_vm11, %v3244_v10  ;;  %v3246_v3 = vpack.c.bf16 %v3243_v6, %v3243_v6 }
 0x44e   : > { %v3254_v45 = vsel %vm6655_vm13, %v3246_v3, 0 }
 0x44f   : > { %3276 = vmatpush.bf16.msra.mxu0 %v3254_v45 }
 0x451   : > { %v3240_v0 = vpop.f32.mrf.mxu2 }
 0x452   : > { %3603 = vmatmul.msk.bf16.vlgmr.msra.gmra.mxu0 %vm6656_vm0, %v3244_v10 }
 0x4cf   : > { %v3265_v43 = vpop.f32.mrf.mxu3  ;;  %v3278_v36 = vpop.f32.mrf.mxu0 }
 0x4d0   : > { %v3282_v53 = vpack.c.bf16 %v3278_v36, %v3265_v43 }
 0x4d2   : > { %v3284_v62 = vrot.slane %v3282_v53, 2 }
 0x4d4   : > { %v3287_v39 = vsel %vm6659_vm4, %v3282_v53, %v3284_v62 }
 0x4d5   : > { %3289 = vst [vmem:[%s544_s24] sm:$0xf] %v3287_v39 }
 0x4d7   : > { %v3267_v5 = vpop.f32.mrf.mxu3  ;;  %v3280_v2 = vpop.f32.mrf.mxu0 }
 0x4d8 PF: > { %s22_s21 = sadd.s32 1, %s3814_s21   ;;  %s6660_s17 = smov %s3806_s19 }
 0x4d9   : > { %p19_p8 = scmp.ge.s32.totalorder %s22_s21, 6   ;;  %s6661_s18 = smov %s3810_s20 }
 0x4da   : > { %s6662_s19 = smov %s6665_s22  ;;  %s6663_s20 = smov %s6669_s23 }
 0x4db   :  { %21 = sbr.rel (!%p19_p8) target bundleno = 3 (0x3), region = 152 }

</bundles_post_ra>
